<compile_context>
chip_gen: v6e
topology: v6e:2x2x1
jax: 0.10.0
libtpu: 0.0.40
codegen_flags: <defaults>
</compile_context>

<pallas_src>
import functools

import jax
import jax.numpy as jnp
from jax.experimental import pallas as pl
from jax.experimental.pallas import tpu as pltpu


_SQRT_2_OVER_PI = 0.7978845608028654
_LANE = 128


def _round_up(x, m):
    return (x + m - 1) // m * m


# -----------------------------------------------------------------------------
# In-kernel helpers (value-level, f32 math)
# -----------------------------------------------------------------------------
def _layernorm(x, g, b, eps):
    mu = jnp.mean(x, axis=-1, keepdims=True)
    xc = x - mu
    var = jnp.mean(xc * xc, axis=-1, keepdims=True)
    return xc * jax.lax.rsqrt(var + eps) * g + b


def _gelu_tanh(y):
    return 0.5 * y * (1.0 + jnp.tanh(_SQRT_2_OVER_PI * (y + 0.044715 * y * y * y)))


def _const_spec(shape):
    """Full-array block, same block every grid step (weights stay VMEM-resident)."""
    n = len(shape)
    return pl.BlockSpec(shape, lambda b: (0,) * n)


# -----------------------------------------------------------------------------
# Patch embedding: conv-as-matmul + bias + position embedding, fused
# -----------------------------------------------------------------------------
def _patch_embed_kernel(p_ref, w_ref, b_ref, pos_ref, o_ref):
    y = jnp.dot(p_ref[0], w_ref[...], preferred_element_type=jnp.float32)
    o_ref[0] = (y + b_ref[...] + pos_ref[...]).astype(o_ref.dtype)


def patch_embed(pixel_values, params, cfg):
    """pixel_values: (B, C, H, W) NCHW -> (B, N, D) bf16."""
    B, C, Hh, Ww = pixel_values.shape
    P = cfg.patch_size
    nh, nw = Hh // P, Ww // P
    N = nh * nw
    CPP = C * P * P
    D = cfg.hidden_size
    # bf16 cast BEFORE the layout glue -> half-width patch-matrix DMA.
    x = pixel_values.astype(jnp.bfloat16)
    x = x.reshape(B, C, nh, P, nw, P)
    x = jnp.transpose(x, (0, 2, 4, 1, 3, 5)).reshape(B, N, CPP)  # patch order (c,i,j)
    return pl.pallas_call(
        _patch_embed_kernel,
        out_shape=jax.ShapeDtypeStruct((B, N, D), jnp.bfloat16),
        grid=(B,),
        in_specs=[
            pl.BlockSpec((1, N, CPP), lambda b: (b, 0, 0)),
            _const_spec((CPP, D)),
            _const_spec((1, D)),
            _const_spec((N, D)),
        ],
        out_specs=pl.BlockSpec((1, N, D), lambda b: (b, 0, 0)),
        compiler_params=pltpu.CompilerParams(
            dimension_semantics=("parallel",),
            vmem_limit_bytes=48 * 1024 * 1024),
    )(x, params["patch_w"], params["patch_b"], params["pos_emb"])


# -----------------------------------------------------------------------------
# Fully fused encoder: all layers + post-LayerNorm in one pallas_call
# -----------------------------------------------------------------------------
def _encoder_kernel(x_ref, ln1_g, ln1_b, qkv_w, qkv_b, o_w, o_b,
                    ln2_g, ln2_b, fc1_w, fc1_b, fc2_w, fc2_b,
                    post_g, post_b, o_ref, *, num_layers, num_heads, hd_pad, eps):
    HP = num_heads * hd_pad
    x = x_ref[0].astype(jnp.float32)                       # (S, D) residual stream, f32

    for l in range(num_layers):                            # static unroll over layers
        # ---------------- self-attention block ----------------
        h = _layernorm(x, ln1_g[l], ln1_b[l], eps)
        # scale already folded into the Q columns of qkv_w / qkv_b at init
        qkv = jnp.dot(h.astype(jnp.bfloat16), qkv_w[l],
                      preferred_element_type=jnp.float32) + qkv_b[l]     # (S, 3*HP)

        heads = []
        for hh in range(num_heads):                        # lane-aligned head slices
            off = hh * hd_pad
            qh = qkv[:, off:off + hd_pad].astype(jnp.bfloat16)           # (S, hd_pad)
            kh = qkv[:, HP + off:HP + off + hd_pad].astype(jnp.bfloat16)
            vh = qkv[:, 2 * HP + off:2 * HP + off + hd_pad].astype(jnp.bfloat16)
            # scores: contract over head_dim directly (padded lanes are exact zeros)
            s = jax.lax.dot_general(qh, kh, (((1,), (1,)), ((), ())),
                                    preferred_element_type=jnp.float32)  # (S, S)
            m = jnp.max(s, axis=-1, keepdims=True)
            p = jnp.exp(s - m)
            p = p * pl.reciprocal(jnp.sum(p, axis=-1, keepdims=True), approx=True)
            heads.append(jnp.dot(p.astype(jnp.bfloat16), vh,
                                 preferred_element_type=jnp.float32)
                         .astype(jnp.bfloat16))                          # (S, hd_pad)

        # ONE full-depth out-projection: concat(heads) @ o_w_padded  (padded rows = 0)
        cat = jnp.concatenate(heads, axis=1)               # (S, HP), 128-aligned pieces
        attn = jnp.dot(cat, o_w[l], preferred_element_type=jnp.float32)  # (S, D)
        x = x + attn + o_b[l]                              # out-proj bias + residual

        # ---------------- MLP block ----------------
        h2 = _layernorm(x, ln2_g[l], ln2_b[l], eps)
        m1 = jnp.dot(h2.astype(jnp.bfloat16), fc1_w[l],
                     preferred_element_type=jnp.float32) + fc1_b[l]
        m1 = _gelu_tanh(m1)
        m2 = jnp.dot(m1.astype(jnp.bfloat16), fc2_w[l],
                     preferred_element_type=jnp.float32) + fc2_b[l]
        x = x + m2

    # final post-LayerNorm fused into the epilogue (no extra kernel / HBM pass)
    o_ref[0] = _layernorm(x, post_g[...], post_b[...], eps).astype(o_ref.dtype)


def encoder_forward(x, params, cfg):
    """x: (B, S, D) bf16 -> (B, S, D) f32, all layers + post-LN in one call."""
    B, S, D = x.shape
    L = cfg.num_hidden_layers
    H = cfg.num_attn_heads
    hd = D // H
    hd_pad = _round_up(hd, _LANE)
    HP = H * hd_pad
    I = cfg.intermediate_size
    kern = functools.partial(_encoder_kernel, num_layers=L, num_heads=H,
                             hd_pad=hd_pad, eps=cfg.layer_norm_eps)
    # NOTE: at real SigLip sizes (so400m) split per layer / S-tile, single-buffer
    # the weight specs and stream next-layer weights; at toy sizes everything
    # fits comfortably in VMEM.
    # TODO(synk): cross-pallas_call weight prefetch for large-model small-batch serving.
    return pl.pallas_call(
        kern,
        out_shape=jax.ShapeDtypeStruct((B, S, D), jnp.float32),
        grid=(B,),
        in_specs=[
            pl.BlockSpec((1, S, D), lambda b: (b, 0, 0)),        # activations
            _const_spec((L, 1, D)), _const_spec((L, 1, D)),      # ln1 gamma/beta
            _const_spec((L, D, 3 * HP)), _const_spec((L, 1, 3 * HP)),  # fused qkv (padded)
            _const_spec((L, HP, D)), _const_spec((L, 1, D)),     # out-proj (padded rows)
            _const_spec((L, 1, D)), _const_spec((L, 1, D)),      # ln2 gamma/beta
            _const_spec((L, D, I)), _const_spec((L, 1, I)),      # fc1
            _const_spec((L, I, D)), _const_spec((L, 1, D)),      # fc2
            _const_spec((1, D)), _const_spec((1, D)),            # post-LN gamma/beta
        ],
        out_specs=pl.BlockSpec((1, S, D), lambda b: (b, 0, 0)),
        compiler_params=pltpu.CompilerParams(
            dimension_semantics=("parallel",),
            vmem_limit_bytes=48 * 1024 * 1024),
    )(x, params["ln1_g"], params["ln1_b"], params["qkv_w"], params["qkv_b"],
      params["o_w"], params["o_b"], params["ln2_g"], params["ln2_b"],
      params["fc1_w"], params["fc1_b"], params["fc2_w"], params["fc2_b"],
      params["post_ln_g"], params["post_ln_b"])


# -----------------------------------------------------------------------------
# Model / params
# -----------------------------------------------------------------------------
class Config:
    def __init__(self, hidden_size=768, intermediate_size=3072, num_hidden_layers=12,
                 num_attn_heads=12, num_channels=3, image_size=224, patch_size=16,
                 layer_norm_eps=1e-6):
        self.hidden_size = hidden_size
        self.intermediate_size = intermediate_size
        self.num_hidden_layers = num_hidden_layers
        self.num_attn_heads = num_attn_heads
        self.num_channels = num_channels
        self.image_size = image_size
        self.patch_size = patch_size
        self.layer_norm_eps = layer_norm_eps


def init_params(cfg: Config, key):
    D, I = cfg.hidden_size, cfg.intermediate_size
    C, P = cfg.num_channels, cfg.patch_size
    H = cfg.num_attn_heads
    hd = D // H
    hd_pad = _round_up(hd, _LANE)
    HP = H * hd_pad
    N = (cfg.image_size // cfg.patch_size) ** 2
    L = cfg.num_hidden_layers
    scale = hd ** (-0.5)

    def nrm(k, shape, dtype=jnp.bfloat16, sd=0.02):
        # matmul weights stored bf16 (MXU-native); LN params / biases / pos-emb f32.
        return (sd * jax.random.normal(k, shape, jnp.float32)).astype(dtype)

    def pad_cols_per_head(w):        # (D, D) -> (D, HP); head h at cols [h*hd_pad, +hd)
        return jnp.pad(w.reshape(D, H, hd),
                       ((0, 0), (0, 0), (0, hd_pad - hd))).reshape(D, HP)

    def pad_rows_per_head(w):        # (D, D) -> (HP, D); head h at rows [h*hd_pad, +hd)
        return jnp.pad(w.reshape(H, hd, D),
                       ((0, 0), (0, hd_pad - hd), (0, 0))).reshape(HP, D)

    def pad_bias_per_head(b):        # (D,) -> (1, HP)
        return jnp.pad(b.reshape(H, hd), ((0, 0), (0, hd_pad - hd))).reshape(1, HP)

    keys = jax.random.split(key, 2 + 6 * L)
    params = {
        "patch_w": nrm(keys[0], (C * P * P, D)),
        "patch_b": jnp.zeros((1, D), jnp.float32),
        "pos_emb": nrm(keys[1], (N, D), jnp.float32),
        "post_ln_g": jnp.ones((1, D), jnp.float32),
        "post_ln_b": jnp.zeros((1, D), jnp.float32),
    }

    names = ["ln1_g", "ln1_b", "qkv_w", "qkv_b", "o_w", "o_b",
             "ln2_g", "ln2_b", "fc1_w", "fc1_b", "fc2_w", "fc2_b"]
    per_layer = {n: [] for n in names}
    for l in range(L):
        k = keys[2 + 6 * l: 2 + 6 * (l + 1)]
        q_w = nrm(k[0], (D, D), jnp.float32)
        k_w = nrm(k[1], (D, D), jnp.float32)
        v_w = nrm(k[2], (D, D), jnp.float32)
        o_w = nrm(k[3], (D, D), jnp.float32)
        q_b = jnp.zeros((D,), jnp.float32)
        k_b = jnp.zeros((D,), jnp.float32)
        v_b = jnp.zeros((D,), jnp.float32)
        # Attention scale folded into the Q projection (weights AND bias).
        qkv_w = jnp.concatenate(
            [pad_cols_per_head(q_w * scale), pad_cols_per_head(k_w),
             pad_cols_per_head(v_w)], axis=1).astype(jnp.bfloat16)       # (D, 3*HP)
        qkv_b = jnp.concatenate(
            [pad_bias_per_head(q_b * scale), pad_bias_per_head(k_b),
             pad_bias_per_head(v_b)], axis=1)                            # (1, 3*HP) f32
        per_layer["ln1_g"].append(jnp.ones((1, D), jnp.float32))
        per_layer["ln1_b"].append(jnp.zeros((1, D), jnp.float32))
        per_layer["qkv_w"].append(qkv_w)
        per_layer["qkv_b"].append(qkv_b)
        per_layer["o_w"].append(pad_rows_per_head(o_w).astype(jnp.bfloat16))  # (HP, D)
        per_layer["o_b"].append(jnp.zeros((1, D), jnp.float32))
        per_layer["ln2_g"].append(jnp.ones((1, D), jnp.float32))
        per_layer["ln2_b"].append(jnp.zeros((1, D), jnp.float32))
        per_layer["fc1_w"].append(nrm(k[4], (D, I)))
        per_layer["fc1_b"].append(jnp.zeros((1, I), jnp.float32))
        per_layer["fc2_w"].append(nrm(k[5], (I, D)))
        per_layer["fc2_b"].append(jnp.zeros((1, D), jnp.float32))
    for n in names:
        params[n] = jnp.stack(per_layer[n], axis=0)        # (L, ...) stacked
    return params


def siglip_vision_model(pixel_values, params, cfg: Config):
    x = patch_embed(pixel_values, params, cfg)             # (B, N, D) bf16
    return encoder_forward(x, params, cfg)                 # (B, N, D) f32, post-LN included


if __name__ == "__main__":
    # Small, lane-dense toy config: D = 128 (full 128-lane stores), hd = 32 -> hd_pad = 128.
    cfg = Config(hidden_size=128, intermediate_size=256, num_hidden_layers=2,
                 num_attn_heads=4, num_channels=3, image_size=32, patch_size=8)
    key = jax.random.PRNGKey(0)
    k_param, k_input = jax.random.split(key)

    params = init_params(cfg, k_param)
    pixel_values = jax.random.normal(
        k_input, (2, cfg.num_channels, cfg.image_size, cfg.image_size), jnp.float32)

    forward = jax.jit(functools.partial(siglip_vision_model, cfg=cfg))
    out = jax.block_until_ready(forward(pixel_values, params))

    expected_seq = (cfg.image_size // cfg.patch_size) ** 2
    assert out.shape == (2, expected_seq, cfg.hidden_size), out.shape
    assert out.dtype == jnp.float32
    assert bool(jnp.all(jnp.isfinite(out)))
    print("KERNEL_OK")
</pallas_src>

<mosaic_0001>
module attributes {stable_mosaic.version = 11 : i64} {
  func.func @_patch_embed_kernel(%arg0: i32, %arg1: memref<1x16x192xbf16, #tpu.memory_space<vmem>>, %arg2: memref<192x128xbf16, #tpu.memory_space<vmem>>, %arg3: memref<1x128xf32, #tpu.memory_space<vmem>>, %arg4: memref<16x128xf32, #tpu.memory_space<vmem>>, %arg5: memref<1x16x128xbf16, #tpu.memory_space<vmem>>) attributes {dimension_semantics = [#tpu.dimension_semantics<parallel>], iteration_bounds = array<i64: 2>, scalar_prefetch = 0 : i64, scratch_operands = 0 : i64, tpu.core_type = #tpu.core_type<tc>, window_params = [{transform_indices = @transform_0, window_bounds = array<i64: 1, 16, 192>}, {pipeline_mode = #tpu.pipeline_mode<synchronous>, transform_indices = @transform_1, window_bounds = array<i64: 192, 128>}, {pipeline_mode = #tpu.pipeline_mode<synchronous>, transform_indices = @transform_2, window_bounds = array<i64: 1, 128>}, {pipeline_mode = #tpu.pipeline_mode<synchronous>, transform_indices = @transform_3, window_bounds = array<i64: 16, 128>}, {transform_indices = @transform_4, window_bounds = array<i64: 1, 16, 128>}]} {
    %c0 = arith.constant 0 : index
    %c0_0 = arith.constant 0 : index
    %c0_1 = arith.constant 0 : index
    %0 = vector.load %arg1[%c0, %c0_0, %c0_1] : memref<1x16x192xbf16, #tpu.memory_space<vmem>>, vector<1x16x192xbf16>
    %1 = vector.shape_cast %0 : vector<1x16x192xbf16> to vector<16x192xbf16>
    %c0_2 = arith.constant 0 : index
    %c0_3 = arith.constant 0 : index
    %2 = vector.load %arg2[%c0_2, %c0_3] : memref<192x128xbf16, #tpu.memory_space<vmem>>, vector<192x128xbf16>
    %cst = arith.constant dense<0.000000e+00> : vector<16x128xf32>
    %3 = tpu.matmul %1, %2, %cst {dimension_numbers = #tpu.dot_dimension_numbers<[1], [0], [0], [1], [0, 0, 1, 1], [], []>} : vector<16x192xbf16>, vector<192x128xbf16>, vector<16x128xf32> -> vector<16x128xf32>
    %c0_4 = arith.constant 0 : index
    %c0_5 = arith.constant 0 : index
    %4 = vector.load %arg3[%c0_4, %c0_5] : memref<1x128xf32, #tpu.memory_space<vmem>>, vector<1x128xf32>
    %5 = vector.broadcast %4 : vector<1x128xf32> to vector<16x128xf32>
    %6 = arith.addf %3, %5 : vector<16x128xf32>
    %c0_6 = arith.constant 0 : index
    %c0_7 = arith.constant 0 : index
    %7 = vector.load %arg4[%c0_6, %c0_7] : memref<16x128xf32, #tpu.memory_space<vmem>>, vector<16x128xf32>
    %8 = arith.addf %6, %7 : vector<16x128xf32>
    %9 = arith.truncf %8 : vector<16x128xf32> to vector<16x128xbf16>
    %c0_8 = arith.constant 0 : index
    %c0_9 = arith.constant 0 : index
    %c0_10 = arith.constant 0 : index
    %10 = vector.load %arg5[%c0_8, %c0_9, %c0_10] : memref<1x16x128xbf16, #tpu.memory_space<vmem>>, vector<1x16x128xbf16>
    %11 = vector.shape_cast %10 : vector<1x16x128xbf16> to vector<16x128xbf16>
    %12 = vector.shape_cast %9 : vector<16x128xbf16> to vector<1x16x128xbf16>
    tpu.vector_store %arg5[%c0_8, %c0_9, %c0_10], %12 {strides = array<i32>} : memref<1x16x128xbf16, #tpu.memory_space<vmem>>, vector<1x16x128xbf16>,
    return
  }
  func.func @transform_0(%arg0: i32) -> (i32, i32, i32) {
    %c0_i32 = arith.constant 0 : i32
    %c0_i32_0 = arith.constant 0 : i32
    %c0_i32_1 = arith.constant 0 : i32
    return %arg0, %c0_i32, %c0_i32_0 : i32, i32, i32
  }
  func.func @transform_1(%arg0: i32) -> (i32, i32) {
    %c0_i32 = arith.constant 0 : i32
    %c0_i32_0 = arith.constant 0 : i32
    %c0_i32_1 = arith.constant 0 : i32
    return %c0_i32, %c0_i32_0 : i32, i32
  }
  func.func @transform_2(%arg0: i32) -> (i32, i32) {
    %c0_i32 = arith.constant 0 : i32
    %c0_i32_0 = arith.constant 0 : i32
    %c0_i32_1 = arith.constant 0 : i32
    return %c0_i32, %c0_i32_0 : i32, i32
  }
  func.func @transform_3(%arg0: i32) -> (i32, i32) {
    %c0_i32 = arith.constant 0 : i32
    %c0_i32_0 = arith.constant 0 : i32
    %c0_i32_1 = arith.constant 0 : i32
    return %c0_i32, %c0_i32_0 : i32, i32
  }
  func.func @transform_4(%arg0: i32) -> (i32, i32, i32) {
    %c0_i32 = arith.constant 0 : i32
    %c0_i32_0 = arith.constant 0 : i32
    %c0_i32_1 = arith.constant 0 : i32
    return %arg0, %c0_i32, %c0_i32_0 : i32, i32, i32
  }
}

module attributes {stable_mosaic.version = 11 : i64} {
  func.func @_encoder_kernel(%arg0: i32, %arg1: memref<1x16x128xbf16, #tpu.memory_space<vmem>>, %arg2: memref<2x1x128xf32, #tpu.memory_space<vmem>>, %arg3: memref<2x1x128xf32, #tpu.memory_space<vmem>>, %arg4: memref<2x128x1536xbf16, #tpu.memory_space<vmem>>, %arg5: memref<2x1x1536xf32, #tpu.memory_space<vmem>>, %arg6: memref<2x512x128xbf16, #tpu.memory_space<vmem>>, %arg7: memref<2x1x128xf32, #tpu.memory_space<vmem>>, %arg8: memref<2x1x128xf32, #tpu.memory_space<vmem>>, %arg9: memref<2x1x128xf32, #tpu.memory_space<vmem>>, %arg10: memref<2x128x256xbf16, #tpu.memory_space<vmem>>, %arg11: memref<2x1x256xf32, #tpu.memory_space<vmem>>, %arg12: memref<2x256x128xbf16, #tpu.memory_space<vmem>>, %arg13: memref<2x1x128xf32, #tpu.memory_space<vmem>>, %arg14: memref<1x128xf32, #tpu.memory_space<vmem>>, %arg15: memref<1x128xf32, #tpu.memory_space<vmem>>, %arg16: memref<1x16x128xf32, #tpu.memory_space<vmem>>) attributes {dimension_semantics = [#tpu.dimension_semantics<parallel>], iteration_bounds = array<i64: 2>, scalar_prefetch = 0 : i64, scratch_operands = 0 : i64, tpu.core_type = #tpu.core_type<tc>, window_params = [{transform_indices = @transform_0, window_bounds = array<i64: 1, 16, 128>}, {pipeline_mode = #tpu.pipeline_mode<synchronous>, transform_indices = @transform_1, window_bounds = array<i64: 2, 1, 128>}, {pipeline_mode = #tpu.pipeline_mode<synchronous>, transform_indices = @transform_2, window_bounds = array<i64: 2, 1, 128>}, {pipeline_mode = #tpu.pipeline_mode<synchronous>, transform_indices = @transform_3, window_bounds = array<i64: 2, 128, 1536>}, {pipeline_mode = #tpu.pipeline_mode<synchronous>, transform_indices = @transform_4, window_bounds = array<i64: 2, 1, 1536>}, {pipeline_mode = #tpu.pipeline_mode<synchronous>, transform_indices = @transform_5, window_bounds = array<i64: 2, 512, 128>}, {pipeline_mode = #tpu.pipeline_mode<synchronous>, transform_indices = @transform_6, window_bounds = array<i64: 2, 1, 128>}, {pipeline_mode = #tpu.pipeline_mode<synchronous>, transform_indices = @transform_7, window_bounds = array<i64: 2, 1, 128>}, {pipeline_mode = #tpu.pipeline_mode<synchronous>, transform_indices = @transform_8, window_bounds = array<i64: 2, 1, 128>}, {pipeline_mode = #tpu.pipeline_mode<synchronous>, transform_indices = @transform_9, window_bounds = array<i64: 2, 128, 256>}, {pipeline_mode = #tpu.pipeline_mode<synchronous>, transform_indices = @transform_10, window_bounds = array<i64: 2, 1, 256>}, {pipeline_mode = #tpu.pipeline_mode<synchronous>, transform_indices = @transform_11, window_bounds = array<i64: 2, 256, 128>}, {pipeline_mode = #tpu.pipeline_mode<synchronous>, transform_indices = @transform_12, window_bounds = array<i64: 2, 1, 128>}, {pipeline_mode = #tpu.pipeline_mode<synchronous>, transform_indices = @transform_13, window_bounds = array<i64: 1, 128>}, {pipeline_mode = #tpu.pipeline_mode<synchronous>, transform_indices = @transform_14, window_bounds = array<i64: 1, 128>}, {transform_indices = @transform_15, window_bounds = array<i64: 1, 16, 128>}]} {
    %c0 = arith.constant 0 : index
    %c0_0 = arith.constant 0 : index
    %c0_1 = arith.constant 0 : index
    %0 = vector.load %arg1[%c0, %c0_0, %c0_1] : memref<1x16x128xbf16, #tpu.memory_space<vmem>>, vector<1x16x128xbf16>
    %1 = vector.shape_cast %0 : vector<1x16x128xbf16> to vector<16x128xbf16>
    %2 = arith.extf %1 : vector<16x128xbf16> to vector<16x128xf32>
    %c0_2 = arith.constant 0 : index
    %c0_3 = arith.constant 0 : index
    %c0_4 = arith.constant 0 : index
    %3 = vector.load %arg2[%c0_2, %c0_3, %c0_4] : memref<2x1x128xf32, #tpu.memory_space<vmem>>, vector<1x1x128xf32>
    %4 = vector.shape_cast %3 : vector<1x1x128xf32> to vector<1x128xf32>
    %c0_5 = arith.constant 0 : index
    %c0_6 = arith.constant 0 : index
    %c0_7 = arith.constant 0 : index
    %5 = vector.load %arg3[%c0_5, %c0_6, %c0_7] : memref<2x1x128xf32, #tpu.memory_space<vmem>>, vector<1x1x128xf32>
    %6 = vector.shape_cast %5 : vector<1x1x128xf32> to vector<1x128xf32>
    %cst = arith.constant dense<0.000000e+00> : vector<16xf32>
    %7 = vector.multi_reduction <add>, %2, %cst [1] : vector<16x128xf32> to vector<16xf32>
    %8 = vector.shape_cast %7 : vector<16xf32> to vector<16x1xf32>
    %cst_8 = arith.constant 1.280000e+02 : f32
    %9 = vector.broadcast %cst_8 : f32 to vector<16x1xf32>
    %10 = arith.divf %8, %9 : vector<16x1xf32>
    %11 = vector.broadcast %10 : vector<16x1xf32> to vector<16x128xf32>
    %12 = arith.subf %2, %11 : vector<16x128xf32>
    %13 = arith.mulf %12, %12 : vector<16x128xf32>
    %cst_9 = arith.constant dense<0.000000e+00> : vector<16xf32>
    %14 = vector.multi_reduction <add>, %13, %cst_9 [1] : vector<16x128xf32> to vector<16xf32>
    %15 = vector.shape_cast %14 : vector<16xf32> to vector<16x1xf32>
    %cst_10 = arith.constant 1.280000e+02 : f32
    %16 = vector.broadcast %cst_10 : f32 to vector<16x1xf32>
    %17 = arith.divf %15, %16 : vector<16x1xf32>
    %cst_11 = arith.constant 9.99999997E-7 : f32
    %18 = vector.broadcast %cst_11 : f32 to vector<16x1xf32>
    %19 = arith.addf %17, %18 : vector<16x1xf32>
    %20 = math.rsqrt %19 : vector<16x1xf32>
    %21 = vector.broadcast %20 : vector<16x1xf32> to vector<16x128xf32>
    %22 = arith.mulf %12, %21 : vector<16x128xf32>
    %23 = vector.broadcast %4 : vector<1x128xf32> to vector<16x128xf32>
    %24 = arith.mulf %22, %23 : vector<16x128xf32>
    %25 = vector.broadcast %6 : vector<1x128xf32> to vector<16x128xf32>
    %26 = arith.addf %24, %25 : vector<16x128xf32>
    %27 = arith.truncf %26 : vector<16x128xf32> to vector<16x128xbf16>
    %c0_12 = arith.constant 0 : index
    %c0_13 = arith.constant 0 : index
    %c0_14 = arith.constant 0 : index
    %28 = vector.load %arg4[%c0_12, %c0_13, %c0_14] : memref<2x128x1536xbf16, #tpu.memory_space<vmem>>, vector<1x128x1536xbf16>
    %29 = vector.shape_cast %28 : vector<1x128x1536xbf16> to vector<128x1536xbf16>
    %cst_15 = arith.constant dense<0.000000e+00> : vector<16x1536xf32>
    %30 = tpu.matmul %27, %29, %cst_15 {dimension_numbers = #tpu.dot_dimension_numbers<[1], [0], [0], [1], [0, 0, 1, 1], [], []>} : vector<16x128xbf16>, vector<128x1536xbf16>, vector<16x1536xf32> -> vector<16x1536xf32>
    %c0_16 = arith.constant 0 : index
    %c0_17 = arith.constant 0 : index
    %c0_18 = arith.constant 0 : index
    %31 = vector.load %arg5[%c0_16, %c0_17, %c0_18] : memref<2x1x1536xf32, #tpu.memory_space<vmem>>, vector<1x1x1536xf32>
    %32 = vector.shape_cast %31 : vector<1x1x1536xf32> to vector<1x1536xf32>
    %33 = vector.broadcast %32 : vector<1x1536xf32> to vector<16x1536xf32>
    %34 = arith.addf %30, %33 : vector<16x1536xf32>
    %35 = vector.extract_strided_slice %34 {offsets = [0, 0], sizes = [16, 128], strides = [1, 1]} : vector<16x1536xf32> to vector<16x128xf32>
    %36 = arith.truncf %35 : vector<16x128xf32> to vector<16x128xbf16>
    %37 = vector.extract_strided_slice %34 {offsets = [0, 512], sizes = [16, 128], strides = [1, 1]} : vector<16x1536xf32> to vector<16x128xf32>
    %38 = arith.truncf %37 : vector<16x128xf32> to vector<16x128xbf16>
    %39 = vector.extract_strided_slice %34 {offsets = [0, 1024], sizes = [16, 128], strides = [1, 1]} : vector<16x1536xf32> to vector<16x128xf32>
    %40 = arith.truncf %39 : vector<16x128xf32> to vector<16x128xbf16>
    %cst_19 = arith.constant dense<0.000000e+00> : vector<16x16xf32>
    %41 = tpu.matmul %36, %38, %cst_19 {dimension_numbers = #tpu.dot_dimension_numbers<[1], [1], [0], [0], [0, 0, 1, 0], [], []>} : vector<16x128xbf16>, vector<16x128xbf16>, vector<16x16xf32> -> vector<16x16xf32>
    %cst_20 = arith.constant dense<0xFF800000> : vector<16xf32>
    %42 = vector.multi_reduction <maximumf>, %41, %cst_20 [1] : vector<16x16xf32> to vector<16xf32>
    %43 = vector.shape_cast %42 : vector<16xf32> to vector<16x1xf32>
    %44 = vector.broadcast %43 : vector<16x1xf32> to vector<16x16xf32>
    %45 = arith.subf %41, %44 : vector<16x16xf32>
    %46 = math.exp %45 : vector<16x16xf32>
    %cst_21 = arith.constant dense<0.000000e+00> : vector<16xf32>
    %47 = vector.multi_reduction <add>, %46, %cst_21 [1] : vector<16x16xf32> to vector<16xf32>
    %48 = vector.shape_cast %47 : vector<16xf32> to vector<16x1xf32>
    %49 = tpu.reciprocal %48 {approx = true} : vector<16x1xf32> -> vector<16x1xf32>
    %50 = vector.broadcast %49 : vector<16x1xf32> to vector<16x16xf32>
    %51 = arith.mulf %46, %50 : vector<16x16xf32>
    %52 = arith.truncf %51 : vector<16x16xf32> to vector<16x16xbf16>
    %cst_22 = arith.constant dense<0.000000e+00> : vector<16x128xf32>
    %53 = tpu.matmul %52, %40, %cst_22 {dimension_numbers = #tpu.dot_dimension_numbers<[1], [0], [0], [1], [0, 0, 1, 1], [], []>} : vector<16x16xbf16>, vector<16x128xbf16>, vector<16x128xf32> -> vector<16x128xf32>
    %54 = arith.truncf %53 : vector<16x128xf32> to vector<16x128xbf16>
    %55 = vector.extract_strided_slice %34 {offsets = [0, 128], sizes = [16, 128], strides = [1, 1]} : vector<16x1536xf32> to vector<16x128xf32>
    %56 = arith.truncf %55 : vector<16x128xf32> to vector<16x128xbf16>
    %57 = vector.extract_strided_slice %34 {offsets = [0, 640], sizes = [16, 128], strides = [1, 1]} : vector<16x1536xf32> to vector<16x128xf32>
    %58 = arith.truncf %57 : vector<16x128xf32> to vector<16x128xbf16>
    %59 = vector.extract_strided_slice %34 {offsets = [0, 1152], sizes = [16, 128], strides = [1, 1]} : vector<16x1536xf32> to vector<16x128xf32>
    %60 = arith.truncf %59 : vector<16x128xf32> to vector<16x128xbf16>
    %cst_23 = arith.constant dense<0.000000e+00> : vector<16x16xf32>
    %61 = tpu.matmul %56, %58, %cst_23 {dimension_numbers = #tpu.dot_dimension_numbers<[1], [1], [0], [0], [0, 0, 1, 0], [], []>} : vector<16x128xbf16>, vector<16x128xbf16>, vector<16x16xf32> -> vector<16x16xf32>
    %cst_24 = arith.constant dense<0xFF800000> : vector<16xf32>
    %62 = vector.multi_reduction <maximumf>, %61, %cst_24 [1] : vector<16x16xf32> to vector<16xf32>
    %63 = vector.shape_cast %62 : vector<16xf32> to vector<16x1xf32>
    %64 = vector.broadcast %63 : vector<16x1xf32> to vector<16x16xf32>
    %65 = arith.subf %61, %64 : vector<16x16xf32>
    %66 = math.exp %65 : vector<16x16xf32>
    %cst_25 = arith.constant dense<0.000000e+00> : vector<16xf32>
    %67 = vector.multi_reduction <add>, %66, %cst_25 [1] : vector<16x16xf32> to vector<16xf32>
    %68 = vector.shape_cast %67 : vector<16xf32> to vector<16x1xf32>
    %69 = tpu.reciprocal %68 {approx = true} : vector<16x1xf32> -> vector<16x1xf32>
    %70 = vector.broadcast %69 : vector<16x1xf32> to vector<16x16xf32>
    %71 = arith.mulf %66, %70 : vector<16x16xf32>
    %72 = arith.truncf %71 : vector<16x16xf32> to vector<16x16xbf16>
    %cst_26 = arith.constant dense<0.000000e+00> : vector<16x128xf32>
    %73 = tpu.matmul %72, %60, %cst_26 {dimension_numbers = #tpu.dot_dimension_numbers<[1], [0], [0], [1], [0, 0, 1, 1], [], []>} : vector<16x16xbf16>, vector<16x128xbf16>, vector<16x128xf32> -> vector<16x128xf32>
    %74 = arith.truncf %73 : vector<16x128xf32> to vector<16x128xbf16>
    %75 = vector.extract_strided_slice %34 {offsets = [0, 256], sizes = [16, 128], strides = [1, 1]} : vector<16x1536xf32> to vector<16x128xf32>
    %76 = arith.truncf %75 : vector<16x128xf32> to vector<16x128xbf16>
    %77 = vector.extract_strided_slice %34 {offsets = [0, 768], sizes = [16, 128], strides = [1, 1]} : vector<16x1536xf32> to vector<16x128xf32>
    %78 = arith.truncf %77 : vector<16x128xf32> to vector<16x128xbf16>
    %79 = vector.extract_strided_slice %34 {offsets = [0, 1280], sizes = [16, 128], strides = [1, 1]} : vector<16x1536xf32> to vector<16x128xf32>
    %80 = arith.truncf %79 : vector<16x128xf32> to vector<16x128xbf16>
    %cst_27 = arith.constant dense<0.000000e+00> : vector<16x16xf32>
    %81 = tpu.matmul %76, %78, %cst_27 {dimension_numbers = #tpu.dot_dimension_numbers<[1], [1], [0], [0], [0, 0, 1, 0], [], []>} : vector<16x128xbf16>, vector<16x128xbf16>, vector<16x16xf32> -> vector<16x16xf32>
    %cst_28 = arith.constant dense<0xFF800000> : vector<16xf32>
    %82 = vector.multi_reduction <maximumf>, %81, %cst_28 [1] : vector<16x16xf32> to vector<16xf32>
    %83 = vector.shape_cast %82 : vector<16xf32> to vector<16x1xf32>
    %84 = vector.broadcast %83 : vector<16x1xf32> to vector<16x16xf32>
    %85 = arith.subf %81, %84 : vector<16x16xf32>
    %86 = math.exp %85 : vector<16x16xf32>
    %cst_29 = arith.constant dense<0.000000e+00> : vector<16xf32>
    %87 = vector.multi_reduction <add>, %86, %cst_29 [1] : vector<16x16xf32> to vector<16xf32>
    %88 = vector.shape_cast %87 : vector<16xf32> to vector<16x1xf32>
    %89 = tpu.reciprocal %88 {approx = true} : vector<16x1xf32> -> vector<16x1xf32>
    %90 = vector.broadcast %89 : vector<16x1xf32> to vector<16x16xf32>
    %91 = arith.mulf %86, %90 : vector<16x16xf32>
    %92 = arith.truncf %91 : vector<16x16xf32> to vector<16x16xbf16>
    %cst_30 = arith.constant dense<0.000000e+00> : vector<16x128xf32>
    %93 = tpu.matmul %92, %80, %cst_30 {dimension_numbers = #tpu.dot_dimension_numbers<[1], [0], [0], [1], [0, 0, 1, 1], [], []>} : vector<16x16xbf16>, vector<16x128xbf16>, vector<16x128xf32> -> vector<16x128xf32>
    %94 = arith.truncf %93 : vector<16x128xf32> to vector<16x128xbf16>
    %95 = vector.extract_strided_slice %34 {offsets = [0, 384], sizes = [16, 128], strides = [1, 1]} : vector<16x1536xf32> to vector<16x128xf32>
    %96 = arith.truncf %95 : vector<16x128xf32> to vector<16x128xbf16>
    %97 = vector.extract_strided_slice %34 {offsets = [0, 896], sizes = [16, 128], strides = [1, 1]} : vector<16x1536xf32> to vector<16x128xf32>
    %98 = arith.truncf %97 : vector<16x128xf32> to vector<16x128xbf16>
    %99 = vector.extract_strided_slice %34 {offsets = [0, 1408], sizes = [16, 128], strides = [1, 1]} : vector<16x1536xf32> to vector<16x128xf32>
    %100 = arith.truncf %99 : vector<16x128xf32> to vector<16x128xbf16>
    %cst_31 = arith.constant dense<0.000000e+00> : vector<16x16xf32>
    %101 = tpu.matmul %96, %98, %cst_31 {dimension_numbers = #tpu.dot_dimension_numbers<[1], [1], [0], [0], [0, 0, 1, 0], [], []>} : vector<16x128xbf16>, vector<16x128xbf16>, vector<16x16xf32> -> vector<16x16xf32>
    %cst_32 = arith.constant dense<0xFF800000> : vector<16xf32>
    %102 = vector.multi_reduction <maximumf>, %101, %cst_32 [1] : vector<16x16xf32> to vector<16xf32>
    %103 = vector.shape_cast %102 : vector<16xf32> to vector<16x1xf32>
    %104 = vector.broadcast %103 : vector<16x1xf32> to vector<16x16xf32>
    %105 = arith.subf %101, %104 : vector<16x16xf32>
    %106 = math.exp %105 : vector<16x16xf32>
    %cst_33 = arith.constant dense<0.000000e+00> : vector<16xf32>
    %107 = vector.multi_reduction <add>, %106, %cst_33 [1] : vector<16x16xf32> to vector<16xf32>
    %108 = vector.shape_cast %107 : vector<16xf32> to vector<16x1xf32>
    %109 = tpu.reciprocal %108 {approx = true} : vector<16x1xf32> -> vector<16x1xf32>
    %110 = vector.broadcast %109 : vector<16x1xf32> to vector<16x16xf32>
    %111 = arith.mulf %106, %110 : vector<16x16xf32>
    %112 = arith.truncf %111 : vector<16x16xf32> to vector<16x16xbf16>
    %cst_34 = arith.constant dense<0.000000e+00> : vector<16x128xf32>
    %113 = tpu.matmul %112, %100, %cst_34 {dimension_numbers = #tpu.dot_dimension_numbers<[1], [0], [0], [1], [0, 0, 1, 1], [], []>} : vector<16x16xbf16>, vector<16x128xbf16>, vector<16x128xf32> -> vector<16x128xf32>
    %114 = arith.truncf %113 : vector<16x128xf32> to vector<16x128xbf16>
    %115 = tpu.concatenate %54, %74, %94, %114 in 1 : vector<16x128xbf16>, vector<16x128xbf16>, vector<16x128xbf16>, vector<16x128xbf16> -> vector<16x512xbf16>
    %c0_35 = arith.constant 0 : index
    %c0_36 = arith.constant 0 : index
    %c0_37 = arith.constant 0 : index
    %116 = vector.load %arg6[%c0_35, %c0_36, %c0_37] : memref<2x512x128xbf16, #tpu.memory_space<vmem>>, vector<1x512x128xbf16>
    %117 = vector.shape_cast %116 : vector<1x512x128xbf16> to vector<512x128xbf16>
    %cst_38 = arith.constant dense<0.000000e+00> : vector<16x128xf32>
    %118 = tpu.matmul %115, %117, %cst_38 {dimension_numbers = #tpu.dot_dimension_numbers<[1], [0], [0], [1], [0, 0, 1, 1], [], []>} : vector<16x512xbf16>, vector<512x128xbf16>, vector<16x128xf32> -> vector<16x128xf32>
    %119 = arith.addf %2, %118 : vector<16x128xf32>
    %c0_39 = arith.constant 0 : index
    %c0_40 = arith.constant 0 : index
    %c0_41 = arith.constant 0 : index
    %120 = vector.load %arg7[%c0_39, %c0_40, %c0_41] : memref<2x1x128xf32, #tpu.memory_space<vmem>>, vector<1x1x128xf32>
    %121 = vector.shape_cast %120 : vector<1x1x128xf32> to vector<1x128xf32>
    %122 = vector.broadcast %121 : vector<1x128xf32> to vector<16x128xf32>
    %123 = arith.addf %119, %122 : vector<16x128xf32>
    %c0_42 = arith.constant 0 : index
    %c0_43 = arith.constant 0 : index
    %c0_44 = arith.constant 0 : index
    %124 = vector.load %arg8[%c0_42, %c0_43, %c0_44] : memref<2x1x128xf32, #tpu.memory_space<vmem>>, vector<1x1x128xf32>
    %125 = vector.shape_cast %124 : vector<1x1x128xf32> to vector<1x128xf32>
    %c0_45 = arith.constant 0 : index
    %c0_46 = arith.constant 0 : index
    %c0_47 = arith.constant 0 : index
    %126 = vector.load %arg9[%c0_45, %c0_46, %c0_47] : memref<2x1x128xf32, #tpu.memory_space<vmem>>, vector<1x1x128xf32>
    %127 = vector.shape_cast %126 : vector<1x1x128xf32> to vector<1x128xf32>
    %cst_48 = arith.constant dense<0.000000e+00> : vector<16xf32>
    %128 = vector.multi_reduction <add>, %123, %cst_48 [1] : vector<16x128xf32> to vector<16xf32>
    %129 = vector.shape_cast %128 : vector<16xf32> to vector<16x1xf32>
    %cst_49 = arith.constant 1.280000e+02 : f32
    %130 = vector.broadcast %cst_49 : f32 to vector<16x1xf32>
    %131 = arith.divf %129, %130 : vector<16x1xf32>
    %132 = vector.broadcast %131 : vector<16x1xf32> to vector<16x128xf32>
    %133 = arith.subf %123, %132 : vector<16x128xf32>
    %134 = arith.mulf %133, %133 : vector<16x128xf32>
    %cst_50 = arith.constant dense<0.000000e+00> : vector<16xf32>
    %135 = vector.multi_reduction <add>, %134, %cst_50 [1] : vector<16x128xf32> to vector<16xf32>
    %136 = vector.shape_cast %135 : vector<16xf32> to vector<16x1xf32>
    %cst_51 = arith.constant 1.280000e+02 : f32
    %137 = vector.broadcast %cst_51 : f32 to vector<16x1xf32>
    %138 = arith.divf %136, %137 : vector<16x1xf32>
    %cst_52 = arith.constant 9.99999997E-7 : f32
    %139 = vector.broadcast %cst_52 : f32 to vector<16x1xf32>
    %140 = arith.addf %138, %139 : vector<16x1xf32>
    %141 = math.rsqrt %140 : vector<16x1xf32>
    %142 = vector.broadcast %141 : vector<16x1xf32> to vector<16x128xf32>
    %143 = arith.mulf %133, %142 : vector<16x128xf32>
    %144 = vector.broadcast %125 : vector<1x128xf32> to vector<16x128xf32>
    %145 = arith.mulf %143, %144 : vector<16x128xf32>
    %146 = vector.broadcast %127 : vector<1x128xf32> to vector<16x128xf32>
    %147 = arith.addf %145, %146 : vector<16x128xf32>
    %148 = arith.truncf %147 : vector<16x128xf32> to vector<16x128xbf16>
    %c0_53 = arith.constant 0 : index
    %c0_54 = arith.constant 0 : index
    %c0_55 = arith.constant 0 : index
    %149 = vector.load %arg10[%c0_53, %c0_54, %c0_55] : memref<2x128x256xbf16, #tpu.memory_space<vmem>>, vector<1x128x256xbf16>
    %150 = vector.shape_cast %149 : vector<1x128x256xbf16> to vector<128x256xbf16>
    %cst_56 = arith.constant dense<0.000000e+00> : vector<16x256xf32>
    %151 = tpu.matmul %148, %150, %cst_56 {dimension_numbers = #tpu.dot_dimension_numbers<[1], [0], [0], [1], [0, 0, 1, 1], [], []>} : vector<16x128xbf16>, vector<128x256xbf16>, vector<16x256xf32> -> vector<16x256xf32>
    %c0_57 = arith.constant 0 : index
    %c0_58 = arith.constant 0 : index
    %c0_59 = arith.constant 0 : index
    %152 = vector.load %arg11[%c0_57, %c0_58, %c0_59] : memref<2x1x256xf32, #tpu.memory_space<vmem>>, vector<1x1x256xf32>
    %153 = vector.shape_cast %152 : vector<1x1x256xf32> to vector<1x256xf32>
    %154 = vector.broadcast %153 : vector<1x256xf32> to vector<16x256xf32>
    %155 = arith.addf %151, %154 : vector<16x256xf32>
    %cst_60 = arith.constant 5.000000e-01 : f32
    %156 = vector.broadcast %cst_60 : f32 to vector<16x256xf32>
    %157 = arith.mulf %156, %155 : vector<16x256xf32>
    %cst_61 = arith.constant 4.471500e-02 : f32
    %158 = vector.broadcast %cst_61 : f32 to vector<16x256xf32>
    %159 = arith.mulf %158, %155 : vector<16x256xf32>
    %160 = arith.mulf %159, %155 : vector<16x256xf32>
    %161 = arith.mulf %160, %155 : vector<16x256xf32>
    %162 = arith.addf %155, %161 : vector<16x256xf32>
    %cst_62 = arith.constant 0.797884583 : f32
    %163 = vector.broadcast %cst_62 : f32 to vector<16x256xf32>
    %164 = arith.mulf %163, %162 : vector<16x256xf32>
    %165 = math.tanh %164 : vector<16x256xf32>
    %cst_63 = arith.constant 1.000000e+00 : f32
    %166 = vector.broadcast %cst_63 : f32 to vector<16x256xf32>
    %167 = arith.addf %166, %165 : vector<16x256xf32>
    %168 = arith.mulf %157, %167 : vector<16x256xf32>
    %169 = arith.truncf %168 : vector<16x256xf32> to vector<16x256xbf16>
    %c0_64 = arith.constant 0 : index
    %c0_65 = arith.constant 0 : index
    %c0_66 = arith.constant 0 : index
    %170 = vector.load %arg12[%c0_64, %c0_65, %c0_66] : memref<2x256x128xbf16, #tpu.memory_space<vmem>>, vector<1x256x128xbf16>
    %171 = vector.shape_cast %170 : vector<1x256x128xbf16> to vector<256x128xbf16>
    %cst_67 = arith.constant dense<0.000000e+00> : vector<16x128xf32>
    %172 = tpu.matmul %169, %171, %cst_67 {dimension_numbers = #tpu.dot_dimension_numbers<[1], [0], [0], [1], [0, 0, 1, 1], [], []>} : vector<16x256xbf16>, vector<256x128xbf16>, vector<16x128xf32> -> vector<16x128xf32>
    %c0_68 = arith.constant 0 : index
    %c0_69 = arith.constant 0 : index
    %c0_70 = arith.constant 0 : index
    %173 = vector.load %arg13[%c0_68, %c0_69, %c0_70] : memref<2x1x128xf32, #tpu.memory_space<vmem>>, vector<1x1x128xf32>
    %174 = vector.shape_cast %173 : vector<1x1x128xf32> to vector<1x128xf32>
    %175 = vector.broadcast %174 : vector<1x128xf32> to vector<16x128xf32>
    %176 = arith.addf %172, %175 : vector<16x128xf32>
    %177 = arith.addf %123, %176 : vector<16x128xf32>
    %c1 = arith.constant 1 : index
    %c0_71 = arith.constant 0 : index
    %c0_72 = arith.constant 0 : index
    %178 = vector.load %arg2[%c1, %c0_71, %c0_72] : memref<2x1x128xf32, #tpu.memory_space<vmem>>, vector<1x1x128xf32>
    %179 = vector.shape_cast %178 : vector<1x1x128xf32> to vector<1x128xf32>
    %c1_73 = arith.constant 1 : index
    %c0_74 = arith.constant 0 : index
    %c0_75 = arith.constant 0 : index
    %180 = vector.load %arg3[%c1_73, %c0_74, %c0_75] : memref<2x1x128xf32, #tpu.memory_space<vmem>>, vector<1x1x128xf32>
    %181 = vector.shape_cast %180 : vector<1x1x128xf32> to vector<1x128xf32>
    %cst_76 = arith.constant dense<0.000000e+00> : vector<16xf32>
    %182 = vector.multi_reduction <add>, %177, %cst_76 [1] : vector<16x128xf32> to vector<16xf32>
    %183 = vector.shape_cast %182 : vector<16xf32> to vector<16x1xf32>
    %cst_77 = arith.constant 1.280000e+02 : f32
    %184 = vector.broadcast %cst_77 : f32 to vector<16x1xf32>
    %185 = arith.divf %183, %184 : vector<16x1xf32>
    %186 = vector.broadcast %185 : vector<16x1xf32> to vector<16x128xf32>
    %187 = arith.subf %177, %186 : vector<16x128xf32>
    %188 = arith.mulf %187, %187 : vector<16x128xf32>
    %cst_78 = arith.constant dense<0.000000e+00> : vector<16xf32>
    %189 = vector.multi_reduction <add>, %188, %cst_78 [1] : vector<16x128xf32> to vector<16xf32>
    %190 = vector.shape_cast %189 : vector<16xf32> to vector<16x1xf32>
    %cst_79 = arith.constant 1.280000e+02 : f32
    %191 = vector.broadcast %cst_79 : f32 to vector<16x1xf32>
    %192 = arith.divf %190, %191 : vector<16x1xf32>
    %cst_80 = arith.constant 9.99999997E-7 : f32
    %193 = vector.broadcast %cst_80 : f32 to vector<16x1xf32>
    %194 = arith.addf %192, %193 : vector<16x1xf32>
    %195 = math.rsqrt %194 : vector<16x1xf32>
    %196 = vector.broadcast %195 : vector<16x1xf32> to vector<16x128xf32>
    %197 = arith.mulf %187, %196 : vector<16x128xf32>
    %198 = vector.broadcast %179 : vector<1x128xf32> to vector<16x128xf32>
    %199 = arith.mulf %197, %198 : vector<16x128xf32>
    %200 = vector.broadcast %181 : vector<1x128xf32> to vector<16x128xf32>
    %201 = arith.addf %199, %200 : vector<16x128xf32>
    %202 = arith.truncf %201 : vector<16x128xf32> to vector<16x128xbf16>
    %c1_81 = arith.constant 1 : index
    %c0_82 = arith.constant 0 : index
    %c0_83 = arith.constant 0 : index
    %203 = vector.load %arg4[%c1_81, %c0_82, %c0_83] : memref<2x128x1536xbf16, #tpu.memory_space<vmem>>, vector<1x128x1536xbf16>
    %204 = vector.shape_cast %203 : vector<1x128x1536xbf16> to vector<128x1536xbf16>
    %cst_84 = arith.constant dense<0.000000e+00> : vector<16x1536xf32>
    %205 = tpu.matmul %202, %204, %cst_84 {dimension_numbers = #tpu.dot_dimension_numbers<[1], [0], [0], [1], [0, 0, 1, 1], [], []>} : vector<16x128xbf16>, vector<128x1536xbf16>, vector<16x1536xf32> -> vector<16x1536xf32>
    %c1_85 = arith.constant 1 : index
    %c0_86 = arith.constant 0 : index
    %c0_87 = arith.constant 0 : index
    %206 = vector.load %arg5[%c1_85, %c0_86, %c0_87] : memref<2x1x1536xf32, #tpu.memory_space<vmem>>, vector<1x1x1536xf32>
    %207 = vector.shape_cast %206 : vector<1x1x1536xf32> to vector<1x1536xf32>
    %208 = vector.broadcast %207 : vector<1x1536xf32> to vector<16x1536xf32>
    %209 = arith.addf %205, %208 : vector<16x1536xf32>
    %210 = vector.extract_strided_slice %209 {offsets = [0, 0], sizes = [16, 128], strides = [1, 1]} : vector<16x1536xf32> to vector<16x128xf32>
    %211 = arith.truncf %210 : vector<16x128xf32> to vector<16x128xbf16>
    %212 = vector.extract_strided_slice %209 {offsets = [0, 512], sizes = [16, 128], strides = [1, 1]} : vector<16x1536xf32> to vector<16x128xf32>
    %213 = arith.truncf %212 : vector<16x128xf32> to vector<16x128xbf16>
    %214 = vector.extract_strided_slice %209 {offsets = [0, 1024], sizes = [16, 128], strides = [1, 1]} : vector<16x1536xf32> to vector<16x128xf32>
    %215 = arith.truncf %214 : vector<16x128xf32> to vector<16x128xbf16>
    %cst_88 = arith.constant dense<0.000000e+00> : vector<16x16xf32>
    %216 = tpu.matmul %211, %213, %cst_88 {dimension_numbers = #tpu.dot_dimension_numbers<[1], [1], [0], [0], [0, 0, 1, 0], [], []>} : vector<16x128xbf16>, vector<16x128xbf16>, vector<16x16xf32> -> vector<16x16xf32>
    %cst_89 = arith.constant dense<0xFF800000> : vector<16xf32>
    %217 = vector.multi_reduction <maximumf>, %216, %cst_89 [1] : vector<16x16xf32> to vector<16xf32>
    %218 = vector.shape_cast %217 : vector<16xf32> to vector<16x1xf32>
    %219 = vector.broadcast %218 : vector<16x1xf32> to vector<16x16xf32>
    %220 = arith.subf %216, %219 : vector<16x16xf32>
    %221 = math.exp %220 : vector<16x16xf32>
    %cst_90 = arith.constant dense<0.000000e+00> : vector<16xf32>
    %222 = vector.multi_reduction <add>, %221, %cst_90 [1] : vector<16x16xf32> to vector<16xf32>
    %223 = vector.shape_cast %222 : vector<16xf32> to vector<16x1xf32>
    %224 = tpu.reciprocal %223 {approx = true} : vector<16x1xf32> -> vector<16x1xf32>
    %225 = vector.broadcast %224 : vector<16x1xf32> to vector<16x16xf32>
    %226 = arith.mulf %221, %225 : vector<16x16xf32>
    %227 = arith.truncf %226 : vector<16x16xf32> to vector<16x16xbf16>
    %cst_91 = arith.constant dense<0.000000e+00> : vector<16x128xf32>
    %228 = tpu.matmul %227, %215, %cst_91 {dimension_numbers = #tpu.dot_dimension_numbers<[1], [0], [0], [1], [0, 0, 1, 1], [], []>} : vector<16x16xbf16>, vector<16x128xbf16>, vector<16x128xf32> -> vector<16x128xf32>
    %229 = arith.truncf %228 : vector<16x128xf32> to vector<16x128xbf16>
    %230 = vector.extract_strided_slice %209 {offsets = [0, 128], sizes = [16, 128], strides = [1, 1]} : vector<16x1536xf32> to vector<16x128xf32>
    %231 = arith.truncf %230 : vector<16x128xf32> to vector<16x128xbf16>
    %232 = vector.extract_strided_slice %209 {offsets = [0, 640], sizes = [16, 128], strides = [1, 1]} : vector<16x1536xf32> to vector<16x128xf32>
    %233 = arith.truncf %232 : vector<16x128xf32> to vector<16x128xbf16>
    %234 = vector.extract_strided_slice %209 {offsets = [0, 1152], sizes = [16, 128], strides = [1, 1]} : vector<16x1536xf32> to vector<16x128xf32>
    %235 = arith.truncf %234 : vector<16x128xf32> to vector<16x128xbf16>
    %cst_92 = arith.constant dense<0.000000e+00> : vector<16x16xf32>
    %236 = tpu.matmul %231, %233, %cst_92 {dimension_numbers = #tpu.dot_dimension_numbers<[1], [1], [0], [0], [0, 0, 1, 0], [], []>} : vector<16x128xbf16>, vector<16x128xbf16>, vector<16x16xf32> -> vector<16x16xf32>
    %cst_93 = arith.constant dense<0xFF800000> : vector<16xf32>
    %237 = vector.multi_reduction <maximumf>, %236, %cst_93 [1] : vector<16x16xf32> to vector<16xf32>
    %238 = vector.shape_cast %237 : vector<16xf32> to vector<16x1xf32>
    %239 = vector.broadcast %238 : vector<16x1xf32> to vector<16x16xf32>
    %240 = arith.subf %236, %239 : vector<16x16xf32>
    %241 = math.exp %240 : vector<16x16xf32>
    %cst_94 = arith.constant dense<0.000000e+00> : vector<16xf32>
    %242 = vector.multi_reduction <add>, %241, %cst_94 [1] : vector<16x16xf32> to vector<16xf32>
    %243 = vector.shape_cast %242 : vector<16xf32> to vector<16x1xf32>
    %244 = tpu.reciprocal %243 {approx = true} : vector<16x1xf32> -> vector<16x1xf32>
    %245 = vector.broadcast %244 : vector<16x1xf32> to vector<16x16xf32>
    %246 = arith.mulf %241, %245 : vector<16x16xf32>
    %247 = arith.truncf %246 : vector<16x16xf32> to vector<16x16xbf16>
    %cst_95 = arith.constant dense<0.000000e+00> : vector<16x128xf32>
    %248 = tpu.matmul %247, %235, %cst_95 {dimension_numbers = #tpu.dot_dimension_numbers<[1], [0], [0], [1], [0, 0, 1, 1], [], []>} : vector<16x16xbf16>, vector<16x128xbf16>, vector<16x128xf32> -> vector<16x128xf32>
    %249 = arith.truncf %248 : vector<16x128xf32> to vector<16x128xbf16>
    %250 = vector.extract_strided_slice %209 {offsets = [0, 256], sizes = [16, 128], strides = [1, 1]} : vector<16x1536xf32> to vector<16x128xf32>
    %251 = arith.truncf %250 : vector<16x128xf32> to vector<16x128xbf16>
    %252 = vector.extract_strided_slice %209 {offsets = [0, 768], sizes = [16, 128], strides = [1, 1]} : vector<16x1536xf32> to vector<16x128xf32>
    %253 = arith.truncf %252 : vector<16x128xf32> to vector<16x128xbf16>
    %254 = vector.extract_strided_slice %209 {offsets = [0, 1280], sizes = [16, 128], strides = [1, 1]} : vector<16x1536xf32> to vector<16x128xf32>
    %255 = arith.truncf %254 : vector<16x128xf32> to vector<16x128xbf16>
    %cst_96 = arith.constant dense<0.000000e+00> : vector<16x16xf32>
    %256 = tpu.matmul %251, %253, %cst_96 {dimension_numbers = #tpu.dot_dimension_numbers<[1], [1], [0], [0], [0, 0, 1, 0], [], []>} : vector<16x128xbf16>, vector<16x128xbf16>, vector<16x16xf32> -> vector<16x16xf32>
    %cst_97 = arith.constant dense<0xFF800000> : vector<16xf32>
    %257 = vector.multi_reduction <maximumf>, %256, %cst_97 [1] : vector<16x16xf32> to vector<16xf32>
    %258 = vector.shape_cast %257 : vector<16xf32> to vector<16x1xf32>
    %259 = vector.broadcast %258 : vector<16x1xf32> to vector<16x16xf32>
    %260 = arith.subf %256, %259 : vector<16x16xf32>
    %261 = math.exp %260 : vector<16x16xf32>
    %cst_98 = arith.constant dense<0.000000e+00> : vector<16xf32>
    %262 = vector.multi_reduction <add>, %261, %cst_98 [1] : vector<16x16xf32> to vector<16xf32>
    %263 = vector.shape_cast %262 : vector<16xf32> to vector<16x1xf32>
    %264 = tpu.reciprocal %263 {approx = true} : vector<16x1xf32> -> vector<16x1xf32>
    %265 = vector.broadcast %264 : vector<16x1xf32> to vector<16x16xf32>
    %266 = arith.mulf %261, %265 : vector<16x16xf32>
    %267 = arith.truncf %266 : vector<16x16xf32> to vector<16x16xbf16>
    %cst_99 = arith.constant dense<0.000000e+00> : vector<16x128xf32>
    %268 = tpu.matmul %267, %255, %cst_99 {dimension_numbers = #tpu.dot_dimension_numbers<[1], [0], [0], [1], [0, 0, 1, 1], [], []>} : vector<16x16xbf16>, vector<16x128xbf16>, vector<16x128xf32> -> vector<16x128xf32>
    %269 = arith.truncf %268 : vector<16x128xf32> to vector<16x128xbf16>
    %270 = vector.extract_strided_slice %209 {offsets = [0, 384], sizes = [16, 128], strides = [1, 1]} : vector<16x1536xf32> to vector<16x128xf32>
    %271 = arith.truncf %270 : vector<16x128xf32> to vector<16x128xbf16>
    %272 = vector.extract_strided_slice %209 {offsets = [0, 896], sizes = [16, 128], strides = [1, 1]} : vector<16x1536xf32> to vector<16x128xf32>
    %273 = arith.truncf %272 : vector<16x128xf32> to vector<16x128xbf16>
    %274 = vector.extract_strided_slice %209 {offsets = [0, 1408], sizes = [16, 128], strides = [1, 1]} : vector<16x1536xf32> to vector<16x128xf32>
    %275 = arith.truncf %274 : vector<16x128xf32> to vector<16x128xbf16>
    %cst_100 = arith.constant dense<0.000000e+00> : vector<16x16xf32>
    %276 = tpu.matmul %271, %273, %cst_100 {dimension_numbers = #tpu.dot_dimension_numbers<[1], [1], [0], [0], [0, 0, 1, 0], [], []>} : vector<16x128xbf16>, vector<16x128xbf16>, vector<16x16xf32> -> vector<16x16xf32>
    %cst_101 = arith.constant dense<0xFF800000> : vector<16xf32>
    %277 = vector.multi_reduction <maximumf>, %276, %cst_101 [1] : vector<16x16xf32> to vector<16xf32>
    %278 = vector.shape_cast %277 : vector<16xf32> to vector<16x1xf32>
    %279 = vector.broadcast %278 : vector<16x1xf32> to vector<16x16xf32>
    %280 = arith.subf %276, %279 : vector<16x16xf32>
    %281 = math.exp %280 : vector<16x16xf32>
    %cst_102 = arith.constant dense<0.000000e+00> : vector<16xf32>
    %282 = vector.multi_reduction <add>, %281, %cst_102 [1] : vector<16x16xf32> to vector<16xf32>
    %283 = vector.shape_cast %282 : vector<16xf32> to vector<16x1xf32>
    %284 = tpu.reciprocal %283 {approx = true} : vector<16x1xf32> -> vector<16x1xf32>
    %285 = vector.broadcast %284 : vector<16x1xf32> to vector<16x16xf32>
    %286 = arith.mulf %281, %285 : vector<16x16xf32>
    %287 = arith.truncf %286 : vector<16x16xf32> to vector<16x16xbf16>
    %cst_103 = arith.constant dense<0.000000e+00> : vector<16x128xf32>
    %288 = tpu.matmul %287, %275, %cst_103 {dimension_numbers = #tpu.dot_dimension_numbers<[1], [0], [0], [1], [0, 0, 1, 1], [], []>} : vector<16x16xbf16>, vector<16x128xbf16>, vector<16x128xf32> -> vector<16x128xf32>
    %289 = arith.truncf %288 : vector<16x128xf32> to vector<16x128xbf16>
    %290 = tpu.concatenate %229, %249, %269, %289 in 1 : vector<16x128xbf16>, vector<16x128xbf16>, vector<16x128xbf16>, vector<16x128xbf16> -> vector<16x512xbf16>
    %c1_104 = arith.constant 1 : index
    %c0_105 = arith.constant 0 : index
    %c0_106 = arith.constant 0 : index
    %291 = vector.load %arg6[%c1_104, %c0_105, %c0_106] : memref<2x512x128xbf16, #tpu.memory_space<vmem>>, vector<1x512x128xbf16>
    %292 = vector.shape_cast %291 : vector<1x512x128xbf16> to vector<512x128xbf16>
    %cst_107 = arith.constant dense<0.000000e+00> : vector<16x128xf32>
    %293 = tpu.matmul %290, %292, %cst_107 {dimension_numbers = #tpu.dot_dimension_numbers<[1], [0], [0], [1], [0, 0, 1, 1], [], []>} : vector<16x512xbf16>, vector<512x128xbf16>, vector<16x128xf32> -> vector<16x128xf32>
    %294 = arith.addf %177, %293 : vector<16x128xf32>
    %c1_108 = arith.constant 1 : index
    %c0_109 = arith.constant 0 : index
    %c0_110 = arith.constant 0 : index
    %295 = vector.load %arg7[%c1_108, %c0_109, %c0_110] : memref<2x1x128xf32, #tpu.memory_space<vmem>>, vector<1x1x128xf32>
    %296 = vector.shape_cast %295 : vector<1x1x128xf32> to vector<1x128xf32>
    %297 = vector.broadcast %296 : vector<1x128xf32> to vector<16x128xf32>
    %298 = arith.addf %294, %297 : vector<16x128xf32>
    %c1_111 = arith.constant 1 : index
    %c0_112 = arith.constant 0 : index
    %c0_113 = arith.constant 0 : index
    %299 = vector.load %arg8[%c1_111, %c0_112, %c0_113] : memref<2x1x128xf32, #tpu.memory_space<vmem>>, vector<1x1x128xf32>
    %300 = vector.shape_cast %299 : vector<1x1x128xf32> to vector<1x128xf32>
    %c1_114 = arith.constant 1 : index
    %c0_115 = arith.constant 0 : index
    %c0_116 = arith.constant 0 : index
    %301 = vector.load %arg9[%c1_114, %c0_115, %c0_116] : memref<2x1x128xf32, #tpu.memory_space<vmem>>, vector<1x1x128xf32>
    %302 = vector.shape_cast %301 : vector<1x1x128xf32> to vector<1x128xf32>
    %cst_117 = arith.constant dense<0.000000e+00> : vector<16xf32>
    %303 = vector.multi_reduction <add>, %298, %cst_117 [1] : vector<16x128xf32> to vector<16xf32>
    %304 = vector.shape_cast %303 : vector<16xf32> to vector<16x1xf32>
    %cst_118 = arith.constant 1.280000e+02 : f32
    %305 = vector.broadcast %cst_118 : f32 to vector<16x1xf32>
    %306 = arith.divf %304, %305 : vector<16x1xf32>
    %307 = vector.broadcast %306 : vector<16x1xf32> to vector<16x128xf32>
    %308 = arith.subf %298, %307 : vector<16x128xf32>
    %309 = arith.mulf %308, %308 : vector<16x128xf32>
    %cst_119 = arith.constant dense<0.000000e+00> : vector<16xf32>
    %310 = vector.multi_reduction <add>, %309, %cst_119 [1] : vector<16x128xf32> to vector<16xf32>
    %311 = vector.shape_cast %310 : vector<16xf32> to vector<16x1xf32>
    %cst_120 = arith.constant 1.280000e+02 : f32
    %312 = vector.broadcast %cst_120 : f32 to vector<16x1xf32>
    %313 = arith.divf %311, %312 : vector<16x1xf32>
    %cst_121 = arith.constant 9.99999997E-7 : f32
    %314 = vector.broadcast %cst_121 : f32 to vector<16x1xf32>
    %315 = arith.addf %313, %314 : vector<16x1xf32>
    %316 = math.rsqrt %315 : vector<16x1xf32>
    %317 = vector.broadcast %316 : vector<16x1xf32> to vector<16x128xf32>
    %318 = arith.mulf %308, %317 : vector<16x128xf32>
    %319 = vector.broadcast %300 : vector<1x128xf32> to vector<16x128xf32>
    %320 = arith.mulf %318, %319 : vector<16x128xf32>
    %321 = vector.broadcast %302 : vector<1x128xf32> to vector<16x128xf32>
    %322 = arith.addf %320, %321 : vector<16x128xf32>
    %323 = arith.truncf %322 : vector<16x128xf32> to vector<16x128xbf16>
    %c1_122 = arith.constant 1 : index
    %c0_123 = arith.constant 0 : index
    %c0_124 = arith.constant 0 : index
    %324 = vector.load %arg10[%c1_122, %c0_123, %c0_124] : memref<2x128x256xbf16, #tpu.memory_space<vmem>>, vector<1x128x256xbf16>
    %325 = vector.shape_cast %324 : vector<1x128x256xbf16> to vector<128x256xbf16>
    %cst_125 = arith.constant dense<0.000000e+00> : vector<16x256xf32>
    %326 = tpu.matmul %323, %325, %cst_125 {dimension_numbers = #tpu.dot_dimension_numbers<[1], [0], [0], [1], [0, 0, 1, 1], [], []>} : vector<16x128xbf16>, vector<128x256xbf16>, vector<16x256xf32> -> vector<16x256xf32>
    %c1_126 = arith.constant 1 : index
    %c0_127 = arith.constant 0 : index
    %c0_128 = arith.constant 0 : index
    %327 = vector.load %arg11[%c1_126, %c0_127, %c0_128] : memref<2x1x256xf32, #tpu.memory_space<vmem>>, vector<1x1x256xf32>
    %328 = vector.shape_cast %327 : vector<1x1x256xf32> to vector<1x256xf32>
    %329 = vector.broadcast %328 : vector<1x256xf32> to vector<16x256xf32>
    %330 = arith.addf %326, %329 : vector<16x256xf32>
    %cst_129 = arith.constant 5.000000e-01 : f32
    %331 = vector.broadcast %cst_129 : f32 to vector<16x256xf32>
    %332 = arith.mulf %331, %330 : vector<16x256xf32>
    %cst_130 = arith.constant 4.471500e-02 : f32
    %333 = vector.broadcast %cst_130 : f32 to vector<16x256xf32>
    %334 = arith.mulf %333, %330 : vector<16x256xf32>
    %335 = arith.mulf %334, %330 : vector<16x256xf32>
    %336 = arith.mulf %335, %330 : vector<16x256xf32>
    %337 = arith.addf %330, %336 : vector<16x256xf32>
    %cst_131 = arith.constant 0.797884583 : f32
    %338 = vector.broadcast %cst_131 : f32 to vector<16x256xf32>
    %339 = arith.mulf %338, %337 : vector<16x256xf32>
    %340 = math.tanh %339 : vector<16x256xf32>
    %cst_132 = arith.constant 1.000000e+00 : f32
    %341 = vector.broadcast %cst_132 : f32 to vector<16x256xf32>
    %342 = arith.addf %341, %340 : vector<16x256xf32>
    %343 = arith.mulf %332, %342 : vector<16x256xf32>
    %344 = arith.truncf %343 : vector<16x256xf32> to vector<16x256xbf16>
    %c1_133 = arith.constant 1 : index
    %c0_134 = arith.constant 0 : index
    %c0_135 = arith.constant 0 : index
    %345 = vector.load %arg12[%c1_133, %c0_134, %c0_135] : memref<2x256x128xbf16, #tpu.memory_space<vmem>>, vector<1x256x128xbf16>
    %346 = vector.shape_cast %345 : vector<1x256x128xbf16> to vector<256x128xbf16>
    %cst_136 = arith.constant dense<0.000000e+00> : vector<16x128xf32>
    %347 = tpu.matmul %344, %346, %cst_136 {dimension_numbers = #tpu.dot_dimension_numbers<[1], [0], [0], [1], [0, 0, 1, 1], [], []>} : vector<16x256xbf16>, vector<256x128xbf16>, vector<16x128xf32> -> vector<16x128xf32>
    %c1_137 = arith.constant 1 : index
    %c0_138 = arith.constant 0 : index
    %c0_139 = arith.constant 0 : index
    %348 = vector.load %arg13[%c1_137, %c0_138, %c0_139] : memref<2x1x128xf32, #tpu.memory_space<vmem>>, vector<1x1x128xf32>
    %349 = vector.shape_cast %348 : vector<1x1x128xf32> to vector<1x128xf32>
    %350 = vector.broadcast %349 : vector<1x128xf32> to vector<16x128xf32>
    %351 = arith.addf %347, %350 : vector<16x128xf32>
    %352 = arith.addf %298, %351 : vector<16x128xf32>
    %c0_140 = arith.constant 0 : index
    %c0_141 = arith.constant 0 : index
    %353 = vector.load %arg14[%c0_140, %c0_141] : memref<1x128xf32, #tpu.memory_space<vmem>>, vector<1x128xf32>
    %c0_142 = arith.constant 0 : index
    %c0_143 = arith.constant 0 : index
    %354 = vector.load %arg15[%c0_142, %c0_143] : memref<1x128xf32, #tpu.memory_space<vmem>>, vector<1x128xf32>
    %cst_144 = arith.constant dense<0.000000e+00> : vector<16xf32>
    %355 = vector.multi_reduction <add>, %352, %cst_144 [1] : vector<16x128xf32> to vector<16xf32>
    %356 = vector.shape_cast %355 : vector<16xf32> to vector<16x1xf32>
    %cst_145 = arith.constant 1.280000e+02 : f32
    %357 = vector.broadcast %cst_145 : f32 to vector<16x1xf32>
    %358 = arith.divf %356, %357 : vector<16x1xf32>
    %359 = vector.broadcast %358 : vector<16x1xf32> to vector<16x128xf32>
    %360 = arith.subf %352, %359 : vector<16x128xf32>
    %361 = arith.mulf %360, %360 : vector<16x128xf32>
    %cst_146 = arith.constant dense<0.000000e+00> : vector<16xf32>
    %362 = vector.multi_reduction <add>, %361, %cst_146 [1] : vector<16x128xf32> to vector<16xf32>
    %363 = vector.shape_cast %362 : vector<16xf32> to vector<16x1xf32>
    %cst_147 = arith.constant 1.280000e+02 : f32
    %364 = vector.broadcast %cst_147 : f32 to vector<16x1xf32>
    %365 = arith.divf %363, %364 : vector<16x1xf32>
    %cst_148 = arith.constant 9.99999997E-7 : f32
    %366 = vector.broadcast %cst_148 : f32 to vector<16x1xf32>
    %367 = arith.addf %365, %366 : vector<16x1xf32>
    %368 = math.rsqrt %367 : vector<16x1xf32>
    %369 = vector.broadcast %368 : vector<16x1xf32> to vector<16x128xf32>
    %370 = arith.mulf %360, %369 : vector<16x128xf32>
    %371 = vector.broadcast %353 : vector<1x128xf32> to vector<16x128xf32>
    %372 = arith.mulf %370, %371 : vector<16x128xf32>
    %373 = vector.broadcast %354 : vector<1x128xf32> to vector<16x128xf32>
    %374 = arith.addf %372, %373 : vector<16x128xf32>
    %c0_149 = arith.constant 0 : index
    %c0_150 = arith.constant 0 : index
    %c0_151 = arith.constant 0 : index
    %375 = vector.load %arg16[%c0_149, %c0_150, %c0_151] : memref<1x16x128xf32, #tpu.memory_space<vmem>>, vector<1x16x128xf32>
    %376 = vector.shape_cast %375 : vector<1x16x128xf32> to vector<16x128xf32>
    %377 = vector.shape_cast %374 : vector<16x128xf32> to vector<1x16x128xf32>
    tpu.vector_store %arg16[%c0_149, %c0_150, %c0_151], %377 {strides = array<i32>} : memref<1x16x128xf32, #tpu.memory_space<vmem>>, vector<1x16x128xf32>,
    return
  }
  func.func @transform_0(%arg0: i32) -> (i32, i32, i32) {
    %c0_i32 = arith.constant 0 : i32
    %c0_i32_0 = arith.constant 0 : i32
    %c0_i32_1 = arith.constant 0 : i32
    return %arg0, %c0_i32, %c0_i32_0 : i32, i32, i32
  }
  func.func @transform_1(%arg0: i32) -> (i32, i32, i32) {
    %c0_i32 = arith.constant 0 : i32
    %c0_i32_0 = arith.constant 0 : i32
    %c0_i32_1 = arith.constant 0 : i32
    %c0_i32_2 = arith.constant 0 : i32
    return %c0_i32, %c0_i32_0, %c0_i32_1 : i32, i32, i32
  }
  func.func @transform_2(%arg0: i32) -> (i32, i32, i32) {
    %c0_i32 = arith.constant 0 : i32
    %c0_i32_0 = arith.constant 0 : i32
    %c0_i32_1 = arith.constant 0 : i32
    %c0_i32_2 = arith.constant 0 : i32
    return %c0_i32, %c0_i32_0, %c0_i32_1 : i32, i32, i32
  }
  func.func @transform_3(%arg0: i32) -> (i32, i32, i32) {
    %c0_i32 = arith.constant 0 : i32
    %c0_i32_0 = arith.constant 0 : i32
    %c0_i32_1 = arith.constant 0 : i32
    %c0_i32_2 = arith.constant 0 : i32
    return %c0_i32, %c0_i32_0, %c0_i32_1 : i32, i32, i32
  }
  func.func @transform_4(%arg0: i32) -> (i32, i32, i32) {
    %c0_i32 = arith.constant 0 : i32
    %c0_i32_0 = arith.constant 0 : i32
    %c0_i32_1 = arith.constant 0 : i32
    %c0_i32_2 = arith.constant 0 : i32
    return %c0_i32, %c0_i32_0, %c0_i32_1 : i32, i32, i32
  }
  func.func @transform_5(%arg0: i32) -> (i32, i32, i32) {
    %c0_i32 = arith.constant 0 : i32
    %c0_i32_0 = arith.constant 0 : i32
    %c0_i32_1 = arith.constant 0 : i32
    %c0_i32_2 = arith.constant 0 : i32
    return %c0_i32, %c0_i32_0, %c0_i32_1 : i32, i32, i32
  }
  func.func @transform_6(%arg0: i32) -> (i32, i32, i32) {
    %c0_i32 = arith.constant 0 : i32
    %c0_i32_0 = arith.constant 0 : i32
    %c0_i32_1 = arith.constant 0 : i32
    %c0_i32_2 = arith.constant 0 : i32
    return %c0_i32, %c0_i32_0, %c0_i32_1 : i32, i32, i32
  }
  func.func @transform_7(%arg0: i32) -> (i32, i32, i32) {
    %c0_i32 = arith.constant 0 : i32
    %c0_i32_0 = arith.constant 0 : i32
    %c0_i32_1 = arith.constant 0 : i32
    %c0_i32_2 = arith.constant 0 : i32
    return %c0_i32, %c0_i32_0, %c0_i32_1 : i32, i32, i32
  }
  func.func @transform_8(%arg0: i32) -> (i32, i32, i32) {
    %c0_i32 = arith.constant 0 : i32
    %c0_i32_0 = arith.constant 0 : i32
    %c0_i32_1 = arith.constant 0 : i32
    %c0_i32_2 = arith.constant 0 : i32
    return %c0_i32, %c0_i32_0, %c0_i32_1 : i32, i32, i32
  }
  func.func @transform_9(%arg0: i32) -> (i32, i32, i32) {
    %c0_i32 = arith.constant 0 : i32
    %c0_i32_0 = arith.constant 0 : i32
    %c0_i32_1 = arith.constant 0 : i32
    %c0_i32_2 = arith.constant 0 : i32
    return %c0_i32, %c0_i32_0, %c0_i32_1 : i32, i32, i32
  }
  func.func @transform_10(%arg0: i32) -> (i32, i32, i32) {
    %c0_i32 = arith.constant 0 : i32
    %c0_i32_0 = arith.constant 0 : i32
    %c0_i32_1 = arith.constant 0 : i32
    %c0_i32_2 = arith.constant 0 : i32
    return %c0_i32, %c0_i32_0, %c0_i32_1 : i32, i32, i32
  }
  func.func @transform_11(%arg0: i32) -> (i32, i32, i32) {
    %c0_i32 = arith.constant 0 : i32
    %c0_i32_0 = arith.constant 0 : i32
    %c0_i32_1 = arith.constant 0 : i32
    %c0_i32_2 = arith.constant 0 : i32
    return %c0_i32, %c0_i32_0, %c0_i32_1 : i32, i32, i32
  }
  func.func @transform_12(%arg0: i32) -> (i32, i32, i32) {
    %c0_i32 = arith.constant 0 : i32
    %c0_i32_0 = arith.constant 0 : i32
    %c0_i32_1 = arith.constant 0 : i32
    %c0_i32_2 = arith.constant 0 : i32
    return %c0_i32, %c0_i32_0, %c0_i32_1 : i32, i32, i32
  }
  func.func @transform_13(%arg0: i32) -> (i32, i32) {
    %c0_i32 = arith.constant 0 : i32
    %c0_i32_0 = arith.constant 0 : i32
    %c0_i32_1 = arith.constant 0 : i32
    return %c0_i32, %c0_i32_0 : i32, i32
  }
  func.func @transform_14(%arg0: i32) -> (i32, i32) {
    %c0_i32 = arith.constant 0 : i32
    %c0_i32_0 = arith.constant 0 : i32
    %c0_i32_1 = arith.constant 0 : i32
    return %c0_i32, %c0_i32_0 : i32, i32
  }
  func.func @transform_15(%arg0: i32) -> (i32, i32, i32) {
    %c0_i32 = arith.constant 0 : i32
    %c0_i32_0 = arith.constant 0 : i32
    %c0_i32_1 = arith.constant 0 : i32
    return %arg0, %c0_i32, %c0_i32_0 : i32, i32, i32
  }
}

</mosaic_0001>

<bundles_post_ra>
// kernel: siglip_vision_model.2
= control target key start
LH: loop header
LB: loop body
LE: loop exit
PB: predicated region body
PF: predicated region fallthrough
CT: control target
= control target key end

     0   :  { %9 = vsyncpa [#allocation3], 0  ;;  %s766_s0 = inlined_call_operand.vmem [shape: bf16[2,16,192], index: 0, kind: input, shape index: {}]   ;;  %s767_s1 = inlined_call_operand.vmem [shape: bf16[192,128], index: 1, kind: input, shape index: {}]   ;;  %s768_s2 = inlined_call_operand.hbm [shape: f32[1,128], index: 2, kind: input, shape index: {}]   ;;  %s769_s3 = inlined_call_operand.hbm [shape: f32[16,128], index: 3, kind: input, shape index: {}]   ;;  %s770_s4 = inlined_call_operand.vmem [shape: bf16[2,16,128], index: 4, kind: output, shape index: {}]  }
   0x1   :  { %10 = vsyncpa [#allocation5], 0  ;;  %s664_s15 = smov 0  }
   0x2 LB: > { %s670_s16 = sadd.s32 4294967295, %s632_s15   ;;  %p479_p0 = scmp.ge.s32.totalorder %s632_s15, 1  ;;  %s632_s15 = sphi %s664_s15, %s16_s15  }
   0x3   : > { %p136_p1 = scmp.lt.s32.totalorder %s632_s15, 3  ;;  %p771_p2 = scmp.eq.s32.totalorder %s670_s16, 0 }
   0x4   : > { %s634_s17 = smov [#allocation2]   ;;  %s635_s20 = smov [#allocation4]  }
   0x5   : > { %s152_s18 = sshll.u32 %s634_s17, 4  ;;  %p675_p3 = pnand %p479_p0, %p136_p1  ;;  %s153_s18 = int_to_ptr.vmem [resolvable:$true] %s152_s18 }
   0x6   : > { %s162_s21 = sshll.u32 %s635_s20, 4  ;;  %s577_s23 = scalar_lea.vmem %s153_s18, 16  ;;  %s163_s21 = int_to_ptr.vmem [resolvable:$true] %s162_s21 }
   0x7   : > { %s773_s19 = scalar_select %p675_p3, 1, 0 }
   0x8   : > { %p527_p4 = pneg %p675_p3  ;;  %p578_p7 = scmp.ne.s32.totalorder %s153_s18, %s577_s23 }
   0x9   : > { %s584_s24 = scalar_lea.vmem %s153_s18, 32  ;;  %p585_p10 = scmp.lt.s32.totalorder %s153_s18, %s153_s18 }
   0xa   : > { %p683_p5 = pnand %p771_p2, %p527_p4  ;;  %p586_p11 = scmp.lt.s32.totalorder %s584_s24, %s577_s23 }
   0xc   : > { %p568_p6 = pneg %p683_p5  ;;  %p587_p12 = por %p586_p11, %p585_p10 }
   0xe   : > { %p580_p8 = pnand %p578_p7, %p568_p6 }
  0x10   : > { %p581_p9 = pneg %p580_p8 }
  0x12   : > { %p588_p13 = pnand %p587_p12, %p581_p9 }
  0x14   : > { %591 = shalt.err (!%p588_p13)
}
  0x15   : > { %530 = dma.hbm_to_vmem [thread:$0]  (!%p683_p5), %s768_s2, 16, %s153_s18, [#allocation3]  }
  0x16   : > { %s603_s27 = scalar_lea.vmem %s163_s21, 256  ;;  %p611_p7 = scmp.lt.s32.totalorder %s163_s21, %s163_s21 }
  0x17   : > { %p604_p0 = scmp.ne.s32.totalorder %s163_s21, %s603_s27  ;;  %p612_p8 = scmp.lt.s32.totalorder %s603_s27, %s603_s27 }
  0x19   : > { %p606_p1 = pnand %p604_p0, %p568_p6  ;;  %p613_p2 = por %p612_p8, %p611_p7 }
  0x1b   : > { %p607_p4 = pneg %p606_p1 }
  0x1d   : > { %p614_p3 = pnand %p613_p2, %p607_p4 }
  0x1f   : > { %617 = shalt.err (!%p614_p3)
}
  0x20   : > { %s636_s28 = smov 128   ;;  %s637_s29 = smov 8  }
  0x21   : > { %533 = dma.hbm_to_vmem [thread:$0]  (!%p683_p5), %s769_s3, 256, %s163_s21, [#allocation5], %s636_s28, %s636_s28, %s637_s29  }
  0x22   : > { %p775_p9 = scmp.ne.s32.totalorder %s773_s19, 0 }
  0x23   : > { %p776_p10 = scmp.eq.s32.totalorder (!%p775_p9), %s670_s16, 0 }
  0x24   : > { %186 = sbr.rel (%p775_p9) target bundleno = 299 (0x12b), region = 36 }
  0x29   : > { %623 = dma.done.wait (%p776_p10), [#allocation3], 16   ;;  %p777_p6 = pmov %p776_p10 }
  0x2b   : > { %625 = vsyncadd (%p777_p6), [#allocation3], 4294967280  ;;  %p778_p2 = pmov %p777_p6 }
  0x2d   : > { %627 = dma.done.wait (%p778_p2), [#allocation5], 256   ;;  %p779_p3 = pmov %p778_p2 }
  0x2e   : > { %v638_v0 = vmov 0   ;;  %p216_p5 = scmp.lt.s32.totalorder %s670_s16, 1  ;;  %v551_v1 = vld [vmem:[%s767_s1 + $0x38] sm:$0xff]   ;;  %v552_v2 = vld [vmem:[%s767_s1 + $0x30] sm:$0xff]   ;;  %v553_v3 = vld [vmem:[%s767_s1 + $0x28] sm:$0xff]   ;;  %vm341_vm0 = vcmask 523264  }
  0x2f   : > { %629 = vsyncadd (%p779_p3), [#allocation5], 4294967040  ;;  %345 = vmatprep.subr.bf16.mxu0 %v638_v0  ;;  %v554_v4 = vld [vmem:[%s767_s1 + $0x20] sm:$0xff]   ;;  %v555_v6 = vld [vmem:[%s767_s1 + $0x18] sm:$0xff]  }
  0x30   : > { %346 = vmatpush1.bf16.msra.mxu0 %v551_v1  ;;  %s781_s16 = smov (!%p216_p5, %s670_s16), 1  ;;  %v556_v7 = vld [vmem:[%s767_s1 + $0x10] sm:$0xff]   ;;  %v557_v8 = vld [vmem:[%s767_s1 + $0x8] sm:$0xff]   ;;  %v558_v9 = vld [vmem:[%s767_s1] sm:$0xff]  }
  0x31   : > { %347 = vmatprep.subr.bf16.mxu0 %v638_v0  ;;  %s510_s12 = sshll.u32 %s781_s16, 4  ;;  %v559_v10 = vld [vmem:[%s767_s1 + $0x58] sm:$0xff]   ;;  %v560_v11 = vld [vmem:[%s767_s1 + $0x50] sm:$0xff]   ;;  %v561_v12 = vld [vmem:[%s767_s1 + $0x48] sm:$0xff]   ;;  %s511_s10 = sshll.u32 %s781_s16, 3 }
  0x32   : > { %s220_s19 = scalar_lea.vmem %s766_s0, %s510_s12  ;;  %v562_v13 = vld [vmem:[%s767_s1 + $0x40] sm:$0xff]   ;;  %v387_v21 = vld [vmem:[#allocation4 + $0x8] sm:$0xff]  ;;  %s225_s13 = scalar_lea.vmem %s770_s4, %s511_s10 }
  0x33   : > { %v565_v5 = vld [vmem:[%s220_s19 + $0x4] ss:$8 sps:$4 sm:$0xff]   ;;  %v563_v14 = vld [vmem:[%s220_s19] ss:$8 sps:$4 sm:$0xff]  }
  0x34   : > { %348 = vmatpush1.bf16.msra.mxu0 %v552_v2  ;;  %505 = vmatprep.mubr.msk.bf16.mxu0 %vm341_vm0, %v565_v5  ;;  %v490_v15 = vld [vmem:[#allocation2] ss:$0 sm:$0xff]  ;;  %v386_v19 = vld [vmem:[#allocation4] sm:$0xff] }
  0x35   : > { %349 = vmatprep.subr.bf16.mxu0 %v638_v0 }
  0x38   : > { %350 = vmatpush1.bf16.msra.mxu0 %v553_v3 }
  0x39   : > { %351 = vmatprep.subr.bf16.mxu0 %v638_v0 }
  0x3c   : > { %352 = vmatpush1.bf16.msra.mxu0 %v554_v4 }
  0x3d   : > { %353 = vmatprep.subr.bf16.mxu0 %v638_v0 }
  0x40   : > { %354 = vmatpush1.bf16.msra.mxu0 %v555_v6 }
  0x41   : > { %355 = vmatprep.subr.bf16.mxu0 %v638_v0 }
  0x44   : > { %356 = vmatpush1.bf16.msra.mxu0 %v556_v7 }
  0x45   : > { %357 = vmatprep.subr.bf16.mxu0 %v638_v0 }
  0x48   : > { %358 = vmatpush1.bf16.msra.mxu0 %v557_v8 }
  0x49   : > { %359 = vmatprep.subr.bf16.mxu0 %v638_v0 }
  0x4c   : > { %360 = vmatpush1.bf16.msra.mxu0 %v558_v9 }
  0x4d   : > { %369 = vmatprep.subr.bf16.mxu0 %v638_v0 }
  0x50   : > { %370 = vmatpush2.bf16.msra.mxu0 %v559_v10 }
  0x51   : > { %371 = vmatprep.subr.bf16.mxu0 %v638_v0 }
  0x54   : > { %372 = vmatpush2.bf16.msra.mxu0 %v560_v11 }
  0x55   : > { %373 = vmatprep.subr.bf16.mxu0 %v638_v0 }
  0x58   : > { %374 = vmatpush2.bf16.msra.mxu0 %v561_v12 }
  0x59   : > { %375 = vmatprep.subr.bf16.mxu0 %v638_v0 }
  0x5c   : > { %376 = vmatpush2.bf16.msra.mxu0 %v562_v13 }
  0x5f   : > { %378 = vmatmul.mubr.bf16.vlgmr.msra.gmra.mxu0 %v563_v14 }
 0x11f   : > { %v379_v16 = vpop.f32.mrf.mxu0 }
 0x120   : > { %v380_v18 = vadd.f32 %v490_v15, %v379_v16 }
 0x121   : > { %v381_v17 = vpop.f32.mrf.mxu0 }
 0x122   : > { %v388_v24 = vadd.f32 %v386_v19, %v380_v18 }
 0x123   : > { %v382_v20 = vpop.f32.mrf.mxu0 }
 0x124   : > { %v383_v22 = vadd.f32 %v490_v15, %v382_v20 }
 0x125   : > { %v384_v23 = vpop.f32.mrf.mxu0 }
 0x126   : > { %v389_v25 = vadd.f32 %v387_v21, %v383_v22 }
 0x128   : > { %v517_v26 = vpack.c.bf16 %v389_v25, %v388_v24 }
 0x12a   : > { %518 = vst [vmem:[%s225_s13] sm:$0xff] %v517_v26  }
 0x12b PF: > { %s16_s15 = sadd.s32 1, %s632_s15  }
 0x12c   : > { %p13_p11 = scmp.ge.s32.totalorder %s16_s15, 4  }
 0x12e   :  { %15 = sbr.rel (!%p13_p11) target bundleno = 2 (0x2), region = 75 }
 0x133   :  { %421 = vsyncpa [#allocation3], 1 }
 0x134   :  { %423 = vsyncpa [#allocation3 + $0x1], 1 }
 0x135   :  { %424 = vsyncpa [#allocation5], 1 }

// kernel: siglip_vision_model.3
= control target key start
LH: loop header
LB: loop body
LE: loop exit
PB: predicated region body
PF: predicated region fallthrough
CT: control target
= control target key end

     0   :  { %s8569_s0 = inlined_call_operand.vmem [shape: bf16[2,16,128], index: 0, kind: input, shape index: {}]   ;;  %s8570_s1 = inlined_call_operand.hbm [shape: f32[2,1,128], index: 1, kind: input, shape index: {}]   ;;  %s8571_s2 = inlined_call_operand.hbm [shape: f32[2,1,128], index: 2, kind: input, shape index: {}]   ;;  %s8572_s3 = inlined_call_operand.vmem [shape: bf16[2,128,1536], index: 3, kind: input, shape index: {}]   ;;  %s8573_s4 = inlined_call_operand.hbm [shape: f32[2,1,1536], index: 4, kind: input, shape index: {}]   ;;  %s8574_s5 = inlined_call_operand.vmem [shape: bf16[2,512,128], index: 5, kind: input, shape index: {}]   ;;  %s8575_s6 = inlined_call_operand.hbm [shape: f32[2,1,128], index: 6, kind: input, shape index: {}]   ;;  %s8576_s7 = inlined_call_operand.hbm [shape: f32[2,1,128], index: 7, kind: input, shape index: {}]   ;;  %s8577_s8 = inlined_call_operand.hbm [shape: f32[2,1,128], index: 8, kind: input, shape index: {}]   ;;  %s8578_s9 = inlined_call_operand.hbm [shape: bf16[2,128,256], index: 9, kind: input, shape index: {}]   ;;  %s8579_s10 = inlined_call_operand.hbm [shape: f32[2,1,256], index: 10, kind: input, shape index: {}]   ;;  %s8580_s11 = inlined_call_operand.hbm [shape: bf16[2,256,128], index: 11, kind: input, shape index: {}]   ;;  %s8581_s12 = inlined_call_operand.hbm [shape: f32[2,1,128], index: 12, kind: input, shape index: {}]   ;;  %s8582_s13 = inlined_call_operand.hbm [shape: f32[1,128], index: 13, kind: input, shape index: {}]   ;;  %s8583_s14 = inlined_call_operand.hbm [shape: f32[1,128], index: 14, kind: input, shape index: {}]   ;;  %s8584_s15 = inlined_call_operand.hbm [shape: f32[2,16,128], index: 15, kind: output, shape index: {}]  }
   0x1   :  { %8599 = sst [smem:[#allocation37_spill]] %s8570_s1 }
   0x2   :  { %8600 = sst [smem:[#allocation38_spill]] %s8571_s2 }
   0x3   :  { %8601 = sst [smem:[#allocation39_spill]] %s8575_s6 }
   0x4   :  { %8602 = sst [smem:[#allocation40_spill]] %s8584_s15 }
   0x5   :  { %20 = vsyncpa [#allocation3], 0 }
   0x6   :  { %21 = vsyncpa [#allocation6], 0 }
   0x7   :  { %22 = vsyncpa [#allocation9], 0 }
   0x8   :  { %23 = vsyncpa [#allocation12], 0 }
   0x9   :  { %24 = vsyncpa [#allocation15], 0 }
   0xa   :  { %25 = vsyncpa [#allocation18], 0 }
   0xb   :  { %26 = vsyncpa [#allocation21], 0 }
   0xc   :  { %27 = vsyncpa [#allocation4], 0 }
   0xd   :  { %29 = vsyncpa [#allocation4 + $0x1], 0  ;;  %s7227_s18 = smov 0   ;;  %s7229_s19 = smov 0  }
   0xe   :  { %s7231_s20 = smov 0   ;;  %s7233_s21 = smov 0  }
   0xf LB: > { %8603 = sst [smem:[#allocation31_spill]] %s7105_s18  ;;  %s7248_s22 = sadd.s32 4294967295, %s7117_s21   ;;  %s7117_s21 = sphi %s7233_s21, %s8640_s21   ;;  %s7113_s20 = sphi %s7231_s20, %s8642_s20   ;;  %s7109_s19 = sphi %s7229_s19, %s8644_s19   ;;  %s7105_s18 = sphi %s7227_s18, %s8643_s18  }
  0x10   : > { %8604 = sst [smem:[#allocation32_spill]] %s7113_s20  ;;  %s5206_s23 = sadd.s32 4294967294, %s7117_s21  }
  0x11   : > { %8605 = sst [smem:[#allocation33_spill]] %s7117_s21  ;;  %s7252_s24 = sadd.s32 1, %s7117_s21  }
  0x12   : > { %8606 = sst [smem:[#allocation34_spill]] %s7252_s24  ;;  %s362_s25 = sadd.s32 1, %s7113_s20 }
  0x13   : > { %s359_s26 = ssub.s32 %s7117_s21, %s7252_s24  ;;  %p372_p0 = scmp.ne.s32.totalorder %s7113_s20, %s7109_s19 }
  0x14   : > { %p360_p1 = scmp.eq.s32.totalorder %s359_s26, 0  ;;  %p373_p2 = scmp.eq.s32.totalorder %s7248_s22, 1 }
  0x15   : > { %p378_p3 = scmp.ne.s32.totalorder %s7109_s19, %s7105_s18  ;;  %p379_p4 = scmp.eq.s32.totalorder %s5206_s23, 1 }
  0x16   : > { %s7263_s27 = scalar_select %p360_p1, %s7113_s20, %s362_s25  }
  0x17   : > { %p7265_p5 = por %p373_p2, %p372_p0  ;;  %p7269_p6 = por %p379_p4, %p378_p3 }
  0x18   : > { %8607 = sst [smem:[#allocation35_spill]] %s7263_s27  ;;  %p5207_p7 = scmp.ge.s32.totalorder %s7117_s21, 1 }
  0x19   : > { %s8608_s28 = scalar_select %p7265_p5, 1, 0 }
  0x1a   : > { %s8609_s29 = scalar_select %p7269_p6, 1, 0 }
  0x1b   : > { %p386_p8 = scmp.lt.s32.totalorder %s7117_s21, 3  ;;  %p8592_p9 = scmp.eq.s32.totalorder %s7248_s22, 0 }
  0x1c   : > { %8610 = sst [smem:[#allocation36_spill]] %s8609_s29  ;;  %s7119_s16 = smov [#allocation5]  }
  0x1d   : > { %p7276_p10 = pnand %p5207_p7, %p386_p8  ;;  %s411_s17 = sshll.u32 %s7119_s16, 4  ;;  %s412_s17 = int_to_ptr.vmem [resolvable:$true] %s411_s17 }
  0x1e   : > { %s7120_s25 = smov [#allocation8]   ;;  %s7121_s27 = smov [#allocation11]  }
  0x1f   : > { %s8611_s30 = scalar_select %p7276_p10, 1, 0 }
  0x20   : > { %p6060_p11 = pneg %p7276_p10  ;;  %s443_s26 = sshll.u32 %s7120_s25, 4  ;;  %s444_s26 = int_to_ptr.vmem [resolvable:$true] %s443_s26 }
  0x21   : > { %s469_s20 = sshll.u32 %s7121_s27, 4  ;;  %s6728_s29 = scalar_lea.vmem %s412_s17, 32  ;;  %s470_s20 = int_to_ptr.vmem [resolvable:$true] %s469_s20 }
  0x22   : > { %p7284_p12 = pnand %p8592_p9, %p6060_p11  ;;  %p6729_p0 = scmp.ne.s32.totalorder %s412_s17, %s6728_s29 }
  0x23   : > { %p6736_p3 = scmp.lt.s32.totalorder %s412_s17, %s412_s17  ;;  %p6737_p4 = scmp.lt.s32.totalorder %s6728_s29, %s6728_s29 }
  0x24   : > { %p7290_p13 = pneg %p7284_p12 }
  0x25   : > { %p6738_p7 = por %p6737_p4, %p6736_p3 }
  0x26   : > { %p6731_p1 = pnand %p6729_p0, %p7290_p13 }
  0x28   : > { %p6732_p2 = pneg %p6731_p1 }
  0x2a   : > { %p6739_p8 = pnand %p6738_p7, %p6732_p2 }
  0x2c   : > { %6742 = shalt.err (!%p6739_p8)
}
  0x2d   : > { %s8593_s16 = smov 16   ;;  %s8595_s27 = smov 1  }
  0x2e   : > { %s8614_s2 = sld [smem:[#allocation38_spill]]  ;;  %s6754_s21 = scalar_lea.vmem %s444_s26, 32 }
  0x2f   : > { %p6755_p11 = scmp.ne.s32.totalorder %s444_s26, %s6754_s21  ;;  %p6762_p3 = scmp.lt.s32.totalorder %s444_s26, %s444_s26 }
  0x30   : > { %p6763_p2 = scmp.lt.s32.totalorder %s6754_s21, %s6754_s21 }
  0x31   : > { %p6757_p0 = pnand %p6755_p11, %p7290_p13 }
  0x32   : > { %p6764_p4 = por %p6763_p2, %p6762_p3 }
  0x33   : > { %p6758_p1 = pneg %p6757_p0 }
  0x34   : > { %6066 = dma.hbm_to_vmem [thread:$0]  (!%p7284_p12), %s8614_s2, 32, %s412_s17, [#allocation6], %s8593_s16, %s8593_s16, %s8595_s27  }
  0x35   : > { %p6765_p7 = pnand %p6764_p4, %p6758_p1 }
  0x37   : > { %6768 = shalt.err (!%p6765_p7)
}
  0x38   : > { %s8615_s6 = sld [smem:[#allocation39_spill]]  ;;  %s6780_s18 = scalar_lea.vmem %s470_s20, 32 }
  0x39   : > { %p6781_p8 = scmp.ne.s32.totalorder %s470_s20, %s6780_s18  ;;  %p6788_p9 = scmp.lt.s32.totalorder %s470_s20, %s470_s20 }
  0x3a   : > { %p6789_p3 = scmp.lt.s32.totalorder %s6780_s18, %s6780_s18 }
  0x3b   : > { %p6783_p11 = pnand %p6781_p8, %p7290_p13 }
  0x3c   : > { %p6790_p1 = por %p6789_p3, %p6788_p9 }
  0x3d   : > { %p6784_p0 = pneg %p6783_p11 }
  0x3e   : > { %6072 = dma.hbm_to_vmem [thread:$0]  (!%p7284_p12), %s8615_s6, 32, %s444_s26, [#allocation9], %s8593_s16, %s8593_s16, %s8595_s27  }
  0x3f   : > { %p6791_p2 = pnand %p6790_p1, %p6784_p0 }
  0x41   : > { %6794 = shalt.err (!%p6791_p2)
}
  0x42   : > { %6078 = dma.hbm_to_vmem [thread:$0]  (!%p7284_p12), %s8577_s8, 32, %s470_s20, [#allocation12], %s8593_s16, %s8593_s16, %s8595_s27  }
  0x43   : > { %s7124_s17 = smov [#allocation14]  }
  0x44   : > { %s495_s26 = sshll.u32 %s7124_s17, 4  ;;  %s496_s26 = int_to_ptr.vmem [resolvable:$true] %s495_s26 }
  0x45   : > { %s6806_s25 = scalar_lea.vmem %s496_s26, 64  ;;  %p6814_p8 = scmp.lt.s32.totalorder %s496_s26, %s496_s26 }
  0x46   : > { %p6807_p4 = scmp.ne.s32.totalorder %s496_s26, %s6806_s25  ;;  %p6815_p11 = scmp.lt.s32.totalorder %s6806_s25, %s6806_s25 }
  0x48   : > { %p6809_p7 = pnand %p6807_p4, %p7290_p13  ;;  %p6816_p0 = por %p6815_p11, %p6814_p8 }
  0x4a   : > { %p6810_p9 = pneg %p6809_p7 }
  0x4c   : > { %p6817_p3 = pnand %p6816_p0, %p6810_p9 }
  0x4e   : > { %6820 = shalt.err (!%p6817_p3)
}
  0x4f   : > { %s7125_s29 = smov 32   ;;  %s7126_s18 = smov 2  }
  0x50   : > { %6084 = dma.hbm_to_vmem [thread:$0]  (!%p7284_p12), %s8579_s10, 64, %s496_s26, [#allocation15], %s7125_s29, %s7125_s29, %s7126_s18  }
  0x51   : > { %s7127_s15 = smov [#allocation17]   ;;  %s7128_s16 = smov [#allocation2]  }
  0x52   : > { %s521_s17 = sshll.u32 %s7127_s15, 4  ;;  %s398_s27 = sshll.u32 %s7128_s16, 4  ;;  %s522_s17 = int_to_ptr.vmem [resolvable:$true] %s521_s17  ;;  %s399_s27 = int_to_ptr.vmem [resolvable:$true] %s398_s27 }
  0x53   : > { %s6832_s2 = scalar_lea.vmem %s522_s17, 32  ;;  %p6840_p7 = scmp.lt.s32.totalorder %s522_s17, %s522_s17 }
  0x54   : > { %p6833_p1 = scmp.ne.s32.totalorder %s522_s17, %s6832_s2  ;;  %p6841_p9 = scmp.lt.s32.totalorder %s6832_s2, %s6832_s2 }
  0x56   : > { %p6835_p2 = pnand %p6833_p1, %p7290_p13  ;;  %p6842_p8 = por %p6841_p9, %p6840_p7 }
  0x58   : > { %p6836_p4 = pneg %p6835_p2 }
  0x5a   : > { %p6843_p11 = pnand %p6842_p8, %p6836_p4 }
  0x5c   : > { %6846 = shalt.err (!%p6843_p11)
}
  0x5d   : > { %s8616_s25 = smov 1   ;;  %s8617_s26 = smov 16  }
  0x5e   : > { %6090 = dma.hbm_to_vmem [thread:$0]  (!%p7284_p12), %s8581_s12, 32, %s522_s17, [#allocation18], %s8617_s26, %s8617_s26, %s8616_s25  }
  0x5f   : > { %s6858_s16 = scalar_lea.vmem %s399_s27, 32  ;;  %p6866_p2 = scmp.lt.s32.totalorder %s399_s27, %s399_s27 }
  0x60   : > { %p6859_p0 = scmp.ne.s32.totalorder %s399_s27, %s6858_s16  ;;  %p6867_p6 = scmp.lt.s32.totalorder %s6858_s16, %s6858_s16 }
  0x62   : > { %p6861_p3 = pnand %p6859_p0, %p7290_p13  ;;  %p6868_p7 = por %p6867_p6, %p6866_p2 }
  0x64   : > { %p6862_p1 = pneg %p6861_p3 }
  0x66   : > { %p6869_p4 = pnand %p6868_p7, %p6862_p1 }
  0x68   : > { %6872 = shalt.err (!%p6869_p4)
}
  0x69   : > { %s8618_s1 = sld [smem:[#allocation37_spill]]  ;;  %s7129_s20 = smov [#allocation7]  }
  0x6a   : > { %s427_s15 = sshll.u32 %s7129_s20, 4  ;;  %s428_s15 = int_to_ptr.vmem [resolvable:$true] %s427_s15 }
  0x6b   : > { %s6884_s17 = scalar_lea.vmem %s428_s15, 384  ;;  %p6892_p11 = scmp.lt.s32.totalorder %s428_s15, %s428_s15 }
  0x6c   : > { %p6885_p9 = scmp.ne.s32.totalorder %s428_s15, %s6884_s17  ;;  %p6893_p0 = scmp.lt.s32.totalorder %s6884_s17, %s6884_s17 }
  0x6e   : > { %p6887_p8 = pnand %p6885_p9, %p7290_p13  ;;  %p6894_p3 = por %p6893_p0, %p6892_p11 }
  0x6f   : > { %6063 = dma.hbm_to_vmem [thread:$0]  (!%p7284_p12), %s8618_s1, 32, %s399_s27, [#allocation3], %s8617_s26, %s8617_s26, %s8616_s25  }
  0x70   : > { %p6888_p6 = pneg %p6887_p8 }
  0x72   : > { %p6895_p1 = pnand %p6894_p3, %p6888_p6 }
  0x74   : > { %6898 = shalt.err (!%p6895_p1)
}
  0x75   : > { %s7130_s29 = smov 192   ;;  %s7131_s18 = smov 12  }
  0x76   : > { %6069 = dma.hbm_to_vmem [thread:$0]  (!%p7284_p12), %s8573_s4, 384, %s428_s15, [#allocation6], %s7130_s29, %s7130_s29, %s7131_s18  }
  0x77   : > { %s7132_s2 = smov [#allocation10]   ;;  %s7133_s20 = smov [#allocation13]  }
  0x78   : > { %s456_s21 = sshll.u32 %s7132_s2, 4  ;;  %s482_s1 = sshll.u32 %s7133_s20, 4  ;;  %s457_s21 = int_to_ptr.vmem [resolvable:$true] %s456_s21  ;;  %s483_s1 = int_to_ptr.vmem [resolvable:$true] %s482_s1 }
  0x79   : > { %s6910_s6 = scalar_lea.vmem %s457_s21, 32  ;;  %p6918_p9 = scmp.lt.s32.totalorder %s457_s21, %s457_s21 }
  0x7a   : > { %p6911_p2 = scmp.ne.s32.totalorder %s457_s21, %s6910_s6  ;;  %p6919_p8 = scmp.lt.s32.totalorder %s6910_s6, %s6910_s6 }
  0x7c   : > { %p6913_p7 = pnand %p6911_p2, %p7290_p13  ;;  %p6920_p6 = por %p6919_p8, %p6918_p9 }
  0x7e   : > { %p6914_p4 = pneg %p6913_p7 }
  0x80   : > { %p6921_p11 = pnand %p6920_p6, %p6914_p4 }
  0x82   : > { %6924 = shalt.err (!%p6921_p11)
}
  0x83   : > { %6075 = dma.hbm_to_vmem [thread:$0]  (!%p7284_p12), %s8576_s7, 32, %s457_s21, [#allocation9], %s8617_s26, %s8617_s26, %s8616_s25  }
  0x84   : > { %s6936_s29 = scalar_lea.vmem %s483_s1, 4096  ;;  %p6944_p2 = scmp.lt.s32.totalorder %s483_s1, %s483_s1 }
  0x85   : > { %p6937_p0 = scmp.ne.s32.totalorder %s483_s1, %s6936_s29  ;;  %p6945_p7 = scmp.lt.s32.totalorder %s6936_s29, %s6936_s29 }
  0x87   : > { %p6939_p3 = pnand %p6937_p0, %p7290_p13  ;;  %p6946_p4 = por %p6945_p7, %p6944_p2 }
  0x89   : > { %p6940_p1 = pneg %p6939_p3 }
  0x8b   : > { %p6947_p9 = pnand %p6946_p4, %p6940_p1 }
  0x8d   : > { %6950 = shalt.err (!%p6947_p9)
}
  0x8e   : > { %s7134_s6 = smov 128   ;;  %s7135_s18 = smov 8  }
  0x8f   : > { %6081 = dma.hbm_to_vmem [thread:$0]  (!%p7284_p12), %s8578_s9, 4096, %s483_s1, [#allocation12], %s7134_s6, %s7134_s6, %s7135_s18  }
  0x90   : > { %s7136_s25 = smov [#allocation16]  }
  0x91   : > { %s508_s26 = sshll.u32 %s7136_s25, 4  ;;  %s509_s26 = int_to_ptr.vmem [resolvable:$true] %s508_s26 }
  0x92   : > { %s6962_s2 = scalar_lea.vmem %s509_s26, 4096  ;;  %p6970_p0 = scmp.lt.s32.totalorder %s509_s26, %s509_s26 }
  0x93   : > { %p6963_p8 = scmp.ne.s32.totalorder %s509_s26, %s6962_s2  ;;  %p6971_p3 = scmp.lt.s32.totalorder %s6962_s2, %s6962_s2 }
  0x95   : > { %p6965_p6 = pnand %p6963_p8, %p7290_p13  ;;  %p6972_p1 = por %p6971_p3, %p6970_p0 }
  0x97   : > { %p6966_p11 = pneg %p6965_p6 }
  0x99   : > { %p6973_p2 = pnand %p6972_p1, %p6966_p11 }
  0x9b   : > { %6976 = shalt.err (!%p6973_p2)
}
  0x9c   : > { %s7137_s21 = smov 64   ;;  %s7138_s20 = smov 4  }
  0x9d   : > { %6087 = dma.hbm_to_vmem [thread:$0]  (!%p7284_p12), %s8580_s11, 4096, %s509_s26, [#allocation15], %s7137_s21, %s7137_s21, %s7138_s20  }
  0x9e   : > { %s7139_s17 = smov [#allocation19]   ;;  %s7140_s6 = smov [#allocation20]  }
  0x9f   : > { %s535_s29 = sshll.u32 %s7139_s17, 4  ;;  %s546_s18 = sshll.u32 %s7140_s6, 4  ;;  %s536_s29 = int_to_ptr.vmem [resolvable:$true] %s535_s29  ;;  %s547_s18 = int_to_ptr.vmem [resolvable:$true] %s546_s18 }
  0xa0   : > { %s6988_s16 = scalar_lea.vmem %s536_s29, 16  ;;  %s6995_s27 = scalar_lea.vmem %s536_s29, 32 }
  0xa1   : > { %p6989_p7 = scmp.ne.s32.totalorder %s536_s29, %s6988_s16  ;;  %p6996_p8 = scmp.lt.s32.totalorder %s536_s29, %s536_s29 }
  0xa2   : > { %p6997_p6 = scmp.lt.s32.totalorder %s6995_s27, %s6988_s16 }
  0xa3   : > { %p6991_p4 = pnand %p6989_p7, %p7290_p13 }
  0xa4   : > { %p6998_p11 = por %p6997_p6, %p6996_p8 }
  0xa5   : > { %p6992_p9 = pneg %p6991_p4 }
  0xa7   : > { %p6999_p0 = pnand %p6998_p11, %p6992_p9 }
  0xa9   : > { %7002 = shalt.err (!%p6999_p0)
}
  0xaa   : > { %6093 = dma.hbm_to_vmem [thread:$0]  (!%p7284_p12), %s8582_s13, 16, %s536_s29, [#allocation18]  }
  0xab   : > { %s7014_s2 = scalar_lea.vmem %s547_s18, 16  ;;  %s7021_s21 = scalar_lea.vmem %s547_s18, 32 }
  0xac   : > { %p7015_p3 = scmp.ne.s32.totalorder %s547_s18, %s7014_s2  ;;  %p7022_p7 = scmp.lt.s32.totalorder %s547_s18, %s547_s18 }
  0xad   : > { %p7023_p4 = scmp.lt.s32.totalorder %s7021_s21, %s7014_s2 }
  0xae   : > { %p7017_p1 = pnand %p7015_p3, %p7290_p13 }
  0xaf   : > { %p7024_p5 = por %p7023_p4, %p7022_p7 }
  0xb0   : > { %p7018_p2 = pneg %p7017_p1 }
  0xb2   : > { %p7025_p10 = pnand %p7024_p5, %p7018_p2 }
  0xb4   : > { %7028 = shalt.err (!%p7025_p10)
}
  0xb5   : > { %6096 = dma.hbm_to_vmem [thread:$0]  (!%p7284_p12), %s8583_s14, 16, %s547_s18, [#allocation21]  }
  0xb6   : > { %p8619_p9 = scmp.ne.s32.totalorder %s8611_s30, 0 }
  0xb7   : > { %p8620_p8 = scmp.eq.s32.totalorder (!%p8619_p9), %s7248_s22, 0 }
  0xb8   : > { %567 = sbr.rel (%p8619_p9) target bundleno = 5012 (0x1394), region = 80 }
  0xbd   : > { %7072 = dma.done.wait (%p8620_p8), [#allocation3], 32   ;;  %p8621_p13 = pmov %p8620_p8 }
  0xbe   : > { %p8622_p6 = pmov %p8620_p8 }
  0xbf   : > { %7074 = vsyncadd (%p8621_p13), [#allocation3], 4294967264 }
  0xc0   : > { %7076 = dma.done.wait (%p8622_p6), [#allocation6], 416   ;;  %p8623_p5 = pmov %p8622_p6 }
  0xc2   : > { %7078 = vsyncadd (%p8623_p5), [#allocation6], 4294966880  ;;  %p8624_p10 = pmov %p8623_p5 }
  0xc3   : > { %p8625_p12 = pmov %p8623_p5 }
  0xc4   : > { %7080 = dma.done.wait (%p8624_p10), [#allocation9], 64  }
  0xc5   : > { %7082 = vsyncadd (%p8625_p12), [#allocation9], 4294967232  ;;  %p8626_p11 = pmov %p8623_p5 }
  0xc6   : > { %p8627_p0 = pmov %p8623_p5 }
  0xc7   : > { %7084 = dma.done.wait (%p8626_p11), [#allocation12], 4128  }
  0xc8   : > { %7086 = vsyncadd (%p8627_p0), [#allocation12], 4294963168  ;;  %p8628_p3 = pmov %p8627_p0 }
  0xc9   : > { %p8629_p1 = pmov %p8627_p0 }
  0xca   : > { %7088 = dma.done.wait (%p8628_p3), [#allocation15], 4160  }
  0xcb   : > { %7090 = vsyncadd (%p8629_p1), [#allocation15], 4294963136  ;;  %p8630_p2 = pmov %p8627_p0 }
  0xcc   : > { %p8631_p7 = pmov %p8627_p0 }
  0xcd   : > { %7092 = dma.done.wait (%p8630_p2), [#allocation18], 48  }
  0xce   : > { %7094 = vsyncadd (%p8631_p7), [#allocation18], 4294967248  ;;  %p8632_p4 = pmov %p8627_p0 }
  0xcf   : > { %p8633_p9 = pmov %p8627_p0 }
  0xd0   : > { %7096 = dma.done.wait (%p8632_p4), [#allocation21], 16  }
  0xd1   : > { %7098 = vsyncadd (%p8633_p9), [#allocation21], 4294967280  ;;  %p659_p8 = scmp.lt.s32.totalorder %s7248_s22, 1  ;;  %v6185_v3 = vld [vmem:[%s8572_s3 + $0x2a4] ss:$48 sps:$4 sm:$0xff]   ;;  %v7141_v45 = vmov 0  }
  0xd2   : > { %v6187_v4 = vld [vmem:[%s8572_s3 + $0x2ac] ss:$48 sps:$4 sm:$0xff]   ;;  %v6189_v5 = vld [vmem:[%s8572_s3 + $0x2a0] ss:$48 sps:$4 sm:$0xff]   ;;  %v6190_v6 = vld [vmem:[%s8572_s3 + $0x2a8] ss:$48 sps:$4 sm:$0xff]   ;;  %1351 = vmatprep.subr.bf16.mxu0 %v6185_v3  ;;  %1383 = vmatprep.mubr.bf16.mxu0 %v7141_v45 }
  0xd3   : > { %s660_s24 = scalar_select %p659_p8, %s7248_s22, 1  ;;  %1394 = vmatprep.subr.bf16.mxu1 %v6187_v4  ;;  %1352 = vmatpush1.bf16.msra.mxu0 %v6189_v5  ;;  %v6191_v15 = vld [vmem:[%s8572_s3 + $0x244] ss:$48 sps:$4 sm:$0xff]   ;;  %v6193_v16 = vld [vmem:[%s8572_s3 + $0x24c] ss:$48 sps:$4 sm:$0xff]   ;;  %vm7143_vm0 = vmmov 0  }
  0xd4   : > { %1395 = vmatpush1.bf16.msra.mxu1 %v6190_v6  ;;  %v6195_v17 = vld [vmem:[%s8572_s3 + $0x240] ss:$48 sps:$4 sm:$0xff]   ;;  %v6196_v18 = vld [vmem:[%s8572_s3 + $0x248] ss:$48 sps:$4 sm:$0xff]   ;;  %1353 = vmatprep.subr.bf16.mxu0 %v6191_v15  ;;  %v6197_v19 = vld [vmem:[%s8572_s3 + $0x1e4] ss:$48 sps:$4 sm:$0xff]  }
  0xd5   : > { %s5744_s30 = sshll.u32 %s660_s24, 3  ;;  %1396 = vmatprep.subr.bf16.mxu1 %v6193_v16  ;;  %v6199_v20 = vld [vmem:[%s8572_s3 + $0x1ec] ss:$48 sps:$4 sm:$0xff]   ;;  %v6201_v21 = vld [vmem:[%s8572_s3 + $0x1e0] ss:$48 sps:$4 sm:$0xff]   ;;  %1426 = vmatprep.mubr.bf16.mxu1 %v7141_v45  ;;  %vm1653_vm1 = vcmask 130048  }
  0xd6   : > { %s663_s17 = scalar_lea.vmem %s8569_s0, %s5744_s30  ;;  %v6202_v22 = vld [vmem:[%s8572_s3 + $0x1e8] ss:$48 sps:$4 sm:$0xff]   ;;  %v6203_v23 = vld [vmem:[%s8572_s3 + $0x184] ss:$48 sps:$4 sm:$0xff]   ;;  %v6205_v24 = vld [vmem:[%s8572_s3 + $0x18c] ss:$48 sps:$4 sm:$0xff]  }
  0xd7   : > { %v5747_v0 = vld [vmem:[%s663_s17] sm:$0xff]   ;;  %1354 = vmatpush1.bf16.msra.mxu0 %v6195_v17  ;;  %v6208_v26 = vld [vmem:[%s8572_s3 + $0x188] ss:$48 sps:$4 sm:$0xff]   ;;  %v6211_v28 = vld [vmem:[%s8572_s3 + $0x12c] ss:$48 sps:$4 sm:$0xff]   ;;  %s656_s29 = sand.u32 1, %s7109_s19  }
  0xd8   : > { %v7431_v1 = vunpack.c.l.bf16 %v5747_v0  ;;  %v7434_v2 = vunpack.c.h.bf16 %v5747_v0  ;;  %1397 = vmatpush1.bf16.msra.mxu1 %v6196_v18  ;;  %1355 = vmatprep.subr.bf16.mxu0 %v6197_v19  ;;  %v6207_v25 = vld [vmem:[%s8572_s3 + $0x180] ss:$48 sps:$4 sm:$0xff]   ;;  %v6209_v27 = vld [vmem:[%s8572_s3 + $0x124] ss:$48 sps:$4 sm:$0xff]   ;;  %v6214_v30 = vld [vmem:[%s8572_s3 + $0x128] ss:$48 sps:$4 sm:$0xff]  }
  0xd9   : > { %1398 = vmatprep.subr.bf16.mxu1 %v6199_v20  ;;  %v6213_v29 = vld [vmem:[%s8572_s3 + $0x120] ss:$48 sps:$4 sm:$0xff]   ;;  %v6215_v31 = vld [vmem:[%s8572_s3 + $0xc4] ss:$48 sps:$4 sm:$0xff]   ;;  %v6217_v32 = vld [vmem:[%s8572_s3 + $0xcc] ss:$48 sps:$4 sm:$0xff]  }
  0xda   : > { %671 = vadd.xlane.f32.xlu0 %v7431_v1  ;;  %v6219_v33 = vld [vmem:[%s8572_s3 + $0xc0] ss:$48 sps:$4 sm:$0xff]   ;;  %v6220_v34 = vld [vmem:[%s8572_s3 + $0xc8] ss:$48 sps:$4 sm:$0xff]   ;;  %v6221_v35 = vld [vmem:[%s8572_s3 + $0x64] ss:$48 sps:$4 sm:$0xff]  }
  0xdb   : > { %1356 = vmatpush1.bf16.msra.mxu0 %v6201_v21  ;;  %v6223_v36 = vld [vmem:[%s8572_s3 + $0x6c] ss:$48 sps:$4 sm:$0xff]   ;;  %v6225_v37 = vld [vmem:[%s8572_s3 + $0x60] ss:$48 sps:$4 sm:$0xff]   ;;  %v6226_v38 = vld [vmem:[%s8572_s3 + $0x68] ss:$48 sps:$4 sm:$0xff]  }
  0xdc   : > { %1399 = vmatpush1.bf16.msra.mxu1 %v6202_v22  ;;  %1357 = vmatprep.subr.bf16.mxu0 %v6203_v23  ;;  %v6227_v39 = vld [vmem:[%s8572_s3 + $0x4] ss:$48 sps:$4 sm:$0xff]   ;;  %v6229_v40 = vld [vmem:[%s8572_s3 + $0xc] ss:$48 sps:$4 sm:$0xff]   ;;  %v6231_v41 = vld [vmem:[%s8572_s3] ss:$48 sps:$4 sm:$0xff]  }
  0xdd   : > { %1400 = vmatprep.subr.bf16.mxu1 %v6205_v24  ;;  %v6232_v42 = vld [vmem:[%s8572_s3 + $0x8] ss:$48 sps:$4 sm:$0xff]   ;;  %v6235_v43 = vld [vmem:[%s8572_s3 + $0x2b4] ss:$48 sps:$4 sm:$0xff]   ;;  %v6238_v44 = vld [vmem:[%s8572_s3 + $0x2bc] ss:$48 sps:$4 sm:$0xff]  }
  0xde   : > { %673 = vadd.xlane.f32.xlu0 %v7434_v2  ;;  %v5237_v54 = vld [vmem:[#allocation2] ss:$0 sm:$0xff]  ;;  %v5238_v58 = vld [vmem:[#allocation5] ss:$0 sm:$0xff]  ;;  %v6236_v63 = vld [vmem:[%s8572_s3 + $0x2b8] ss:$48 sps:$4 sm:$0xff]  }
  0xdf   : > { %1358 = vmatpush1.bf16.msra.mxu0 %v6207_v25  ;;  %v6233_v62 = vld [vmem:[%s8572_s3 + $0x2b0] ss:$48 sps:$4 sm:$0xff]   ;;  %v6241_v3 = vld [vmem:[%s8572_s3 + $0x254] ss:$48 sps:$4 sm:$0xff]   ;;  %v6244_v4 = vld [vmem:[%s8572_s3 + $0x25c] ss:$48 sps:$4 sm:$0xff]  }
  0xe0   : > { %1401 = vmatpush1.bf16.msra.mxu1 %v6208_v26  ;;  %1359 = vmatprep.subr.bf16.mxu0 %v6209_v27  ;;  %v6239_v5 = vld [vmem:[%s8572_s3 + $0x250] ss:$48 sps:$4 sm:$0xff]   ;;  %v6242_v6 = vld [vmem:[%s8572_s3 + $0x258] ss:$48 sps:$4 sm:$0xff]   ;;  %v6259_v15 = vld [vmem:[%s8572_s3 + $0x134] ss:$48 sps:$4 sm:$0xff]  }
  0xe1   : > { %1402 = vmatprep.subr.bf16.mxu1 %v6211_v28  ;;  %v6262_v16 = vld [vmem:[%s8572_s3 + $0x13c] ss:$48 sps:$4 sm:$0xff]   ;;  %v6257_v17 = vld [vmem:[%s8572_s3 + $0x130] ss:$48 sps:$4 sm:$0xff]   ;;  %v6260_v18 = vld [vmem:[%s8572_s3 + $0x138] ss:$48 sps:$4 sm:$0xff]  }
  0xe2   : > { %v6265_v19 = vld [vmem:[%s8572_s3 + $0xd4] ss:$48 sps:$4 sm:$0xff]   ;;  %v6268_v20 = vld [vmem:[%s8572_s3 + $0xdc] ss:$48 sps:$4 sm:$0xff]   ;;  %v6263_v21 = vld [vmem:[%s8572_s3 + $0xd0] ss:$48 sps:$4 sm:$0xff]  }
  0xe3   : > { %1360 = vmatpush1.bf16.msra.mxu0 %v6213_v29  ;;  %v6266_v22 = vld [vmem:[%s8572_s3 + $0xd8] ss:$48 sps:$4 sm:$0xff]   ;;  %v6271_v23 = vld [vmem:[%s8572_s3 + $0x74] ss:$48 sps:$4 sm:$0xff]   ;;  %v6274_v24 = vld [vmem:[%s8572_s3 + $0x7c] ss:$48 sps:$4 sm:$0xff]  }
  0xe4   : > { %1403 = vmatpush1.bf16.msra.mxu1 %v6214_v30  ;;  %1361 = vmatprep.subr.bf16.mxu0 %v6215_v31  ;;  %v6269_v25 = vld [vmem:[%s8572_s3 + $0x70] ss:$48 sps:$4 sm:$0xff]   ;;  %v6272_v26 = vld [vmem:[%s8572_s3 + $0x78] ss:$48 sps:$4 sm:$0xff]   ;;  %v6277_v27 = vld [vmem:[%s8572_s3 + $0x14] ss:$48 sps:$4 sm:$0xff]  }
  0xe5   : > { %1404 = vmatprep.subr.bf16.mxu1 %v6217_v32  ;;  %v6280_v28 = vld [vmem:[%s8572_s3 + $0x1c] ss:$48 sps:$4 sm:$0xff]   ;;  %v6275_v29 = vld [vmem:[%s8572_s3 + $0x10] ss:$48 sps:$4 sm:$0xff]   ;;  %v6278_v30 = vld [vmem:[%s8572_s3 + $0x18] ss:$48 sps:$4 sm:$0xff]  }
  0xe6   : > { %v6283_v31 = vld [vmem:[%s8572_s3 + $0x2c4] ss:$48 sps:$4 sm:$0xff]   ;;  %v6286_v32 = vld [vmem:[%s8572_s3 + $0x2cc] ss:$48 sps:$4 sm:$0xff]   ;;  %s5234_s6 = sshll.u32 %s656_s29, 4  ;;  %s5745_s18 = sshll.u32 %s7248_s22, 8 }
  0xe7   : > { %1362 = vmatpush1.bf16.msra.mxu0 %v6219_v33  ;;  %v6281_v33 = vld [vmem:[%s8572_s3 + $0x2c0] ss:$48 sps:$4 sm:$0xff]   ;;  %s658_s16 = scalar_lea.vmem [#allocation22], %s5234_s6  ;;  %s8634_s2 = sld [smem:[#allocation40_spill]] }
  0xe8   : > { %1405 = vmatpush1.bf16.msra.mxu1 %v6220_v34  ;;  %1363 = vmatprep.subr.bf16.mxu0 %v6221_v35  ;;  %v6284_v34 = vld [vmem:[%s8572_s3 + $0x2c8] ss:$48 sps:$4 sm:$0xff]   ;;  %v6289_v35 = vld [vmem:[%s8572_s3 + $0x264] ss:$48 sps:$4 sm:$0xff]   ;;  %s5027_s27 = sshll.u32 %s658_s16, 4  ;;  %s8529_s20 = scalar_lea.sflag [#allocation4], %s656_s29  ;;  %s8527_s27 = int_to_ptr.vmem [resolvable:$true] %s5027_s27 }
  0xe9   : > { %1406 = vmatprep.subr.bf16.mxu1 %v6223_v36  ;;  %v6292_v36 = vld [vmem:[%s8572_s3 + $0x26c] ss:$48 sps:$4 sm:$0xff]   ;;  %s7029_s15 = scalar_lea.vmem %s8527_s27, 256  ;;  %p8635_p6 = scmp.ne.s32.totalorder %s8608_s28, 0 }
  0xea   : > { %p7030_p13 = scmp.ne.s32.totalorder %s8527_s27, %s7029_s15  ;;  %s7144_s22 = smov [#allocation22]  }
  0xeb   : > { %1364 = vmatpush1.bf16.msra.mxu0 %v6225_v37  ;;  %v6287_v37 = vld [vmem:[%s8572_s3 + $0x260] ss:$48 sps:$4 sm:$0xff]   ;;  %s7033_s24 = sshll.u32 %s7144_s22, 4  ;;  %s7034_s24 = int_to_ptr.vmem [resolvable:$false] %s7033_s24 }
  0xec   : > { %1407 = vmatpush1.bf16.msra.mxu1 %v6226_v38  ;;  %1365 = vmatprep.subr.bf16.mxu0 %v6227_v39  ;;  %v6290_v38 = vld [vmem:[%s8572_s3 + $0x268] ss:$48 sps:$4 sm:$0xff]   ;;  %v6295_v39 = vld [vmem:[%s8572_s3 + $0x204] ss:$48 sps:$4 sm:$0xff]   ;;  %p7031_p5 = pnand %p7030_p13, %p8635_p6  ;;  %s7035_s30 = scalar_lea.vmem %s7034_s24, 512 }
  0xed   : > { %1408 = vmatprep.subr.bf16.mxu1 %v6229_v40  ;;  %v6298_v40 = vld [vmem:[%s8572_s3 + $0x20c] ss:$48 sps:$4 sm:$0xff]   ;;  %s8525_s21 = scalar_lea.hbm %s8634_s2, %s5745_s18  ;;  %p7036_p12 = scmp.lt.s32.totalorder %s8527_s27, %s7034_s24 }
  0xee   : > { %p7032_p10 = pneg %p7031_p5  ;;  %p7037_p11 = scmp.lt.s32.totalorder %s7035_s30, %s7029_s15 }
  0xef   : > { %1366 = vmatpush1.bf16.msra.mxu0 %v6231_v41  ;;  %v6293_v41 = vld [vmem:[%s8572_s3 + $0x200] ss:$48 sps:$4 sm:$0xff]  }
  0xf0   : > { %1409 = vmatpush1.bf16.msra.mxu1 %v6232_v42  ;;  %1437 = vmatprep.subr.bf16.mxu0 %v6235_v43  ;;  %v6296_v42 = vld [vmem:[%s8572_s3 + $0x208] ss:$48 sps:$4 sm:$0xff]   ;;  %v6301_v43 = vld [vmem:[%s8572_s3 + $0x1a4] ss:$48 sps:$4 sm:$0xff]   ;;  %p7038_p0 = por %p7037_p11, %p7036_p12 }
  0xf1   : > { %1480 = vmatprep.subr.bf16.mxu1 %v6238_v44  ;;  %v6304_v44 = vld [vmem:[%s8572_s3 + $0x1ac] ss:$48 sps:$4 sm:$0xff]  }
  0xf2   : > { %p7039_p3 = pnand %p7038_p0, %p7032_p10 }
 0x163   : > { %v672_v7 = vpop.xlane.xlu0 %671 }
 0x164   : > { %v676_v8 = vmul.f32 0.0078125, %v672_v7  ;;  %v6247_v7 = vld [vmem:[%s8572_s3 + $0x1f4] ss:$48 sps:$4 sm:$0xff]  }
 0x166   : > { %v7450_v9 = vsub.f32 %v7431_v1, %v676_v8  ;;  %v6250_v8 = vld [vmem:[%s8572_s3 + $0x1fc] ss:$48 sps:$4 sm:$0xff]  }
 0x167   : > { %v674_v10 = vpop.xlane.xlu0 %673 }
 0x168   : > { %v677_v11 = vmul.f32 0.0078125, %v674_v10  ;;  %v680_v12 = vmul.f32 %v7450_v9, %v7450_v9  ;;  %v6248_v10 = vld [vmem:[%s8572_s3 + $0x1f8] ss:$48 sps:$4 sm:$0xff]  }
 0x16a   : > { %v7455_v13 = vsub.f32 %v7434_v2, %v677_v11  ;;  %682 = vadd.xlane.f32.xlu1 %v680_v12  ;;  %v6253_v11 = vld [vmem:[%s8572_s3 + $0x194] ss:$48 sps:$4 sm:$0xff]   ;;  %v6256_v12 = vld [vmem:[%s8572_s3 + $0x19c] ss:$48 sps:$4 sm:$0xff]  }
 0x16c   : > { %v681_v14 = vmul.f32 %v7455_v13, %v7455_v13 }
 0x16e   : > { %684 = vadd.xlane.f32.xlu1 %v681_v14  ;;  %v6254_v14 = vld [vmem:[%s8572_s3 + $0x198] ss:$48 sps:$4 sm:$0xff]  }
 0x1f3   : > { %v683_v46 = vpop.xlane.xlu1 %682 }
 0x1f4   : > { %v686_v47 = vmul.f32 0.0078125, %v683_v46  ;;  %v6299_v46 = vld [vmem:[%s8572_s3 + $0x1a0] ss:$48 sps:$4 sm:$0xff]  }
 0x1f6   : > { %v688_v48 = vadd.f32 1e-06, %v686_v47  ;;  %v6302_v47 = vld [vmem:[%s8572_s3 + $0x1a8] ss:$48 sps:$4 sm:$0xff]  }
 0x1f7   : > { %v685_v49 = vpop.xlane.xlu1 %684 }
 0x1f8   : > { %6617 = vrsqrt.f32 %v688_v48  ;;  %v687_v50 = vmul.f32 0.0078125, %v685_v49  ;;  %v6307_v48 = vld [vmem:[%s8572_s3 + $0x144] ss:$48 sps:$4 sm:$0xff]   ;;  %v6310_v49 = vld [vmem:[%s8572_s3 + $0x14c] ss:$48 sps:$4 sm:$0xff]  }
 0x1fa   : > { %v689_v51 = vadd.f32 1e-06, %v687_v50  ;;  %v6305_v50 = vld [vmem:[%s8572_s3 + $0x140] ss:$48 sps:$4 sm:$0xff]  }
 0x1fc   : > { %6619 = vrsqrt.f32 %v689_v51  ;;  %v6308_v51 = vld [vmem:[%s8572_s3 + $0x148] ss:$48 sps:$4 sm:$0xff]  }
 0x205   : > { %v6618_v52 = vpop.eup %6617 }
 0x206   : > { %v692_v53 = vmul.f32 %v6618_v52, %v7450_v9  ;;  %v6245_v9 = vld [vmem:[%s8572_s3 + $0x1f0] ss:$48 sps:$4 sm:$0xff]   ;;  %v6313_v52 = vld [vmem:[%s8572_s3 + $0xe4] ss:$48 sps:$4 sm:$0xff]  }
 0x208   : > { %v700_v56 = vmul.f32 %v5237_v54, %v692_v53  ;;  %v6316_v53 = vld [vmem:[%s8572_s3 + $0xec] ss:$48 sps:$4 sm:$0xff]  }
 0x209   : > { %v6620_v55 = vpop.eup %6619 }
 0x20a   : > { %v693_v57 = vmul.f32 %v6620_v55, %v7455_v13  ;;  %v708_v60 = vadd.f32 %v5238_v58, %v700_v56  ;;  %v6251_v13 = vld [vmem:[%s8572_s3 + $0x190] ss:$48 sps:$4 sm:$0xff]   ;;  %v6314_v55 = vld [vmem:[%s8572_s3 + $0xe8] ss:$48 sps:$4 sm:$0xff]   ;;  %v6319_v56 = vld [vmem:[%s8572_s3 + $0x84] ss:$48 sps:$4 sm:$0xff]  }
 0x20c   : > { %v701_v59 = vmul.f32 %v5237_v54, %v693_v57  ;;  %v6311_v54 = vld [vmem:[%s8572_s3 + $0xe0] ss:$48 sps:$4 sm:$0xff]   ;;  %v6322_v57 = vld [vmem:[%s8572_s3 + $0x8c] ss:$48 sps:$4 sm:$0xff]  }
 0x20e   : > { %v709_v61 = vadd.f32 %v5238_v58, %v701_v59  ;;  %v6317_v58 = vld [vmem:[%s8572_s3 + $0x80] ss:$48 sps:$4 sm:$0xff]   ;;  %v6320_v59 = vld [vmem:[%s8572_s3 + $0x88] ss:$48 sps:$4 sm:$0xff]  }
 0x210   : > { %v7559_v0 = vpack.c.bf16 %v709_v61, %v708_v60  ;;  %v6325_v60 = vld [vmem:[%s8572_s3 + $0x24] ss:$48 sps:$4 sm:$0xff]   ;;  %v6328_v61 = vld [vmem:[%s8572_s3 + $0x2c] ss:$48 sps:$4 sm:$0xff]  }
 0x212   : > { %1384 = vmatmul.mubr.bf16.vlgmr.msra.gmra.mxu0 %v7559_v0  ;;  %1427 = vmatmul.mubr.bf16.vlgmr.msra.gmra.mxu1 %v7559_v0 }
 0x213   : > { %1438 = vmatpush1.bf16.msra.mxu0 %v6233_v62  ;;  %1481 = vmatpush1.bf16.msra.mxu1 %v6236_v63  ;;  %v6323_v62 = vld [vmem:[%s8572_s3 + $0x20] ss:$48 sps:$4 sm:$0xff]   ;;  %v6326_v63 = vld [vmem:[%s8572_s3 + $0x28] ss:$48 sps:$4 sm:$0xff]  }
 0x214   : > { %1439 = vmatprep.subr.bf16.mxu0 %v6241_v3  ;;  %1482 = vmatprep.subr.bf16.mxu1 %v6244_v4  ;;  %v7142_v3 = vmov 0.0  }
 0x215   : > { %1469 = vmatprep.mubr.bf16.mxu0 %v7141_v45  ;;  %1512 = vmatprep.mubr.bf16.mxu1 %v7141_v45 }
 0x217   : > { %1440 = vmatpush1.bf16.msra.mxu0 %v6239_v5  ;;  %1483 = vmatpush1.bf16.msra.mxu1 %v6242_v6  ;;  %v811_v6 = vlaneseq }
 0x218   : > { %1441 = vmatprep.subr.bf16.mxu0 %v6247_v7  ;;  %1484 = vmatprep.subr.bf16.mxu1 %v6250_v8 }
 0x21b   : > { %1442 = vmatpush1.bf16.msra.mxu0 %v6245_v9  ;;  %1485 = vmatpush1.bf16.msra.mxu1 %v6248_v10  ;;  %v7757_v9 = vshrl.u32 %v811_v6, 7 }
 0x21c   : > { %1443 = vmatprep.subr.bf16.mxu0 %v6253_v11  ;;  %1486 = vmatprep.subr.bf16.mxu1 %v6256_v12  ;;  %v807_v12 = vld [vmem:[#allocation7] sm:$0xff] }
 0x21f   : > { %1444 = vmatpush1.bf16.msra.mxu0 %v6251_v13  ;;  %1487 = vmatpush1.bf16.msra.mxu1 %v6254_v14 }
 0x220   : > { %1445 = vmatprep.subr.bf16.mxu0 %v6259_v15  ;;  %1488 = vmatprep.subr.bf16.mxu1 %v6262_v16 }
 0x223   : > { %1446 = vmatpush1.bf16.msra.mxu0 %v6257_v17  ;;  %1489 = vmatpush1.bf16.msra.mxu1 %v6260_v18  ;;  %v7765_v17 = vsub.s32 0, %v7757_v9 }
 0x224   : > { %1447 = vmatprep.subr.bf16.mxu0 %v6265_v19  ;;  %1490 = vmatprep.subr.bf16.mxu1 %v6268_v20  ;;  %v833_v20 = vsub.s32 5, %v7757_v9 }
 0x227   : > { %1448 = vmatpush1.bf16.msra.mxu0 %v6263_v21  ;;  %1491 = vmatpush1.bf16.msra.mxu1 %v6266_v22 }
 0x228   : > { %1449 = vmatprep.subr.bf16.mxu0 %v6271_v23  ;;  %1492 = vmatprep.subr.bf16.mxu1 %v6274_v24  ;;  %v814_v24 = vrot.slane %v807_v12, %v7765_v17 }
 0x22b   : > { %1450 = vmatpush1.bf16.msra.mxu0 %v6269_v25  ;;  %1493 = vmatpush1.bf16.msra.mxu1 %v6272_v26 }
 0x22c   : > { %1451 = vmatprep.subr.bf16.mxu0 %v6277_v27  ;;  %1494 = vmatprep.subr.bf16.mxu1 %v6280_v28  ;;  %v834_v27 = vrot.slane %v807_v12, %v833_v20 }
 0x22f   : > { %1452 = vmatpush1.bf16.msra.mxu0 %v6275_v29  ;;  %1495 = vmatpush1.bf16.msra.mxu1 %v6278_v30 }
 0x230   : > { %1523 = vmatprep.subr.bf16.mxu0 %v6283_v31  ;;  %1566 = vmatprep.subr.bf16.mxu1 %v6286_v32  ;;  %v7773_v31 = vsub.s32 1, %v7757_v9 }
 0x232   : > { %1470 = vmatmul.mubr.bf16.vlgmr.msra.gmra.mxu0 %v7559_v0  ;;  %1513 = vmatmul.mubr.bf16.vlgmr.msra.gmra.mxu1 %v7559_v0 }
 0x233   : > { %1524 = vmatpush1.bf16.msra.mxu0 %v6281_v33  ;;  %1567 = vmatpush1.bf16.msra.mxu1 %v6284_v34  ;;  %v837_v33 = vsub.s32 6, %v7757_v9 }
 0x234   : > { %1525 = vmatprep.subr.bf16.mxu0 %v6289_v35  ;;  %1568 = vmatprep.subr.bf16.mxu1 %v6292_v36 }
 0x235   : > { %1555 = vmatprep.mubr.bf16.mxu0 %v7141_v45  ;;  %1598 = vmatprep.mubr.bf16.mxu1 %v7141_v45 }
 0x237   : > { %1526 = vmatpush1.bf16.msra.mxu0 %v6287_v37  ;;  %1569 = vmatpush1.bf16.msra.mxu1 %v6290_v38  ;;  %v818_v37 = vrot.slane %v807_v12, %v7773_v31 }
 0x238   : > { %1527 = vmatprep.subr.bf16.mxu0 %v6295_v39  ;;  %1570 = vmatprep.subr.bf16.mxu1 %v6298_v40  ;;  %v838_v39 = vrot.slane %v807_v12, %v837_v33 }
 0x23b   : > { %1528 = vmatpush1.bf16.msra.mxu0 %v6293_v41  ;;  %1571 = vmatpush1.bf16.msra.mxu1 %v6296_v42  ;;  %v7783_v42 = vsub.s32 2, %v7757_v9 }
 0x23c   : > { %1529 = vmatprep.subr.bf16.mxu0 %v6301_v43  ;;  %1572 = vmatprep.subr.bf16.mxu1 %v6304_v44 }
 0x23f   : > { %1530 = vmatpush1.bf16.msra.mxu0 %v6299_v46  ;;  %1573 = vmatpush1.bf16.msra.mxu1 %v6302_v47  ;;  %v841_v46 = vsub.s32 7, %v7757_v9 }
 0x240   : > { %1531 = vmatprep.subr.bf16.mxu0 %v6307_v48  ;;  %1574 = vmatprep.subr.bf16.mxu1 %v6310_v49  ;;  %v822_v49 = vrot.slane %v807_v12, %v7783_v42 }
 0x243   : > { %1532 = vmatpush1.bf16.msra.mxu0 %v6305_v50  ;;  %1575 = vmatpush1.bf16.msra.mxu1 %v6308_v51  ;;  %v842_v51 = vrot.slane %v807_v12, %v841_v46 }
 0x244   : > { %1533 = vmatprep.subr.bf16.mxu0 %v6313_v52  ;;  %1576 = vmatprep.subr.bf16.mxu1 %v6316_v53 }
 0x247   : > { %1534 = vmatpush1.bf16.msra.mxu0 %v6311_v54  ;;  %1577 = vmatpush1.bf16.msra.mxu1 %v6314_v55  ;;  %v7793_v55 = vsub.s32 3, %v7757_v9 }
 0x248   : > { %1535 = vmatprep.subr.bf16.mxu0 %v6319_v56  ;;  %1578 = vmatprep.subr.bf16.mxu1 %v6322_v57 }
 0x24b   : > { %1536 = vmatpush1.bf16.msra.mxu0 %v6317_v58  ;;  %1579 = vmatpush1.bf16.msra.mxu1 %v6320_v59  ;;  %v7795_v58 = vld [vmem:[#allocation7 + $0x8] sm:$0xf] }
 0x24c   : > { %1537 = vmatprep.subr.bf16.mxu0 %v6325_v60  ;;  %1580 = vmatprep.subr.bf16.mxu1 %v6328_v61  ;;  %v850_v60 = vrot.slane %v7795_v58, %v7773_v31  ;;  %v826_v61 = vrot.slane %v807_v12, %v7793_v55 }
 0x24f   : > { %1538 = vmatpush1.bf16.msra.mxu0 %v6323_v62  ;;  %1581 = vmatpush1.bf16.msra.mxu1 %v6326_v63  ;;  %v846_v63 = vrot.slane %v7795_v58, %v7765_v17 }
 0x250   : > { %5914 = vmatprep.subr.bf16.mxu0 %v7142_v3  ;;  %5920 = vmatprep.subr.bf16.mxu1 %v7142_v3 }
 0x252   : > { %1556 = vmatmul.mubr.bf16.vlgmr.msra.gmra.mxu0 %v7559_v0  ;;  %1599 = vmatmul.mubr.bf16.vlgmr.msra.gmra.mxu1 %v7559_v0  ;;  %v829_v0 = vsub.s32 4, %v7757_v9 }
 0x253   : > { %5916 = vmatprep.mubr.msk.bf16.mxu0 %vm7143_vm0, %v7142_v3  ;;  %5922 = vmatprep.mubr.msk.bf16.mxu1 %vm7143_vm0, %v7142_v3 }
 0x254   : > { %v830_v14 = vrot.slane %v807_v12, %v829_v0 }
 0x2d2   : > { %v1385_v4 = vpop.f32.mrf.mxu0  ;;  %v1428_v7 = vpop.f32.mrf.mxu1 }
 0x2d3   : > { %v1386_v30 = vadd.f32 %v1385_v4, %v814_v24  ;;  %v1429_v54 = vadd.f32 %v1428_v7, %v822_v49 }
 0x2d4   : > { %v1387_v5 = vpop.f32.mrf.mxu0  ;;  %v7760_v10 = vpop.f32.mrf.mxu1 }
 0x2d5   : > { %v1388_v43 = vadd.f32 %v1387_v5, %v818_v37  ;;  %v1431_v7 = vadd.f32 %v7760_v10, %v826_v61 }
 0x2d6   : > { %v1389_v8 = vpop.f32.mrf.mxu0  ;;  %v1432_v15 = vpop.f32.mrf.mxu1 }
 0x2d7   : > { %v1390_v28 = vadd.f32 %v1389_v8, %v814_v24  ;;  %v1433_v52 = vadd.f32 %v1432_v15, %v822_v49 }
 0x2d8   : > { %v1391_v11 = vpop.f32.mrf.mxu0  ;;  %v1434_v22 = vpop.f32.mrf.mxu1 }
 0x2d9   : > { %v1609_v35 = vpack.c.bf16 %v1390_v28, %v1386_v30  ;;  %v1392_v40 = vadd.f32 %v1391_v11, %v818_v37  ;;  %v1834_v57 = vpack.c.bf16 %v1433_v52, %v1429_v54  ;;  %v1435_v4 = vadd.f32 %v1434_v22, %v826_v61 }
 0x2db   : > { %v1722_v47 = vpack.c.bf16 %v1392_v40, %v1388_v43 }
 0x2f2   : > { %v1471_v13 = vpop.f32.mrf.mxu0  ;;  %v1514_v25 = vpop.f32.mrf.mxu1 }
 0x2f3   : > { %v1472_v19 = vadd.f32 %v1471_v13, %v830_v14  ;;  %v1515_v44 = vadd.f32 %v1514_v25, %v838_v39 }
 0x2f4   : > { %v1473_v16 = vpop.f32.mrf.mxu0  ;;  %v1516_v32 = vpop.f32.mrf.mxu1 }
 0x2f5   : > { %v1474_v34 = vadd.f32 %v1473_v16, %v834_v27  ;;  %v1517_v56 = vadd.f32 %v1516_v32, %v842_v51 }
 0x2f6   : > { %v1475_v18 = vpop.f32.mrf.mxu0  ;;  %v1518_v38 = vpop.f32.mrf.mxu1 }
 0x2f7   : > { %v1476_v21 = vadd.f32 %v1475_v18, %v830_v14  ;;  %v1519_v41 = vadd.f32 %v1518_v38, %v838_v39  ;;  %v1946_v14 = vpack.c.bf16 %v1435_v4, %v1431_v7 }
 0x2f8   : > { %v1477_v26 = vpop.f32.mrf.mxu0  ;;  %v1520_v50 = vpop.f32.mrf.mxu1 }
 0x2f9   : > { %v1610_v23 = vpack.c.bf16 %v1476_v21, %v1472_v19  ;;  %v1478_v29 = vadd.f32 %v1477_v26, %v834_v27  ;;  %v1835_v48 = vpack.c.bf16 %v1519_v41, %v1515_v44  ;;  %v1521_v53 = vadd.f32 %v1520_v50, %v842_v51 }
 0x2fb   : > { %5915 = vmatpush3.bf16.xpose.msra.mxu0 %v1610_v23  ;;  %v1723_v36 = vpack.c.bf16 %v1478_v29, %v1474_v34  ;;  %v1947_v59 = vpack.c.bf16 %v1521_v53, %v1517_v56 }
 0x2fc   : > { %5926 = vmatprep.subr.bf16.mxu0 %v7142_v3 }
 0x302   : > { %5917 = vmatmul.mubr.bf16.vlgmr.msra.gmra.mxu0 %v1609_v35 }
 0x303   : > { %5927 = vmatpush3.bf16.xpose.msra.mxu0 %v1723_v36  ;;  %5928 = vmatprep.mubr.msk.bf16.mxu0 %vm7143_vm0, %v7142_v3 }
 0x304   : > { %5938 = vmatprep.subr.bf16.mxu0 %v7142_v3 }
 0x30a   : > { %5929 = vmatmul.mubr.bf16.vlgmr.msra.gmra.mxu0 %v1722_v47 }
 0x30b   : > { %5939 = vmatpush3.bf16.xpose.msra.mxu0 %v1835_v48  ;;  %5940 = vmatprep.mubr.msk.bf16.mxu0 %vm7143_vm0, %v7142_v3 }
 0x30c   : > { %5950 = vmatprep.subr.bf16.mxu0 %v7142_v3 }
 0x312   : > { %v1557_v62 = vpop.f32.mrf.mxu0  ;;  %5941 = vmatmul.mubr.bf16.vlgmr.msra.gmra.mxu0 %v1834_v57 }
 0x313   : > { %5951 = vmatpush3.bf16.xpose.msra.mxu0 %v1947_v59  ;;  %5952 = vmatprep.mubr.msk.bf16.mxu0 %vm7143_vm0, %v7142_v3  ;;  %v1558_v11 = vadd.f32 %v1557_v62, %v846_v63 }
 0x314   : > { %v1559_v5 = vpop.f32.mrf.mxu0 }
 0x315   : > { %v7804_v6 = vadd.f32 %v1559_v5, %v850_v60 }
 0x316   : > { %v1561_v8 = vpop.f32.mrf.mxu0 }
 0x317   : > { %v1562_v13 = vadd.f32 %v1561_v8, %v846_v63 }
 0x318   : > { %v1563_v12 = vpop.f32.mrf.mxu0 }
 0x319   : > { %v1611_v15 = vpack.c.bf16 %v1562_v13, %v1558_v11  ;;  %v7807_v16 = vadd.f32 %v1563_v12, %v850_v60 }
 0x31a   : > { %5953 = vmatmul.mubr.bf16.vlgmr.msra.gmra.mxu0 %v1946_v14 }
 0x31b   : > { %v1724_v18 = vpack.c.bf16 %v7807_v16, %v7804_v6  ;;  %5921 = vmatpush3.bf16.msra.mxu1 %v1611_v15 }
 0x31c   : > { %5932 = vmatprep.subr.bf16.mxu1 %v7142_v3 }
 0x3c2   : > { %v1646_v19 = vpop.f32.mrf.mxu0 }
 0x3c3   : > { %v1654_v21 = vsel %vm1653_vm1, %v1646_v19, -inf }
 0x3c4   : > { %1655 = vmax.xlane.f32.xlu0 %v1654_v21  ;;  %v5918_v10 = vpop.f32.mrf.mxu0 }
 0x3c6   : > { %v1649_v22 = vpop.f32.mrf.mxu0 }
 0x3c7   : > { %v1657_v23 = vsel %vm1653_vm1, %v1649_v22, -inf }
 0x3c8   : > { %1658 = vmax.xlane.f32.xlu1 %v1657_v23  ;;  %v5919_v24 = vpop.f32.mrf.mxu0 }
 0x3ca   : > { %v1759_v25 = vpop.f32.mrf.mxu0 }
 0x3cb   : > { %v1766_v26 = vsel %vm1653_vm1, %v1759_v25, -inf }
 0x3cc   : > { %1767 = vmax.xlane.f32.xlu0 %v1766_v26  ;;  %v5930_v27 = vpop.f32.mrf.mxu0 }
 0x3ce   : > { %v1762_v28 = vpop.f32.mrf.mxu0 }
 0x3cf   : > { %v1769_v29 = vsel %vm1653_vm1, %v1762_v28, -inf }
 0x3d0   : > { %1770 = vmax.xlane.f32.xlu1 %v1769_v29  ;;  %v5931_v30 = vpop.f32.mrf.mxu0 }
 0x3d2   : > { %v1871_v32 = vpop.f32.mrf.mxu0 }
 0x3d3   : > { %v1878_v34 = vsel %vm1653_vm1, %v1871_v32, -inf }
 0x3d4   : > { %1879 = vmax.xlane.f32.xlu0 %v1878_v34  ;;  %v5942_v35 = vpop.f32.mrf.mxu0 }
 0x3d6   : > { %v1874_v36 = vpop.f32.mrf.mxu0 }
 0x3d7   : > { %v1881_v37 = vsel %vm1653_vm1, %v1874_v36, -inf }
 0x3d8   : > { %1882 = vmax.xlane.f32.xlu1 %v1881_v37  ;;  %v5943_v38 = vpop.f32.mrf.mxu0 }
 0x3d9   : > { %v6329_v38 = vld [vmem:[%s8574_s5 + $0x78] sm:$0xff]  }
 0x3da   : > { %v1983_v39 = vpop.f32.mrf.mxu0  ;;  %5766 = vmatprep.subr.bf16.mxu0 %v6329_v38 }
 0x3db   : > { %v1990_v40 = vsel %vm1653_vm1, %v1983_v39, -inf }
 0x3dc   : > { %1991 = vmax.xlane.f32.xlu0 %v1990_v40  ;;  %v5954_v41 = vpop.f32.mrf.mxu0  ;;  %v6331_v40 = vld [vmem:[%s8574_s5 + $0x70] sm:$0xff]  }
 0x3dd   : > { %v6332_v41 = vld [vmem:[%s8574_s5 + $0x30] sm:$0xff]  }
 0x3de   : > { %v1986_v43 = vpop.f32.mrf.mxu0 }
 0x3df   : > { %v1993_v44 = vsel %vm1653_vm1, %v1986_v43, -inf }
 0x3e0   : > { %1994 = vmax.xlane.f32.xlu1 %v1993_v44  ;;  %v5955_v47 = vpop.f32.mrf.mxu0  ;;  %v6334_v44 = vld [vmem:[%s8574_s5 + $0x28] sm:$0xff]  }
 0x3e1   : > { %v6335_v47 = vld [vmem:[%s8574_s5 + $0x60] sm:$0xff]  }
 0x44d   : > { %v1656_v48 = vpop.xlane.xlu0 %1655 }
 0x44e   : > { %v1660_v49 = vsub.f32 %v1646_v19, %v1656_v48  ;;  %v6336_v48 = vld [vmem:[%s8574_s5 + $0x20] sm:$0xff]  }
 0x450   : > { %v1662_v50 = vmul.f32 1.442695, %v1660_v49 }
 0x451   : > { %v1659_v51 = vpop.xlane.xlu1 %1658 }
 0x452   : > { %6621 = vpow2.f32 %v1662_v50  ;;  %v1661_v52 = vsub.f32 %v1649_v22, %v1659_v51 }
 0x454   : > { %v1664_v53 = vmul.f32 1.442695, %v1661_v52 }
 0x455   : > { %v1768_v54 = vpop.xlane.xlu0 %1767 }
 0x456   : > { %6623 = vpow2.f32 %v1664_v53  ;;  %v1772_v56 = vsub.f32 %v1759_v25, %v1768_v54  ;;  %v1600_v53 = vpop.f32.mrf.mxu1 }
 0x458   : > { %v1774_v57 = vmul.f32 1.442695, %v1772_v56 }
 0x459   : > { %v1771_v59 = vpop.xlane.xlu1 %1770 }
 0x45a   : > { %6625 = vpow2.f32 %v1774_v57  ;;  %v1773_v60 = vsub.f32 %v1762_v28, %v1771_v59  ;;  %v1602_v59 = vpop.f32.mrf.mxu1 }
 0x45c   : > { %v1776_v61 = vmul.f32 1.442695, %v1773_v60 }
 0x45d   : > { %v1880_v62 = vpop.xlane.xlu0 %1879 }
 0x45e   : > { %6627 = vpow2.f32 %v1776_v61  ;;  %v1884_v63 = vsub.f32 %v1871_v32, %v1880_v62 }
 0x45f   : > { %v7820_v4 = vpop.eup %6621 }
 0x460   : > { %v1886_v5 = vmul.f32 1.442695, %v1884_v63  ;;  %v1666_v7 = vsel %vm1653_vm1, %v7820_v4, 0.0 }
 0x461   : > { %v1883_v8 = vpop.xlane.xlu1 %1882  ;;  %1667 = vadd.xlane.f32.xlu0 %v1666_v7 }
 0x462   : > { %6629 = vpow2.f32 %v1886_v5  ;;  %v1885_v11 = vsub.f32 %v1874_v36, %v1883_v8  ;;  %v1604_v5 = vpop.f32.mrf.mxu1  ;;  %v854_v8 = vrot.slane %v7795_v58, %v7783_v42 }
 0x463   : > { %v6624_v13 = vpop.eup %6623 }
 0x464   : > { %v1888_v14 = vmul.f32 1.442695, %v1885_v11  ;;  %v1669_v12 = vsel %vm1653_vm1, %v6624_v13, 0.0  ;;  %v1606_v6 = vpop.f32.mrf.mxu1 }
 0x465   : > { %v1992_v15 = vpop.xlane.xlu0 %1991  ;;  %1670 = vadd.xlane.f32.xlu1 %v1669_v12 }
 0x466   : > { %6631 = vpow2.f32 %v1888_v14  ;;  %v1996_v19 = vsub.f32 %v1983_v39, %v1992_v15  ;;  %v6330_v39 = vld [vmem:[%s8574_s5 + $0x38] sm:$0xff]   ;;  %v1601_v15 = vadd.f32 %v1600_v53, %v854_v8  ;;  %v6352_v53 = vld [vmem:[%s8574_s5 + $0xa0] sm:$0xff]  }
 0x467   : > { %v7825_v21 = vpop.eup %6625  ;;  %5767 = vmatpush3.bf16.msra.mxu0 %v6330_v39  ;;  %v6339_v39 = vld [vmem:[%s8574_s5 + $0x18] sm:$0xff]  }
 0x468   : > { %v1998_v10 = vmul.f32 1.442695, %v1996_v19  ;;  %v1778_v22 = vsel %vm1653_vm1, %v7825_v21, 0.0  ;;  %5768 = vmatprep.subr.bf16.mxu0 %v6331_v40  ;;  %v6342_v40 = vld [vmem:[%s8574_s5 + $0xf0] sm:$0xff]  }
 0x469   : > { %1779 = vadd.xlane.f32.xlu0 %v1778_v22  ;;  %v1995_v23 = vpop.xlane.xlu1 %1994 }
 0x46a   : > { %6633 = vpow2.f32 %v1998_v10  ;;  %v1997_v24 = vsub.f32 %v1986_v43, %v1995_v23  ;;  %v6333_v43 = vld [vmem:[%s8574_s5 + $0x68] sm:$0xff]  }
 0x46b   : > { %v7829_v25 = vpop.eup %6627  ;;  %5769 = vmatpush3.bf16.msra.mxu0 %v6332_v41  ;;  %v6343_v41 = vld [vmem:[%s8574_s5 + $0x10] sm:$0xff]  }
 0x46c   : > { %v2000_v26 = vmul.f32 1.442695, %v1997_v24  ;;  %v1781_v27 = vsel %vm1653_vm1, %v7829_v25, 0.0  ;;  %5770 = vmatprep.subr.bf16.mxu0 %v6333_v43  ;;  %v6344_v43 = vld [vmem:[%s8574_s5 + $0xb0] sm:$0xff]  }
 0x46d   : > { %1782 = vadd.xlane.f32.xlu1 %v1781_v27 }
 0x46e   : > { %6635 = vpow2.f32 %v2000_v26 }
 0x46f   : > { %v7833_v28 = vpop.eup %6629  ;;  %5771 = vmatpush3.bf16.msra.mxu0 %v6334_v44  ;;  %v6345_v44 = vld [vmem:[%s8574_s5 + $0x48] sm:$0xff]  }
 0x470   : > { %v1890_v29 = vsel %vm1653_vm1, %v7833_v28, 0.0  ;;  %5772 = vmatprep.subr.bf16.mxu0 %v6335_v47  ;;  %v6346_v47 = vld [vmem:[%s8574_s5 + $0xe8] sm:$0xff]  }
 0x471   : > { %1891 = vadd.xlane.f32.xlu0 %v1890_v29 }
 0x473   : > { %v7837_v30 = vpop.eup %6631  ;;  %5773 = vmatpush3.bf16.msra.mxu0 %v6336_v48  ;;  %v6347_v48 = vld [vmem:[%s8574_s5 + $0x8] sm:$0xff]  }
 0x474   : > { %v1893_v32 = vsel %vm1653_vm1, %v7837_v30, 0.0 }
 0x475   : > { %1894 = vadd.xlane.f32.xlu1 %v1893_v32 }
 0x477   : > { %v7841_v34 = vpop.eup %6633 }
 0x478   : > { %v2002_v35 = vsel %vm1653_vm1, %v7841_v34, 0.0 }
 0x479   : > { %2003 = vadd.xlane.f32.xlu0 %v2002_v35 }
 0x47b   : > { %v7845_v36 = vpop.eup %6635 }
 0x47c   : > { %v2005_v37 = vsel %vm1653_vm1, %v7845_v36, 0.0 }
 0x47d   : > { %2006 = vadd.xlane.f32.xlu1 %v2005_v37 }
 0x4ea   : > { %v1668_v49 = vpop.xlane.xlu0 %1667 }
 0x4eb   : > { %6637 = vrcp.f32 %v1668_v49  ;;  %v6348_v49 = vld [vmem:[%s8574_s5 + $0xa8] sm:$0xff]  }
 0x4ee   : > { %v1671_v50 = vpop.xlane.xlu1 %1670 }
 0x4ef   : > { %6639 = vrcp.f32 %v1671_v50  ;;  %v6349_v50 = vld [vmem:[%s8574_s5 + $0x40] sm:$0xff]  }
 0x4f2   : > { %v1780_v51 = vpop.xlane.xlu0 %1779 }
 0x4f3   : > { %6641 = vrcp.f32 %v1780_v51  ;;  %v6350_v51 = vld [vmem:[%s8574_s5 + $0xe0] sm:$0xff]  }
 0x4f6   : > { %v1783_v52 = vpop.xlane.xlu1 %1782 }
 0x4f7   : > { %6643 = vrcp.f32 %v1783_v52  ;;  %v6351_v52 = vld [vmem:[%s8574_s5] sm:$0xff]  }
 0x4f8   : > { %v6638_v54 = vpop.eup %6637 }
 0x4f9   : > { %v1674_v60 = vmul.f32 %v6638_v54, %v7820_v4  ;;  %v6353_v54 = vld [vmem:[%s8574_s5 + $0xd8] sm:$0xff]  }
 0x4fa   : > { %v1892_v56 = vpop.xlane.xlu0 %1891 }
 0x4fb   : > { %6645 = vrcp.f32 %v1892_v56  ;;  %v6354_v56 = vld [vmem:[%s8574_s5 + $0x98] sm:$0xff]  }
 0x4fc   : > { %v6640_v57 = vpop.eup %6639 }
 0x4fd   : > { %v1675_v61 = vmul.f32 %v6640_v57, %v6624_v13  ;;  %v1605_v13 = vadd.f32 %v1604_v5, %v854_v8  ;;  %v6355_v57 = vld [vmem:[%s8574_s5 + $0xd0] sm:$0xff]  }
 0x4fe   : > { %v1895_v62 = vpop.xlane.xlu1 %1894 }
 0x4ff   : > { %6647 = vrcp.f32 %v1895_v62  ;;  %v1676_v63 = vpack.c.bf16 %v1675_v61, %v1674_v60  ;;  %v1836_v22 = vpack.c.bf16 %v1605_v13, %v1601_v15  ;;  %v6357_v60 = vld [vmem:[%s8574_s5 + $0xc8] sm:$0xff]   ;;  %v6359_v62 = vld [vmem:[%s8574_s5 + $0xc0] sm:$0xff]  }
 0x500   : > { %v6642_v7 = vpop.eup %6641  ;;  %v6358_v61 = vld [vmem:[%s8574_s5 + $0x88] sm:$0xff]  }
 0x501   : > { %5923 = vmatmul.mubr.msk.bf16.vlgmr.msra.gmra.mxu1 %vm1653_vm1, %v1676_v63  ;;  %v1786_v14 = vmul.f32 %v6642_v7, %v7825_v21  ;;  %v6360_v63 = vld [vmem:[%s8574_s5 + $0x80] sm:$0xff]  }
 0x502   : > { %5933 = vmatpush3.bf16.msra.mxu1 %v1724_v18  ;;  %v2004_v11 = vpop.xlane.xlu0 %2003  ;;  %5934 = vmatprep.mubr.msk.bf16.mxu1 %vm7143_vm0, %v7142_v3  ;;  %v858_v18 = vrot.slane %v7795_v58, %v7793_v55 }
 0x503   : > { %5944 = vmatprep.subr.bf16.mxu1 %v7142_v3  ;;  %6649 = vrcp.f32 %v2004_v11 }
 0x504   : > { %v6644_v4 = vpop.eup %6643  ;;  %v1607_v23 = vadd.f32 %v1606_v6, %v858_v18  ;;  %v1603_v26 = vadd.f32 %v1602_v59, %v858_v18  ;;  %v6356_v59 = vld [vmem:[%s8574_s5 + $0x90] sm:$0xff]  }
 0x505   : > { %v1787_v12 = vmul.f32 %v6644_v4, %v7829_v25 }
 0x506   : > { %v2007_v19 = vpop.xlane.xlu1 %2006  ;;  %v1948_v29 = vpack.c.bf16 %v1607_v23, %v1603_v26 }
 0x507   : > { %6651 = vrcp.f32 %v2007_v19  ;;  %v1788_v10 = vpack.c.bf16 %v1787_v12, %v1786_v14 }
 0x508   : > { %v6646_v16 = vpop.eup %6645 }
 0x509   : > { %5935 = vmatmul.mubr.msk.bf16.vlgmr.msra.gmra.mxu1 %vm1653_vm1, %v1788_v10  ;;  %v1898_v24 = vmul.f32 %v6646_v16, %v7833_v28  ;;  %v6337_v28 = vld [vmem:[%s8574_s5 + $0x58] sm:$0xff]  }
 0x50a   : > { %5945 = vmatpush3.bf16.msra.mxu1 %v1836_v22  ;;  %5946 = vmatprep.mubr.msk.bf16.mxu1 %vm7143_vm0, %v7142_v3 }
 0x50b   : > { %5956 = vmatprep.subr.bf16.mxu1 %v7142_v3  ;;  %5774 = vmatprep.subr.bf16.mxu0 %v6337_v28 }
 0x50c   : > { %v6648_v21 = vpop.eup %6647  ;;  %5775 = vmatpush3.bf16.msra.mxu0 %v6339_v39 }
 0x50d   : > { %v1899_v25 = vmul.f32 %v6648_v21, %v7837_v30  ;;  %v6338_v30 = vld [vmem:[%s8574_s5 + $0xf8] sm:$0xff]  }
 0x50f   : > { %v1900_v27 = vpack.c.bf16 %v1899_v25, %v1898_v24 }
 0x510   : > { %v6650_v32 = vpop.eup %6649 }
 0x511   : > { %5947 = vmatmul.mubr.msk.bf16.vlgmr.msra.gmra.mxu1 %vm1653_vm1, %v1900_v27  ;;  %v2010_v35 = vmul.f32 %v6650_v32, %v7841_v34  ;;  %v6340_v34 = vld [vmem:[%s8574_s5 + $0xb8] sm:$0xff]  }
 0x512   : > { %5957 = vmatpush3.bf16.msra.mxu1 %v1948_v29  ;;  %5958 = vmatprep.mubr.msk.bf16.mxu1 %vm7143_vm0, %v7142_v3 }
 0x513   : > { %5788 = vmatprep.subr.bf16.mxu1 %v6338_v30 }
 0x514   : > { %v6652_v58 = vpop.eup %6651 }
 0x515   : > { %v2011_v37 = vmul.f32 %v6652_v58, %v7845_v36  ;;  %v6341_v36 = vld [vmem:[%s8574_s5 + $0x50] sm:$0xff]  }
 0x516   : > { %5776 = vmatprep.subr.bf16.mxu0 %v6341_v36  ;;  %v5371_v36 = vld [vmem:[#allocation8] ss:$0 sm:$0xff] }
 0x517   : > { %v2012_v38 = vpack.c.bf16 %v2011_v37, %v2010_v35  ;;  %5777 = vmatpush3.bf16.msra.mxu0 %v6343_v41 }
 0x518   : > { %5778 = vmatprep.subr.bf16.mxu0 %v6345_v44 }
 0x519   : > { %5959 = vmatmul.mubr.msk.bf16.vlgmr.msra.gmra.mxu1 %vm1653_vm1, %v2012_v38 }
 0x51a   : > { %5789 = vmatpush3.bf16.msra.mxu1 %v6340_v34 }
 0x51b   : > { %5790 = vmatprep.subr.bf16.mxu1 %v6342_v40  ;;  %5779 = vmatpush3.bf16.msra.mxu0 %v6347_v48 }
 0x51c   : > { %5780 = vmatprep.subr.bf16.mxu0 %v6349_v50  ;;  %v6361_v50 = vld [vmem:[#allocation13 + $0x70] ss:$8 sps:$4 sm:$0xff]  }
 0x51e   : > { %5791 = vmatpush3.bf16.msra.mxu1 %v6344_v43 }
 0x51f   : > { %5792 = vmatprep.subr.bf16.mxu1 %v6346_v47  ;;  %5781 = vmatpush3.bf16.msra.mxu0 %v6351_v52 }
 0x522   : > { %5793 = vmatpush3.bf16.msra.mxu1 %v6348_v49 }
 0x523   : > { %5794 = vmatprep.subr.bf16.mxu1 %v6350_v51  ;;  %v6363_v51 = vld [vmem:[#allocation13 + $0x74] ss:$8 sps:$4 sm:$0xff]  }
 0x524   : > { %2556 = vmatprep.subr.bf16.mxu0 %v6363_v51  ;;  %v6396_v51 = vld [vmem:[#allocation16 + $0x10] sm:$0xff]  }
 0x526   : > { %5795 = vmatpush3.bf16.msra.mxu1 %v6352_v53 }
 0x527   : > { %5796 = vmatprep.subr.bf16.mxu1 %v6353_v54 }
 0x52a   : > { %5797 = vmatpush3.bf16.msra.mxu1 %v6354_v56 }
 0x52b   : > { %5798 = vmatprep.subr.bf16.mxu1 %v6355_v57 }
 0x52e   : > { %5799 = vmatpush3.bf16.msra.mxu1 %v6356_v59 }
 0x52f   : > { %5800 = vmatprep.subr.bf16.mxu1 %v6357_v60  ;;  %v6366_v60 = vld [vmem:[#allocation13 + $0x64] ss:$8 sps:$4 sm:$0xff]  }
 0x532   : > { %5801 = vmatpush3.bf16.msra.mxu1 %v6358_v61  ;;  %v6364_v61 = vld [vmem:[#allocation13 + $0x60] ss:$8 sps:$4 sm:$0xff]  }
 0x533   : > { %5802 = vmatprep.subr.bf16.mxu1 %v6359_v62  ;;  %v6369_v62 = vld [vmem:[#allocation13 + $0x54] ss:$8 sps:$4 sm:$0xff]  }
 0x536   : > { %5803 = vmatpush3.bf16.msra.mxu1 %v6360_v63  ;;  %v6367_v63 = vld [vmem:[#allocation13 + $0x50] ss:$8 sps:$4 sm:$0xff]  }
 0x5c1   : > { %v1714_v5 = vpop.f32.mrf.mxu1 }
 0x5c3   : > { %v5924_v7 = vpop.f32.mrf.mxu1 }
 0x5c4   : > { %v6372_v7 = vld [vmem:[#allocation13 + $0x44] ss:$8 sps:$4 sm:$0xff]  }
 0x5c5   : > { %v1717_v8 = vpop.f32.mrf.mxu1 }
 0x5c6   : > { %v1721_v15 = vpack.c.bf16 %v1717_v8, %v1714_v5  ;;  %v6370_v5 = vld [vmem:[#allocation13 + $0x40] ss:$8 sps:$4 sm:$0xff]   ;;  %v6375_v8 = vld [vmem:[#allocation13 + $0x34] ss:$8 sps:$4 sm:$0xff]  }
 0x5c7   : > { %v5925_v11 = vpop.f32.mrf.mxu1 }
 0x5c8   : > { %v6373_v11 = vld [vmem:[#allocation13 + $0x30] ss:$8 sps:$4 sm:$0xff]  }
 0x5c9   : > { %v1826_v4 = vpop.f32.mrf.mxu1 }
 0x5cb   : > { %v5936_v13 = vpop.f32.mrf.mxu1 }
 0x5cc   : > { %v6376_v13 = vld [vmem:[#allocation13 + $0x20] ss:$8 sps:$4 sm:$0xff]  }
 0x5cd   : > { %v1829_v14 = vpop.f32.mrf.mxu1 }
 0x5ce   : > { %v1833_v12 = vpack.c.bf16 %v1829_v14, %v1826_v4  ;;  %v6378_v4 = vld [vmem:[#allocation13 + $0x24] ss:$8 sps:$4 sm:$0xff]   ;;  %v6381_v14 = vld [vmem:[#allocation13 + $0x14] ss:$8 sps:$4 sm:$0xff]  }
 0x5cf   : > { %v5937_v19 = vpop.f32.mrf.mxu1 }
 0x5d0   : > { %2346 = vmatprep.mubr.bf16.mxu0 %v1833_v12  ;;  %v6379_v12 = vld [vmem:[#allocation13 + $0x10] ss:$8 sps:$4 sm:$0xff]   ;;  %v6382_v19 = vld [vmem:[#allocation13] ss:$8 sps:$4 sm:$0xff]  }
 0x5d1   : > { %v1938_v10 = vpop.f32.mrf.mxu1  ;;  %2347 = vmatmul.mubr.bf16.vlgmr.msra.gmra.mxu0 %v1721_v15  ;;  %v6384_v15 = vld [vmem:[#allocation13 + $0x4] ss:$8 sps:$4 sm:$0xff]  }
 0x5d2   : > { %2588 = vmatprep.mubr.bf16.mxu0 %v7141_v45  ;;  %2557 = vmatpush1.bf16.msra.mxu0 %v6361_v50  ;;  %v6395_v50 = vld [vmem:[#allocation16 + $0x50] sm:$0xff]  }
 0x5d3   : > { %v5948_v22 = vpop.f32.mrf.mxu1  ;;  %2558 = vmatprep.subr.bf16.mxu0 %v6366_v60 }
 0x5d5   : > { %v1941_v6 = vpop.f32.mrf.mxu1 }
 0x5d6   : > { %v1945_v25 = vpack.c.bf16 %v1941_v6, %v1938_v10  ;;  %2559 = vmatpush1.bf16.msra.mxu0 %v6364_v61 }
 0x5d7   : > { %v5949_v16 = vpop.f32.mrf.mxu1  ;;  %2560 = vmatprep.subr.bf16.mxu0 %v6369_v62 }
 0x5d9   : > { %v2050_v18 = vpop.f32.mrf.mxu1 }
 0x5da   : > { %2561 = vmatpush1.bf16.msra.mxu0 %v6367_v63 }
 0x5db   : > { %v5960_v21 = vpop.f32.mrf.mxu1  ;;  %2562 = vmatprep.subr.bf16.mxu0 %v6372_v7 }
 0x5dd   : > { %v2053_v23 = vpop.f32.mrf.mxu1 }
 0x5de   : > { %v2057_v24 = vpack.c.bf16 %v2053_v23, %v2050_v18  ;;  %2563 = vmatpush1.bf16.msra.mxu0 %v6370_v5 }
 0x5df   : > { %v5961_v26 = vpop.f32.mrf.mxu1  ;;  %2564 = vmatprep.subr.bf16.mxu0 %v6375_v8 }
 0x5e0   : > { %2387 = vmatprep.mubr.bf16.mxu1 %v2057_v24 }
 0x5e1   : > { %2388 = vmatmul.mubr.bf16.vlgmr.msra.gmra.mxu1 %v1945_v25  ;;  %v5372_v25 = vld [vmem:[#allocation10] ss:$0 sm:$0xff] }
 0x5e2   : > { %2565 = vmatpush1.bf16.msra.mxu0 %v6373_v11 }
 0x5e3   : > { %2566 = vmatprep.subr.bf16.mxu0 %v6378_v4 }
 0x5e6   : > { %2567 = vmatpush1.bf16.msra.mxu0 %v6376_v13 }
 0x5e7   : > { %2568 = vmatprep.subr.bf16.mxu0 %v6381_v14 }
 0x5ea   : > { %2569 = vmatpush1.bf16.msra.mxu0 %v6379_v12 }
 0x5eb   : > { %2570 = vmatprep.subr.bf16.mxu0 %v6384_v15 }
 0x5ee   : > { %2571 = vmatpush1.bf16.msra.mxu0 %v6382_v19 }
 0x691   : > { %v5782_v27 = vpop.f32.mrf.mxu0 }
 0x693   : > { %v5783_v29 = vpop.f32.mrf.mxu0 }
 0x694   : > { %v5784_v37 = vadd.f32 %v5783_v29, %v5782_v27 }
 0x695   : > { %v5785_v32 = vpop.f32.mrf.mxu0 }
 0x697   : > { %v5786_v28 = vpop.f32.mrf.mxu0 }
 0x698   : > { %v5787_v40 = vadd.f32 %v5786_v28, %v5785_v32  ;;  %v5373_v32 = vld [vmem:[#allocation11] ss:$0 sm:$0xff] }
 0x699   : > { %v6385_v28 = vld [vmem:[#allocation16 + $0x78] sm:$0xff]  }
 0x69a   : > { %5810 = vmatprep.subr.bf16.mxu1 %v6385_v28 }
 0x6a1   : > { %v5804_v58 = vpop.f32.mrf.mxu1 }
 0x6a3   : > { %v5805_v35 = vpop.f32.mrf.mxu1 }
 0x6a4   : > { %v5806_v38 = vadd.f32 %v5805_v35, %v5804_v58 }
 0x6a5   : > { %v5807_v30 = vpop.f32.mrf.mxu1 }
 0x6a6   : > { %v2390_v39 = vadd.f32 %v5806_v38, %v5784_v37 }
 0x6a7   : > { %v5808_v34 = vpop.f32.mrf.mxu1 }
 0x6a8   : > { %v2396_v41 = vadd.f32 %v7431_v1, %v2390_v39  ;;  %v5809_v43 = vadd.f32 %v5808_v34, %v5807_v30  ;;  %v6386_v30 = vld [vmem:[#allocation16 + $0x38] sm:$0xff]   ;;  %v6387_v39 = vld [vmem:[#allocation16 + $0x70] sm:$0xff]  }
 0x6a9   : > { %5811 = vmatpush3.bf16.msra.mxu1 %v6386_v30  ;;  %v6388_v34 = vld [vmem:[#allocation16 + $0x30] sm:$0xff]  }
 0x6aa   : > { %v2393_v44 = vadd.f32 %v5809_v43, %v5787_v40  ;;  %v7973_v47 = vadd.f32 %v5371_v36, %v2396_v41  ;;  %5812 = vmatprep.subr.bf16.mxu1 %v6387_v39  ;;  %v6390_v40 = vld [vmem:[#allocation16 + $0x28] sm:$0xff]   ;;  %v6391_v41 = vld [vmem:[#allocation16 + $0x60] sm:$0xff]  }
 0x6ab   : > { %v6392_v43 = vld [vmem:[#allocation16 + $0x20] sm:$0xff]  }
 0x6ac   : > { %v2397_v48 = vadd.f32 %v7434_v2, %v2393_v44  ;;  %2409 = vadd.xlane.f32.xlu0 %v7973_v47  ;;  %v6393_v44 = vld [vmem:[#allocation16 + $0x58] sm:$0xff]  }
 0x6ad   : > { %5813 = vmatpush3.bf16.msra.mxu1 %v6388_v34 }
 0x6ae   : > { %v7977_v49 = vadd.f32 %v5371_v36, %v2397_v48  ;;  %v6389_v36 = vld [vmem:[#allocation16 + $0x68] sm:$0xff]   ;;  %v6394_v48 = vld [vmem:[#allocation16 + $0x18] sm:$0xff]  }
 0x6af   : > { %5814 = vmatprep.subr.bf16.mxu1 %v6389_v36 }
 0x6b0   : > { %2411 = vadd.xlane.f32.xlu1 %v7977_v49 }
 0x6b1   : > { %5815 = vmatpush3.bf16.msra.mxu1 %v6390_v40 }
 0x6b2   : > { %5816 = vmatprep.subr.bf16.mxu1 %v6391_v41 }
 0x6b5   : > { %5817 = vmatpush3.bf16.msra.mxu1 %v6392_v43 }
 0x6b6   : > { %5818 = vmatprep.subr.bf16.mxu1 %v6393_v44 }
 0x6b9   : > { %5819 = vmatpush3.bf16.msra.mxu1 %v6394_v48 }
 0x6ba   : > { %5820 = vmatprep.subr.bf16.mxu1 %v6395_v50 }
 0x6bd   : > { %5821 = vmatpush3.bf16.msra.mxu1 %v6396_v51 }
 0x735   : > { %v2410_v52 = vpop.xlane.xlu0 %2409 }
 0x736   : > { %v2413_v53 = vmul.f32 0.0078125, %v2410_v52  ;;  %v6397_v52 = vld [vmem:[#allocation16 + $0x48] sm:$0xff]  }
 0x737   : > { %5822 = vmatprep.subr.bf16.mxu1 %v6397_v52 }
 0x738   : > { %v2415_v1 = vsub.f32 %v7973_v47, %v2413_v53  ;;  %v6398_v53 = vld [vmem:[#allocation16 + $0x8] sm:$0xff]  }
 0x739   : > { %v2412_v54 = vpop.xlane.xlu1 %2411  ;;  %5823 = vmatpush3.bf16.msra.mxu1 %v6398_v53 }
 0x73a   : > { %v2414_v56 = vmul.f32 0.0078125, %v2412_v54  ;;  %v2417_v57 = vmul.f32 %v2415_v1, %v2415_v1  ;;  %v6400_v54 = vld [vmem:[#allocation16] sm:$0xff]  }
 0x73c   : > { %v2416_v59 = vsub.f32 %v7977_v49, %v2414_v56  ;;  %2419 = vadd.xlane.f32.xlu0 %v2417_v57  ;;  %v2464_v56 = vld [vmem:[#allocation14] sm:$0x3] }
 0x73d   : > { %v2469_v57 = vrot.slane %v2464_v56, %v7765_v17 }
 0x73e   : > { %v2418_v2 = vmul.f32 %v2416_v59, %v2416_v59 }
 0x740   : > { %2421 = vadd.xlane.f32.xlu1 %v2418_v2 }
 0x7c5   : > { %v2420_v10 = vpop.xlane.xlu0 %2419 }
 0x7c6   : > { %v2423_v22 = vmul.f32 0.0078125, %v2420_v10 }
 0x7c8   : > { %v2425_v6 = vadd.f32 1e-06, %v2423_v22 }
 0x7c9   : > { %v2422_v16 = vpop.xlane.xlu1 %2421 }
 0x7ca   : > { %6653 = vrsqrt.f32 %v2425_v6  ;;  %v2424_v18 = vmul.f32 0.0078125, %v2422_v16 }
 0x7cc   : > { %v2426_v21 = vadd.f32 1e-06, %v2424_v18 }
 0x7ce   : > { %6655 = vrsqrt.f32 %v2426_v21 }
 0x7d7   : > { %v6654_v23 = vpop.eup %6653 }
 0x7d8   : > { %v2429_v24 = vmul.f32 %v6654_v23, %v2415_v1  ;;  %v6399_v1 = vld [vmem:[#allocation16 + $0x40] sm:$0xff]  }
 0x7d9   : > { %5824 = vmatprep.subr.bf16.mxu1 %v6399_v1 }
 0x7da   : > { %v2437_v29 = vmul.f32 %v5372_v25, %v2429_v24  ;;  %5825 = vmatpush3.bf16.msra.mxu1 %v6400_v54  ;;  %v5390_v54 = vld [vmem:[#allocation17] ss:$0 sm:$0xff] }
 0x7db   : > { %v6656_v26 = vpop.eup %6655 }
 0x7dc   : > { %v2430_v27 = vmul.f32 %v6656_v26, %v2416_v59  ;;  %v2445_v35 = vadd.f32 %v5373_v32, %v2437_v29  ;;  %v2473_v59 = vrot.slane %v2464_v56, %v7773_v31 }
 0x7de   : > { %v2438_v58 = vmul.f32 %v5372_v25, %v2430_v27 }
 0x7e0   : > { %v2446_v37 = vadd.f32 %v5373_v32, %v2438_v58 }
 0x7e2   : > { %v2447_v38 = vpack.c.bf16 %v2446_v37, %v2445_v35 }
 0x7e4   : > { %2589 = vmatmul.mubr.bf16.vlgmr.msra.gmra.mxu0 %v2447_v38 }
 0x7e5   : > { %3532 = vmatprep.mubr.bf16.mxu0 %v7141_v45 }
 0x8a4   : > { %v2590_v2 = vpop.f32.mrf.mxu0 }
 0x8a5   : > { %v2591_v60 = vadd.f32 %v2590_v2, %v2469_v57 }
 0x8a6   : > { %v2592_v61 = vpop.f32.mrf.mxu0 }
 0x8a7   : > { %v2603_v62 = vmul.f32 0.044715, %v2591_v60  ;;  %v2593_v63 = vadd.f32 %v2592_v61, %v2473_v59  ;;  %v2599_v43 = vmul.f32 0.5, %v2591_v60 }
 0x8a8   : > { %v2594_v5 = vpop.f32.mrf.mxu0 }
 0x8a9   : > { %v2607_v7 = vmul.f32 %v2603_v62, %v2591_v60  ;;  %v2604_v8 = vmul.f32 0.044715, %v2593_v63  ;;  %v2595_v11 = vadd.f32 %v2594_v5, %v2469_v57  ;;  %v2600_v36 = vmul.f32 0.5, %v2593_v63 }
 0x8aa   : > { %v2596_v4 = vpop.f32.mrf.mxu0 }
 0x8ab   : > { %v2611_v13 = vmul.f32 %v2607_v7, %v2591_v60  ;;  %v2608_v14 = vmul.f32 %v2604_v8, %v2593_v63  ;;  %v2605_v12 = vmul.f32 0.044715, %v2595_v11  ;;  %v2597_v15 = vadd.f32 %v2596_v4, %v2473_v59  ;;  %v6401_v7 = vld [vmem:[%s8572_s3 + $0x5a0] ss:$48 sps:$4 sm:$0xff]   ;;  %v6403_v8 = vld [vmem:[%s8572_s3 + $0x5a4] ss:$48 sps:$4 sm:$0xff]  }
 0x8ac   : > { %v2601_v39 = vmul.f32 0.5, %v2595_v11  ;;  %3500 = vmatprep.subr.bf16.mxu0 %v6403_v8 }
 0x8ad   : > { %v2615_v19 = vadd.f32 %v2611_v13, %v2591_v60  ;;  %v2612_v10 = vmul.f32 %v2608_v14, %v2593_v63  ;;  %v2609_v22 = vmul.f32 %v2605_v12, %v2595_v11  ;;  %v2606_v6 = vmul.f32 0.044715, %v2597_v15  ;;  %3501 = vmatpush1.bf16.msra.mxu0 %v6401_v7 }
 0x8ae   : > { %v2602_v40 = vmul.f32 0.5, %v2597_v15 }
 0x8af   : > { %v2613_v16 = vmul.f32 %v2609_v22, %v2595_v11  ;;  %v2610_v18 = vmul.f32 %v2606_v6, %v2597_v15  ;;  %v2616_v21 = vadd.f32 %v2612_v10, %v2593_v63  ;;  %v2619_v23 = vmul.f32 0.7978846, %v2615_v19  ;;  %v6409_v22 = vld [vmem:[%s8572_s3 + $0x544] ss:$48 sps:$4 sm:$0xff]   ;;  %v6412_v6 = vld [vmem:[%s8572_s3 + $0x54c] ss:$48 sps:$4 sm:$0xff]  }
 0x8b0   : > { %3502 = vmatprep.subr.bf16.mxu0 %v6409_v22  ;;  %v6455_v22 = vld [vmem:[%s8572_s3 + $0x550] ss:$48 sps:$4 sm:$0xff]  }
 0x8b1   : > { %v2617_v24 = vadd.f32 %v2613_v16, %v2595_v11  ;;  %v2614_v25 = vmul.f32 %v2610_v18, %v2597_v15  ;;  %v2620_v26 = vmul.f32 0.7978846, %v2616_v21  ;;  %v6406_v11 = vld [vmem:[%s8572_s3 + $0x5ac] ss:$48 sps:$4 sm:$0xff]   ;;  %v6407_v16 = vld [vmem:[%s8572_s3 + $0x540] ss:$48 sps:$4 sm:$0xff]  }
 0x8b2   : > { %3543 = vmatprep.subr.bf16.mxu1 %v6406_v11  ;;  %v6410_v18 = vld [vmem:[%s8572_s3 + $0x548] ss:$48 sps:$4 sm:$0xff]   ;;  %3503 = vmatpush1.bf16.msra.mxu0 %v6407_v16  ;;  %v6415_v21 = vld [vmem:[%s8572_s3 + $0x4e4] ss:$48 sps:$4 sm:$0xff]   ;;  %v5408_v11 = vld [vmem:[#allocation5 + $0x1] ss:$0 sm:$0xff] }
 0x8b3   : > { %v2621_v27 = vmul.f32 0.7978846, %v2617_v24  ;;  %v2618_v29 = vadd.f32 %v2614_v25, %v2597_v15  ;;  %6657 = vtanh.f32 %v2620_v26  ;;  %v6413_v24 = vld [vmem:[%s8572_s3 + $0x4e0] ss:$48 sps:$4 sm:$0xff]   ;;  %v6416_v25 = vld [vmem:[%s8572_s3 + $0x4e8] ss:$48 sps:$4 sm:$0xff]   ;;  %3504 = vmatprep.subr.bf16.mxu0 %v6415_v21 }
 0x8b4   : > { %6659 = vtanh.f32 %v2619_v23  ;;  %v6418_v23 = vld [vmem:[%s8572_s3 + $0x4ec] ss:$48 sps:$4 sm:$0xff]   ;;  %v6421_v26 = vld [vmem:[%s8572_s3 + $0x484] ss:$48 sps:$4 sm:$0xff]   ;;  %v6461_v21 = vld [vmem:[%s8572_s3 + $0x4f0] ss:$48 sps:$4 sm:$0xff]  }
 0x8b5   : > { %6661 = vtanh.f32 %v2621_v27  ;;  %v2622_v32 = vmul.f32 0.7978846, %v2618_v29  ;;  %v6424_v27 = vld [vmem:[%s8572_s3 + $0x48c] ss:$48 sps:$4 sm:$0xff]   ;;  %v6419_v29 = vld [vmem:[%s8572_s3 + $0x480] ss:$48 sps:$4 sm:$0xff]  }
 0x8b6   : > { %3505 = vmatpush1.bf16.msra.mxu0 %v6413_v24  ;;  %v6463_v16 = vld [vmem:[%s8572_s3 + $0x4f4] ss:$48 sps:$4 sm:$0xff]  }
 0x8b7   : > { %6663 = vtanh.f32 %v2622_v32  ;;  %v6422_v32 = vld [vmem:[%s8572_s3 + $0x488] ss:$48 sps:$4 sm:$0xff]   ;;  %3506 = vmatprep.subr.bf16.mxu0 %v6421_v26  ;;  %v6469_v24 = vld [vmem:[%s8572_s3 + $0x494] ss:$48 sps:$4 sm:$0xff]   ;;  %v6467_v26 = vld [vmem:[%s8572_s3 + $0x490] ss:$48 sps:$4 sm:$0xff]  }
 0x8ba   : > { %3507 = vmatpush1.bf16.msra.mxu0 %v6419_v29  ;;  %v6475_v29 = vld [vmem:[%s8572_s3 + $0x434] ss:$48 sps:$4 sm:$0xff]  }
 0x8c0   : > { %v6658_v58 = vpop.eup %6657 }
 0x8c1   : > { %v6660_v35 = vpop.eup %6659  ;;  %v2628_v38 = vadd.f32 1.0, %v6658_v58  ;;  %v6427_v58 = vld [vmem:[%s8572_s3 + $0x424] ss:$48 sps:$4 sm:$0xff]  }
 0x8c2   : > { %v6662_v37 = vpop.eup %6661  ;;  %v2627_v34 = vadd.f32 1.0, %v6660_v35  ;;  %v6430_v35 = vld [vmem:[%s8572_s3 + $0x42c] ss:$48 sps:$4 sm:$0xff]   ;;  %3508 = vmatprep.subr.bf16.mxu0 %v6427_v58  ;;  %v6473_v58 = vld [vmem:[%s8572_s3 + $0x430] ss:$48 sps:$4 sm:$0xff]  }
 0x8c3   : > { %v2629_v28 = vadd.f32 1.0, %v6662_v37  ;;  %v2632_v48 = vmul.f32 %v2628_v38, %v2600_v36  ;;  %v6425_v37 = vld [vmem:[%s8572_s3 + $0x420] ss:$48 sps:$4 sm:$0xff]   ;;  %v6428_v38 = vld [vmem:[%s8572_s3 + $0x428] ss:$48 sps:$4 sm:$0xff]  }
 0x8c4   : > { %v6664_v30 = vpop.eup %6663  ;;  %v2631_v51 = vmul.f32 %v2627_v34, %v2599_v43  ;;  %3509 = vmatpush1.bf16.msra.mxu0 %v6425_v37  ;;  %v6434_v34 = vld [vmem:[%s8572_s3 + $0x3c8] ss:$48 sps:$4 sm:$0xff]   ;;  %v6439_v36 = vld [vmem:[%s8572_s3 + $0x364] ss:$48 sps:$4 sm:$0xff]  }
 0x8c5   : > { %v2630_v41 = vadd.f32 1.0, %v6664_v30  ;;  %v2633_v44 = vmul.f32 %v2629_v28, %v2601_v39  ;;  %v6433_v28 = vld [vmem:[%s8572_s3 + $0x3c4] ss:$48 sps:$4 sm:$0xff]   ;;  %v6436_v30 = vld [vmem:[%s8572_s3 + $0x3cc] ss:$48 sps:$4 sm:$0xff]  }
 0x8c6   : > { %v6431_v39 = vld [vmem:[%s8572_s3 + $0x3c0] ss:$48 sps:$4 sm:$0xff]   ;;  %3510 = vmatprep.subr.bf16.mxu0 %v6433_v28  ;;  %v6440_v43 = vld [vmem:[%s8572_s3 + $0x368] ss:$48 sps:$4 sm:$0xff]   ;;  %v6481_v37 = vld [vmem:[%s8572_s3 + $0x3d4] ss:$48 sps:$4 sm:$0xff]  }
 0x8c7   : > { %v2634_v50 = vmul.f32 %v2630_v41, %v2602_v40  ;;  %v2635_v53 = vpack.c.bf16 %v2633_v44, %v2631_v51  ;;  %v6442_v40 = vld [vmem:[%s8572_s3 + $0x36c] ss:$48 sps:$4 sm:$0xff]   ;;  %v6437_v41 = vld [vmem:[%s8572_s3 + $0x360] ss:$48 sps:$4 sm:$0xff]  }
 0x8c8   : > { %3511 = vmatpush1.bf16.msra.mxu0 %v6431_v39  ;;  %v6443_v44 = vld [vmem:[%s8572_s3 + $0x300] ss:$48 sps:$4 sm:$0xff]   ;;  %v6448_v51 = vld [vmem:[%s8572_s3 + $0x30c] ss:$48 sps:$4 sm:$0xff]   ;;  %v6487_v39 = vld [vmem:[%s8572_s3 + $0x374] ss:$48 sps:$4 sm:$0xff]  }
 0x8c9   : > { %v2636_v52 = vpack.c.bf16 %v2634_v50, %v2632_v48  ;;  %3512 = vmatprep.subr.bf16.mxu0 %v6439_v36  ;;  %v6445_v48 = vld [vmem:[%s8572_s3 + $0x304] ss:$48 sps:$4 sm:$0xff]   ;;  %v6446_v50 = vld [vmem:[%s8572_s3 + $0x308] ss:$48 sps:$4 sm:$0xff]   ;;  %v6479_v28 = vld [vmem:[%s8572_s3 + $0x3d0] ss:$48 sps:$4 sm:$0xff]  }
 0x8ca   : > { %v6485_v36 = vld [vmem:[%s8572_s3 + $0x370] ss:$48 sps:$4 sm:$0xff]  }
 0x8cb   : > { %2804 = vmatprep.mubr.bf16.mxu1 %v2636_v52  ;;  %v6451_v52 = vld [vmem:[%s8572_s3 + $0x5b4] ss:$48 sps:$4 sm:$0xff]  }
 0x8cc   : > { %2805 = vmatmul.mubr.bf16.vlgmr.msra.gmra.mxu1 %v2635_v53  ;;  %3513 = vmatpush1.bf16.msra.mxu0 %v6437_v41  ;;  %v6454_v53 = vld [vmem:[%s8572_s3 + $0x5bc] ss:$48 sps:$4 sm:$0xff]   ;;  %v6493_v41 = vld [vmem:[%s8572_s3 + $0x314] ss:$48 sps:$4 sm:$0xff]  }
 0x8cd   : > { %3575 = vmatprep.mubr.bf16.mxu1 %v7141_v45  ;;  %3514 = vmatprep.subr.bf16.mxu0 %v6445_v48  ;;  %v6494_v48 = vld [vmem:[%s8572_s3 + $0x318] ss:$48 sps:$4 sm:$0xff]  }
 0x8d0   : > { %3515 = vmatpush1.bf16.msra.mxu0 %v6443_v44  ;;  %v6491_v44 = vld [vmem:[%s8572_s3 + $0x310] ss:$48 sps:$4 sm:$0xff]  }
 0x8d1   : > { %3586 = vmatprep.subr.bf16.mxu0 %v6451_v52  ;;  %v6497_v52 = vld [vmem:[%s8572_s3 + $0x5c0] ss:$48 sps:$4 sm:$0xff]  }
 0x98c   : > { %v5826_v1 = vpop.f32.mrf.mxu1 }
 0x98e   : > { %v5827_v56 = vpop.f32.mrf.mxu1 }
 0x98f   : > { %v5828_v57 = vadd.f32 %v5827_v56, %v5826_v1 }
 0x990   : > { %v5829_v59 = vpop.f32.mrf.mxu1 }
 0x991   : > { %v2807_v2 = vadd.f32 %v5828_v57, %v5390_v54 }
 0x992   : > { %v5830_v61 = vpop.f32.mrf.mxu1 }
 0x993   : > { %v5831_v62 = vadd.f32 %v5830_v61, %v5829_v59  ;;  %v7987_v60 = vadd.f32 %v2807_v2, %v7973_v47  ;;  %v6404_v47 = vld [vmem:[%s8572_s3 + $0x5a8] ss:$48 sps:$4 sm:$0xff]  }
 0x994   : > { %3544 = vmatpush1.bf16.msra.mxu1 %v6404_v47 }
 0x995   : > { %v2810_v63 = vadd.f32 %v5831_v62, %v5390_v54  ;;  %2819 = vadd.xlane.f32.xlu0 %v7987_v60  ;;  %3545 = vmatprep.subr.bf16.mxu1 %v6412_v6  ;;  %v6458_v6 = vld [vmem:[%s8572_s3 + $0x558] ss:$48 sps:$4 sm:$0xff]  }
 0x997   : > { %v7991_v5 = vadd.f32 %v2810_v63, %v7977_v49  ;;  %v5407_v63 = vld [vmem:[#allocation2 + $0x1] ss:$0 sm:$0xff] }
 0x998   : > { %3546 = vmatpush1.bf16.msra.mxu1 %v6410_v18  ;;  %v6466_v18 = vld [vmem:[%s8572_s3 + $0x4fc] ss:$48 sps:$4 sm:$0xff]  }
 0x999   : > { %2821 = vadd.xlane.f32.xlu1 %v7991_v5  ;;  %3547 = vmatprep.subr.bf16.mxu1 %v6418_v23  ;;  %v6464_v23 = vld [vmem:[%s8572_s3 + $0x4f8] ss:$48 sps:$4 sm:$0xff]  }
 0x99c   : > { %3548 = vmatpush1.bf16.msra.mxu1 %v6416_v25  ;;  %v6472_v25 = vld [vmem:[%s8572_s3 + $0x49c] ss:$48 sps:$4 sm:$0xff]  }
 0x99d   : > { %3549 = vmatprep.subr.bf16.mxu1 %v6424_v27  ;;  %v6470_v27 = vld [vmem:[%s8572_s3 + $0x498] ss:$48 sps:$4 sm:$0xff]  }
 0x9a0   : > { %3550 = vmatpush1.bf16.msra.mxu1 %v6422_v32  ;;  %v6478_v32 = vld [vmem:[%s8572_s3 + $0x43c] ss:$48 sps:$4 sm:$0xff]  }
 0x9a1   : > { %3551 = vmatprep.subr.bf16.mxu1 %v6430_v35  ;;  %v6476_v35 = vld [vmem:[%s8572_s3 + $0x438] ss:$48 sps:$4 sm:$0xff]  }
 0x9a4   : > { %3552 = vmatpush1.bf16.msra.mxu1 %v6428_v38  ;;  %v6484_v38 = vld [vmem:[%s8572_s3 + $0x3dc] ss:$48 sps:$4 sm:$0xff]  }
 0x9a5   : > { %3553 = vmatprep.subr.bf16.mxu1 %v6436_v30  ;;  %v6482_v30 = vld [vmem:[%s8572_s3 + $0x3d8] ss:$48 sps:$4 sm:$0xff]  }
 0x9a8   : > { %3554 = vmatpush1.bf16.msra.mxu1 %v6434_v34  ;;  %v6490_v34 = vld [vmem:[%s8572_s3 + $0x37c] ss:$48 sps:$4 sm:$0xff]  }
 0x9a9   : > { %3555 = vmatprep.subr.bf16.mxu1 %v6442_v40  ;;  %v6488_v40 = vld [vmem:[%s8572_s3 + $0x378] ss:$48 sps:$4 sm:$0xff]  }
 0x9ac   : > { %3556 = vmatpush1.bf16.msra.mxu1 %v6440_v43  ;;  %v6496_v43 = vld [vmem:[%s8572_s3 + $0x31c] ss:$48 sps:$4 sm:$0xff]  }
 0x9ad   : > { %3557 = vmatprep.subr.bf16.mxu1 %v6448_v51  ;;  %v6502_v51 = vld [vmem:[%s8572_s3 + $0x5cc] ss:$48 sps:$4 sm:$0xff]  }
 0x9b0   : > { %3558 = vmatpush1.bf16.msra.mxu1 %v6446_v50  ;;  %v6499_v50 = vld [vmem:[%s8572_s3 + $0x5c4] ss:$48 sps:$4 sm:$0xff]  }
 0x9b1   : > { %3629 = vmatprep.subr.bf16.mxu1 %v6454_v53  ;;  %v6500_v53 = vld [vmem:[%s8572_s3 + $0x5c8] ss:$48 sps:$4 sm:$0xff]  }
 0xa1e   : > { %v2820_v49 = vpop.xlane.xlu0 %2819 }
 0xa1f   : > { %v2823_v4 = vmul.f32 0.0078125, %v2820_v49 }
 0xa21   : > { %v8007_v13 = vsub.f32 %v7987_v60, %v2823_v4 }
 0xa22   : > { %v2822_v14 = vpop.xlane.xlu1 %2821 }
 0xa23   : > { %v2824_v12 = vmul.f32 0.0078125, %v2822_v14  ;;  %v2827_v15 = vmul.f32 %v8007_v13, %v8007_v13 }
 0xa25   : > { %v8012_v19 = vsub.f32 %v7991_v5, %v2824_v12  ;;  %2829 = vadd.xlane.f32.xlu0 %v2827_v15  ;;  %v6449_v12 = vld [vmem:[%s8572_s3 + $0x5b0] ss:$48 sps:$4 sm:$0xff]   ;;  %v6452_v15 = vld [vmem:[%s8572_s3 + $0x5b8] ss:$48 sps:$4 sm:$0xff]  }
 0xa27   : > { %v2828_v10 = vmul.f32 %v8012_v19, %v8012_v19 }
 0xa29   : > { %2831 = vadd.xlane.f32.xlu1 %v2828_v10 }
 0xaae   : > { %v2830_v1 = vpop.xlane.xlu0 %2829 }
 0xaaf   : > { %v2833_v54 = vmul.f32 0.0078125, %v2830_v1  ;;  %v6505_v1 = vld [vmem:[%s8572_s3 + $0x564] ss:$48 sps:$4 sm:$0xff]  }
 0xab1   : > { %v2835_v56 = vadd.f32 1e-06, %v2833_v54  ;;  %v6508_v54 = vld [vmem:[%s8572_s3 + $0x56c] ss:$48 sps:$4 sm:$0xff]  }
 0xab2   : > { %v2832_v57 = vpop.xlane.xlu1 %2831 }
 0xab3   : > { %6665 = vrsqrt.f32 %v2835_v56  ;;  %v2834_v59 = vmul.f32 0.0078125, %v2832_v57  ;;  %v6503_v56 = vld [vmem:[%s8572_s3 + $0x560] ss:$48 sps:$4 sm:$0xff]   ;;  %v6506_v57 = vld [vmem:[%s8572_s3 + $0x568] ss:$48 sps:$4 sm:$0xff]  }
 0xab5   : > { %v2836_v2 = vadd.f32 1e-06, %v2834_v59  ;;  %v6511_v59 = vld [vmem:[%s8572_s3 + $0x504] ss:$48 sps:$4 sm:$0xff]  }
 0xab7   : > { %6667 = vrsqrt.f32 %v2836_v2  ;;  %v6514_v2 = vld [vmem:[%s8572_s3 + $0x50c] ss:$48 sps:$4 sm:$0xff]  }
 0xac0   : > { %v6666_v61 = vpop.eup %6665 }
 0xac1   : > { %v2839_v62 = vmul.f32 %v6666_v61, %v8007_v13  ;;  %v6457_v13 = vld [vmem:[%s8572_s3 + $0x554] ss:$48 sps:$4 sm:$0xff]   ;;  %v6509_v61 = vld [vmem:[%s8572_s3 + $0x500] ss:$48 sps:$4 sm:$0xff]  }
 0xac3   : > { %v2847_v8 = vmul.f32 %v5407_v63, %v2839_v62  ;;  %v6512_v62 = vld [vmem:[%s8572_s3 + $0x508] ss:$48 sps:$4 sm:$0xff]  }
 0xac4   : > { %v6668_v7 = vpop.eup %6667 }
 0xac5   : > { %v2840_v47 = vmul.f32 %v6668_v7, %v8012_v19  ;;  %v2855_v4 = vadd.f32 %v5408_v11, %v2847_v8  ;;  %v6460_v19 = vld [vmem:[%s8572_s3 + $0x55c] ss:$48 sps:$4 sm:$0xff]   ;;  %v6515_v8 = vld [vmem:[%s8572_s3 + $0x4a0] ss:$48 sps:$4 sm:$0xff]  }
 0xac6   : > { %v6520_v7 = vld [vmem:[%s8572_s3 + $0x4ac] ss:$48 sps:$4 sm:$0xff]  }
 0xac7   : > { %v2848_v49 = vmul.f32 %v5407_v63, %v2840_v47  ;;  %v6517_v63 = vld [vmem:[%s8572_s3 + $0x4a4] ss:$48 sps:$4 sm:$0xff]   ;;  %v6518_v47 = vld [vmem:[%s8572_s3 + $0x4a8] ss:$48 sps:$4 sm:$0xff]  }
 0xac9   : > { %v2856_v14 = vadd.f32 %v5408_v11, %v2848_v49  ;;  %v6523_v11 = vld [vmem:[%s8572_s3 + $0x444] ss:$48 sps:$4 sm:$0xff]   ;;  %v6526_v49 = vld [vmem:[%s8572_s3 + $0x44c] ss:$48 sps:$4 sm:$0xff]  }
 0xacb   : > { %v8114_v10 = vpack.c.bf16 %v2856_v14, %v2855_v4  ;;  %v6521_v4 = vld [vmem:[%s8572_s3 + $0x440] ss:$48 sps:$4 sm:$0xff]   ;;  %v6524_v14 = vld [vmem:[%s8572_s3 + $0x448] ss:$48 sps:$4 sm:$0xff]  }
 0xacd   : > { %3533 = vmatmul.mubr.bf16.vlgmr.msra.gmra.mxu0 %v8114_v10  ;;  %3576 = vmatmul.mubr.bf16.vlgmr.msra.gmra.mxu1 %v8114_v10 }
 0xace   : > { %3587 = vmatpush1.bf16.msra.mxu0 %v6449_v12  ;;  %3630 = vmatpush1.bf16.msra.mxu1 %v6452_v15  ;;  %v6529_v12 = vld [vmem:[%s8572_s3 + $0x3e4] ss:$48 sps:$4 sm:$0xff]   ;;  %v6532_v15 = vld [vmem:[%s8572_s3 + $0x3ec] ss:$48 sps:$4 sm:$0xff]  }
 0xacf   : > { %3588 = vmatprep.subr.bf16.mxu0 %v6457_v13  ;;  %3631 = vmatprep.subr.bf16.mxu1 %v6460_v19  ;;  %v6527_v13 = vld [vmem:[%s8572_s3 + $0x3e0] ss:$48 sps:$4 sm:$0xff]   ;;  %v6530_v19 = vld [vmem:[%s8572_s3 + $0x3e8] ss:$48 sps:$4 sm:$0xff]  }
 0xad0   : > { %3618 = vmatprep.mubr.bf16.mxu0 %v7141_v45  ;;  %3661 = vmatprep.mubr.bf16.mxu1 %v7141_v45 }
 0xad2   : > { %3589 = vmatpush1.bf16.msra.mxu0 %v6455_v22  ;;  %3632 = vmatpush1.bf16.msra.mxu1 %v6458_v6  ;;  %v6535_v22 = vld [vmem:[%s8572_s3 + $0x384] ss:$48 sps:$4 sm:$0xff]   ;;  %v6538_v6 = vld [vmem:[%s8572_s3 + $0x38c] ss:$48 sps:$4 sm:$0xff]  }
 0xad3   : > { %3590 = vmatprep.subr.bf16.mxu0 %v6463_v16  ;;  %3633 = vmatprep.subr.bf16.mxu1 %v6466_v18  ;;  %v6533_v16 = vld [vmem:[%s8572_s3 + $0x380] ss:$48 sps:$4 sm:$0xff]   ;;  %v6536_v18 = vld [vmem:[%s8572_s3 + $0x388] ss:$48 sps:$4 sm:$0xff]  }
 0xad6   : > { %3591 = vmatpush1.bf16.msra.mxu0 %v6461_v21  ;;  %3634 = vmatpush1.bf16.msra.mxu1 %v6464_v23  ;;  %v6541_v21 = vld [vmem:[%s8572_s3 + $0x324] ss:$48 sps:$4 sm:$0xff]   ;;  %v6544_v23 = vld [vmem:[%s8572_s3 + $0x32c] ss:$48 sps:$4 sm:$0xff]  }
 0xad7   : > { %3592 = vmatprep.subr.bf16.mxu0 %v6469_v24  ;;  %3635 = vmatprep.subr.bf16.mxu1 %v6472_v25  ;;  %v6539_v24 = vld [vmem:[%s8572_s3 + $0x320] ss:$48 sps:$4 sm:$0xff]   ;;  %v6542_v25 = vld [vmem:[%s8572_s3 + $0x328] ss:$48 sps:$4 sm:$0xff]  }
 0xada   : > { %3593 = vmatpush1.bf16.msra.mxu0 %v6467_v26  ;;  %3636 = vmatpush1.bf16.msra.mxu1 %v6470_v27 }
 0xadb   : > { %3594 = vmatprep.subr.bf16.mxu0 %v6475_v29  ;;  %3637 = vmatprep.subr.bf16.mxu1 %v6478_v32 }
 0xade   : > { %3595 = vmatpush1.bf16.msra.mxu0 %v6473_v58  ;;  %3638 = vmatpush1.bf16.msra.mxu1 %v6476_v35 }
 0xadf   : > { %3596 = vmatprep.subr.bf16.mxu0 %v6481_v37  ;;  %3639 = vmatprep.subr.bf16.mxu1 %v6484_v38  ;;  %v2956_v37 = vld [vmem:[#allocation7 + $0xc] sm:$0xff] }
 0xae0   : > { %v2975_v9 = vrot.slane %v2956_v37, %v7793_v55 }
 0xae2   : > { %3597 = vmatpush1.bf16.msra.mxu0 %v6479_v28  ;;  %3640 = vmatpush1.bf16.msra.mxu1 %v6482_v30  ;;  %v2979_v28 = vrot.slane %v2956_v37, %v829_v0 }
 0xae3   : > { %3598 = vmatprep.subr.bf16.mxu0 %v6487_v39  ;;  %3641 = vmatprep.subr.bf16.mxu1 %v6490_v34 }
 0xae6   : > { %3599 = vmatpush1.bf16.msra.mxu0 %v6485_v36  ;;  %3642 = vmatpush1.bf16.msra.mxu1 %v6488_v40 }
 0xae7   : > { %3600 = vmatprep.subr.bf16.mxu0 %v6493_v41  ;;  %3643 = vmatprep.subr.bf16.mxu1 %v6496_v43  ;;  %v2963_v43 = vrot.slane %v2956_v37, %v7765_v17 }
 0xaea   : > { %3601 = vmatpush1.bf16.msra.mxu0 %v6491_v44  ;;  %3644 = vmatpush1.bf16.msra.mxu1 %v6494_v48 }
 0xaeb   : > { %3672 = vmatprep.subr.bf16.mxu0 %v6499_v50  ;;  %3715 = vmatprep.subr.bf16.mxu1 %v6502_v51  ;;  %v2983_v50 = vrot.slane %v2956_v37, %v833_v20 }
 0xaed   : > { %3619 = vmatmul.mubr.bf16.vlgmr.msra.gmra.mxu0 %v8114_v10  ;;  %3662 = vmatmul.mubr.bf16.vlgmr.msra.gmra.mxu1 %v8114_v10 }
 0xaee   : > { %3673 = vmatpush1.bf16.msra.mxu0 %v6497_v52  ;;  %3716 = vmatpush1.bf16.msra.mxu1 %v6500_v53 }
 0xaef   : > { %3674 = vmatprep.subr.bf16.mxu0 %v6505_v1  ;;  %3717 = vmatprep.subr.bf16.mxu1 %v6508_v54 }
 0xaf0   : > { %3704 = vmatprep.mubr.bf16.mxu0 %v7141_v45  ;;  %3747 = vmatprep.mubr.bf16.mxu1 %v7141_v45 }
 0xaf2   : > { %3675 = vmatpush1.bf16.msra.mxu0 %v6503_v56  ;;  %3718 = vmatpush1.bf16.msra.mxu1 %v6506_v57  ;;  %v2967_v57 = vrot.slane %v2956_v37, %v7773_v31 }
 0xaf3   : > { %3676 = vmatprep.subr.bf16.mxu0 %v6511_v59  ;;  %3719 = vmatprep.subr.bf16.mxu1 %v6514_v2  ;;  %v2987_v2 = vrot.slane %v2956_v37, %v837_v33 }
 0xaf6   : > { %3677 = vmatpush1.bf16.msra.mxu0 %v6509_v61  ;;  %3720 = vmatpush1.bf16.msra.mxu1 %v6512_v62 }
 0xaf7   : > { %3678 = vmatprep.subr.bf16.mxu0 %v6517_v63  ;;  %3721 = vmatprep.subr.bf16.mxu1 %v6520_v7 }
 0xafa   : > { %3679 = vmatpush1.bf16.msra.mxu0 %v6515_v8  ;;  %3722 = vmatpush1.bf16.msra.mxu1 %v6518_v47  ;;  %v2971_v47 = vrot.slane %v2956_v37, %v7783_v42 }
 0xafb   : > { %3680 = vmatprep.subr.bf16.mxu0 %v6523_v11  ;;  %3723 = vmatprep.subr.bf16.mxu1 %v6526_v49  ;;  %v2991_v49 = vrot.slane %v2956_v37, %v841_v46 }
 0xafe   : > { %3681 = vmatpush1.bf16.msra.mxu0 %v6521_v4  ;;  %3724 = vmatpush1.bf16.msra.mxu1 %v6524_v14 }
 0xaff   : > { %3682 = vmatprep.subr.bf16.mxu0 %v6529_v12  ;;  %3725 = vmatprep.subr.bf16.mxu1 %v6532_v15 }
 0xb02   : > { %3683 = vmatpush1.bf16.msra.mxu0 %v6527_v13  ;;  %3726 = vmatpush1.bf16.msra.mxu1 %v6530_v19  ;;  %v8330_v13 = vld [vmem:[#allocation7 + $0x14] sm:$0xf] }
 0xb03   : > { %3684 = vmatprep.subr.bf16.mxu0 %v6535_v22  ;;  %3727 = vmatprep.subr.bf16.mxu1 %v6538_v6  ;;  %v2999_v22 = vrot.slane %v8330_v13, %v7773_v31  ;;  %v2995_v6 = vrot.slane %v8330_v13, %v7765_v17 }
 0xb06   : > { %3685 = vmatpush1.bf16.msra.mxu0 %v6533_v16  ;;  %3728 = vmatpush1.bf16.msra.mxu1 %v6536_v18 }
 0xb07   : > { %3686 = vmatprep.subr.bf16.mxu0 %v6541_v21  ;;  %3729 = vmatprep.subr.bf16.mxu1 %v6544_v23 }
 0xb0a   : > { %3687 = vmatpush1.bf16.msra.mxu0 %v6539_v24  ;;  %3730 = vmatpush1.bf16.msra.mxu1 %v6542_v25 }
 0xb0b   : > { %5962 = vmatprep.subr.bf16.mxu0 %v7142_v3  ;;  %5968 = vmatprep.subr.bf16.mxu1 %v7142_v3 }
 0xb0d   : > { %3705 = vmatmul.mubr.bf16.vlgmr.msra.gmra.mxu0 %v8114_v10  ;;  %3748 = vmatmul.mubr.bf16.vlgmr.msra.gmra.mxu1 %v8114_v10 }
 0xb0e   : > { %5964 = vmatprep.mubr.msk.bf16.mxu0 %vm7143_vm0, %v7142_v3  ;;  %5970 = vmatprep.mubr.msk.bf16.mxu1 %vm7143_vm0, %v7142_v3 }
 0xb8d   : > { %v3534_v26 = vpop.f32.mrf.mxu0  ;;  %v3577_v29 = vpop.f32.mrf.mxu1 }
 0xb8e   : > { %v3535_v0 = vadd.f32 %v3534_v26, %v2963_v43  ;;  %v3578_v14 = vadd.f32 %v3577_v29, %v2971_v47 }
 0xb8f   : > { %v3536_v27 = vpop.f32.mrf.mxu0  ;;  %v3579_v58 = vpop.f32.mrf.mxu1 }
 0xb90   : > { %v3537_v62 = vadd.f32 %v3536_v27, %v2967_v57  ;;  %v3580_v23 = vadd.f32 %v3579_v58, %v2975_v9 }
 0xb91   : > { %v3538_v32 = vpop.f32.mrf.mxu0  ;;  %v3581_v30 = vpop.f32.mrf.mxu1 }
 0xb92   : > { %v3539_v51 = vadd.f32 %v3538_v32, %v2963_v43  ;;  %v3582_v33 = vadd.f32 %v3581_v30, %v2971_v47 }
 0xb93   : > { %v3540_v35 = vpop.f32.mrf.mxu0  ;;  %v3583_v40 = vpop.f32.mrf.mxu1 }
 0xb94   : > { %v3758_v54 = vpack.c.bf16 %v3539_v51, %v3535_v0  ;;  %v3541_v20 = vadd.f32 %v3540_v35, %v2967_v57  ;;  %v3982_v15 = vpack.c.bf16 %v3582_v33, %v3578_v14  ;;  %v3584_v16 = vadd.f32 %v3583_v40, %v2975_v9 }
 0xb96   : > { %v3870_v7 = vpack.c.bf16 %v3541_v20, %v3537_v62  ;;  %v4094_v27 = vpack.c.bf16 %v3584_v16, %v3580_v23 }
 0xbad   : > { %v3620_v38 = vpop.f32.mrf.mxu0  ;;  %v3663_v44 = vpop.f32.mrf.mxu1 }
 0xbae   : > { %v3621_v34 = vadd.f32 %v3620_v38, %v2979_v28  ;;  %v3664_v63 = vadd.f32 %v3663_v44, %v2987_v2 }
 0xbaf   : > { %v3622_v39 = vpop.f32.mrf.mxu0  ;;  %v3665_v53 = vpop.f32.mrf.mxu1 }
 0xbb0   : > { %v3623_v1 = vadd.f32 %v3622_v39, %v2983_v50  ;;  %v3666_v12 = vadd.f32 %v3665_v53, %v2991_v49 }
 0xbb1   : > { %v3624_v10 = vpop.f32.mrf.mxu0  ;;  %v3667_v59 = vpop.f32.mrf.mxu1 }
 0xbb2   : > { %v3625_v36 = vadd.f32 %v3624_v10, %v2979_v28  ;;  %v3668_v61 = vadd.f32 %v3667_v59, %v2987_v2 }
 0xbb3   : > { %v3626_v48 = vpop.f32.mrf.mxu0  ;;  %v3669_v11 = vpop.f32.mrf.mxu1 }
 0xbb4   : > { %v3759_v41 = vpack.c.bf16 %v3625_v36, %v3621_v34  ;;  %v3627_v52 = vadd.f32 %v3626_v48, %v2983_v50  ;;  %v3983_v8 = vpack.c.bf16 %v3668_v61, %v3664_v63  ;;  %v3670_v4 = vadd.f32 %v3669_v11, %v2991_v49 }
 0xbb6   : > { %5963 = vmatpush3.bf16.xpose.msra.mxu0 %v3759_v41  ;;  %v3871_v56 = vpack.c.bf16 %v3627_v52, %v3623_v1  ;;  %v4095_v19 = vpack.c.bf16 %v3670_v4, %v3666_v12 }
 0xbb7   : > { %5974 = vmatprep.subr.bf16.mxu0 %v7142_v3 }
 0xbbd   : > { %5965 = vmatmul.mubr.bf16.vlgmr.msra.gmra.mxu0 %v3758_v54 }
 0xbbe   : > { %5975 = vmatpush3.bf16.xpose.msra.mxu0 %v3871_v56  ;;  %5976 = vmatprep.mubr.msk.bf16.mxu0 %vm7143_vm0, %v7142_v3 }
 0xbbf   : > { %5986 = vmatprep.subr.bf16.mxu0 %v7142_v3 }
 0xbc5   : > { %5977 = vmatmul.mubr.bf16.vlgmr.msra.gmra.mxu0 %v3870_v7 }
 0xbc6   : > { %5987 = vmatpush3.bf16.xpose.msra.mxu0 %v3983_v8  ;;  %5988 = vmatprep.mubr.msk.bf16.mxu0 %vm7143_vm0, %v7142_v3 }
 0xbc7   : > { %5998 = vmatprep.subr.bf16.mxu0 %v7142_v3 }
 0xbcd   : > { %v3706_v46 = vpop.f32.mrf.mxu0  ;;  %5989 = vmatmul.mubr.bf16.vlgmr.msra.gmra.mxu0 %v3982_v15 }
 0xbce   : > { %5999 = vmatpush3.bf16.xpose.msra.mxu0 %v4095_v19  ;;  %6000 = vmatprep.mubr.msk.bf16.mxu0 %vm7143_vm0, %v7142_v3  ;;  %v3707_v25 = vadd.f32 %v3706_v46, %v2995_v6 }
 0xbcf   : > { %v3708_v18 = vpop.f32.mrf.mxu0 }
 0xbd0   : > { %v8339_v21 = vadd.f32 %v3708_v18, %v2999_v22 }
 0xbd1   : > { %v3710_v24 = vpop.f32.mrf.mxu0 }
 0xbd2   : > { %v3711_v26 = vadd.f32 %v3710_v24, %v2995_v6 }
 0xbd3   : > { %v3712_v29 = vpop.f32.mrf.mxu0 }
 0xbd4   : > { %v3760_v32 = vpack.c.bf16 %v3711_v26, %v3707_v25  ;;  %v8341_v35 = vadd.f32 %v3712_v29, %v2999_v22 }
 0xbd5   : > { %6001 = vmatmul.mubr.bf16.vlgmr.msra.gmra.mxu0 %v4094_v27 }
 0xbd6   : > { %v3872_v37 = vpack.c.bf16 %v8341_v35, %v8339_v21  ;;  %5969 = vmatpush3.bf16.msra.mxu1 %v3760_v32 }
 0xbd7   : > { %5980 = vmatprep.subr.bf16.mxu1 %v7142_v3 }
 0xc7d   : > { %v3795_v38 = vpop.f32.mrf.mxu0 }
 0xc7e   : > { %v3802_v28 = vsel %vm1653_vm1, %v3795_v38, -inf }
 0xc7f   : > { %3803 = vmax.xlane.f32.xlu0 %v3802_v28  ;;  %v5966_v58 = vpop.f32.mrf.mxu0 }
 0xc81   : > { %v3798_v30 = vpop.f32.mrf.mxu0 }
 0xc82   : > { %v3805_v39 = vsel %vm1653_vm1, %v3798_v30, -inf }
 0xc83   : > { %3806 = vmax.xlane.f32.xlu1 %v3805_v39  ;;  %v5967_v10 = vpop.f32.mrf.mxu0 }
 0xc85   : > { %v3907_v34 = vpop.f32.mrf.mxu0 }
 0xc86   : > { %v3914_v36 = vsel %vm1653_vm1, %v3907_v34, -inf }
 0xc87   : > { %3915 = vmax.xlane.f32.xlu0 %v3914_v36  ;;  %v5978_v40 = vpop.f32.mrf.mxu0 }
 0xc89   : > { %v3910_v41 = vpop.f32.mrf.mxu0 }
 0xc8a   : > { %v3917_v43 = vsel %vm1653_vm1, %v3910_v41, -inf }
 0xc8b   : > { %3918 = vmax.xlane.f32.xlu1 %v3917_v43  ;;  %v5979_v44 = vpop.f32.mrf.mxu0 }
 0xc8d   : > { %v4019_v48 = vpop.f32.mrf.mxu0 }
 0xc8e   : > { %v4026_v50 = vsel %vm1653_vm1, %v4019_v48, -inf }
 0xc8f   : > { %4027 = vmax.xlane.f32.xlu0 %v4026_v50  ;;  %v5990_v51 = vpop.f32.mrf.mxu0  ;;  %v6546_v50 = vld [vmem:[%s8574_s5 + $0x138] sm:$0xff]  }
 0xc90   : > { %v6547_v51 = vld [vmem:[%s8574_s5 + $0x170] sm:$0xff]  }
 0xc91   : > { %v4022_v52 = vpop.f32.mrf.mxu0 }
 0xc92   : > { %v4029_v0 = vsel %vm1653_vm1, %v4022_v52, -inf }
 0xc93   : > { %4030 = vmax.xlane.f32.xlu1 %v4029_v0  ;;  %v5991_v53 = vpop.f32.mrf.mxu0  ;;  %v6549_v0 = vld [vmem:[%s8574_s5 + $0x168] sm:$0xff]  }
 0xc94   : > { %v6550_v53 = vld [vmem:[%s8574_s5 + $0x128] sm:$0xff]  }
 0xc95   : > { %v4131_v1 = vpop.f32.mrf.mxu0 }
 0xc96   : > { %v4138_v54 = vsel %vm1653_vm1, %v4131_v1, -inf }
 0xc97   : > { %4139 = vmax.xlane.f32.xlu0 %v4138_v54  ;;  %v6002_v56 = vpop.f32.mrf.mxu0  ;;  %v6552_v54 = vld [vmem:[%s8574_s5 + $0x120] sm:$0xff]  }
 0xc99   : > { %v4134_v57 = vpop.f32.mrf.mxu0 }
 0xc9a   : > { %v4141_v59 = vsel %vm1653_vm1, %v4134_v57, -inf }
 0xc9b   : > { %4142 = vmax.xlane.f32.xlu1 %v4141_v59  ;;  %v6003_v2 = vpop.f32.mrf.mxu0 }
 0xd08   : > { %v3804_v20 = vpop.xlane.xlu0 %3803 }
 0xd09   : > { %v3808_v61 = vsub.f32 %v3795_v38, %v3804_v20  ;;  %v3749_v20 = vpop.f32.mrf.mxu1 }
 0xd0b   : > { %v3810_v62 = vmul.f32 1.442695, %v3808_v61 }
 0xd0c   : > { %v3807_v63 = vpop.xlane.xlu1 %3806 }
 0xd0d   : > { %6669 = vpow2.f32 %v3810_v62  ;;  %v3809_v7 = vsub.f32 %v3798_v30, %v3807_v63 }
 0xd0f   : > { %v3812_v8 = vmul.f32 1.442695, %v3809_v7  ;;  %v3751_v7 = vpop.f32.mrf.mxu1 }
 0xd10   : > { %v3916_v47 = vpop.xlane.xlu0 %3915 }
 0xd11   : > { %6671 = vpow2.f32 %v3812_v8  ;;  %v3920_v11 = vsub.f32 %v3907_v34, %v3916_v47 }
 0xd13   : > { %v3922_v49 = vmul.f32 1.442695, %v3920_v11 }
 0xd14   : > { %v3919_v33 = vpop.xlane.xlu1 %3918 }
 0xd15   : > { %6673 = vpow2.f32 %v3922_v49  ;;  %v3921_v4 = vsub.f32 %v3910_v41, %v3919_v33  ;;  %v3753_v33 = vpop.f32.mrf.mxu1 }
 0xd17   : > { %v3924_v14 = vmul.f32 1.442695, %v3921_v4  ;;  %v3755_v21 = vpop.f32.mrf.mxu1 }
 0xd18   : > { %v4028_v12 = vpop.xlane.xlu0 %4027 }
 0xd19   : > { %6675 = vpow2.f32 %v3924_v14  ;;  %v4032_v15 = vsub.f32 %v4019_v48, %v4028_v12  ;;  %v6545_v48 = vld [vmem:[%s8574_s5 + $0x178] sm:$0xff]   ;;  %v3003_v14 = vrot.slane %v8330_v13, %v7783_v42 }
 0xd1a   : > { %v8354_v19 = vpop.eup %6669  ;;  %5848 = vmatprep.subr.bf16.mxu0 %v6545_v48  ;;  %v6564_v48 = vld [vmem:[%s8574_s5 + $0x1a8] sm:$0xff]  }
 0xd1b   : > { %v4034_v22 = vmul.f32 1.442695, %v4032_v15  ;;  %v3814_v9 = vsel %vm1653_vm1, %v8354_v19, 0.0  ;;  %5849 = vmatpush3.bf16.msra.mxu0 %v6546_v50  ;;  %v6565_v50 = vld [vmem:[%s8574_s5 + $0x140] sm:$0xff]  }
 0xd1c   : > { %v4031_v46 = vpop.xlane.xlu1 %4030  ;;  %3815 = vadd.xlane.f32.xlu0 %v3814_v9  ;;  %5850 = vmatprep.subr.bf16.mxu0 %v6547_v51  ;;  %v6566_v51 = vld [vmem:[%s8574_s5 + $0x1e0] sm:$0xff]  }
 0xd1d   : > { %6677 = vpow2.f32 %v4034_v22  ;;  %v4033_v6 = vsub.f32 %v4022_v52, %v4031_v46  ;;  %v6548_v52 = vld [vmem:[%s8574_s5 + $0x130] sm:$0xff]   ;;  %v3750_v46 = vadd.f32 %v3749_v20, %v3003_v14  ;;  %v6576_v20 = vld [vmem:[%s8574_s5 + $0x180] sm:$0xff]  }
 0xd1e   : > { %v6672_v16 = vpop.eup %6671 }
 0xd1f   : > { %v4036_v18 = vmul.f32 1.442695, %v4033_v6  ;;  %v3817_v23 = vsel %vm1653_vm1, %v6672_v16, 0.0  ;;  %5851 = vmatpush3.bf16.msra.mxu0 %v6548_v52  ;;  %v6567_v52 = vld [vmem:[%s8574_s5 + $0x100] sm:$0xff]  }
 0xd20   : > { %v4140_v24 = vpop.xlane.xlu0 %4139  ;;  %3818 = vadd.xlane.f32.xlu1 %v3817_v23  ;;  %5852 = vmatprep.subr.bf16.mxu0 %v6549_v0  ;;  %v6568_v0 = vld [vmem:[%s8574_s5 + $0x1a0] sm:$0xff]  }
 0xd21   : > { %6679 = vpow2.f32 %v4036_v18  ;;  %v4144_v25 = vsub.f32 %v4131_v1, %v4140_v24  ;;  %v6551_v1 = vld [vmem:[%s8574_s5 + $0x160] sm:$0xff]  }
 0xd22   : > { %v8359_v26 = vpop.eup %6673 }
 0xd23   : > { %v4146_v27 = vmul.f32 1.442695, %v4144_v25  ;;  %v3926_v29 = vsel %vm1653_vm1, %v8359_v26, 0.0  ;;  %5853 = vmatpush3.bf16.msra.mxu0 %v6550_v53  ;;  %v6569_v53 = vld [vmem:[%s8574_s5 + $0x1d8] sm:$0xff]  }
 0xd24   : > { %3927 = vadd.xlane.f32.xlu0 %v3926_v29  ;;  %v4143_v32 = vpop.xlane.xlu1 %4142  ;;  %5854 = vmatprep.subr.bf16.mxu0 %v6551_v1  ;;  %v6570_v1 = vld [vmem:[%s8574_s5 + $0x198] sm:$0xff]  }
 0xd25   : > { %6681 = vpow2.f32 %v4146_v27  ;;  %v4145_v38 = vsub.f32 %v4134_v57, %v4143_v32 }
 0xd26   : > { %v8363_v28 = vpop.eup %6675 }
 0xd27   : > { %v4148_v58 = vmul.f32 1.442695, %v4145_v38  ;;  %v3929_v30 = vsel %vm1653_vm1, %v8363_v28, 0.0  ;;  %5855 = vmatpush3.bf16.msra.mxu0 %v6552_v54  ;;  %v6571_v54 = vld [vmem:[%s8574_s5 + $0x1d0] sm:$0xff]  }
 0xd28   : > { %3930 = vadd.xlane.f32.xlu1 %v3929_v30  ;;  %v6554_v30 = vld [vmem:[%s8574_s5 + $0x1f8] sm:$0xff]  }
 0xd29   : > { %6683 = vpow2.f32 %v4148_v58  ;;  %v6553_v58 = vld [vmem:[%s8574_s5 + $0x158] sm:$0xff]  }
 0xd2a   : > { %v8367_v39 = vpop.eup %6677  ;;  %5856 = vmatprep.subr.bf16.mxu0 %v6553_v58 }
 0xd2b   : > { %v4038_v10 = vsel %vm1653_vm1, %v8367_v39, 0.0 }
 0xd2c   : > { %4039 = vadd.xlane.f32.xlu0 %v4038_v10  ;;  %v6557_v10 = vld [vmem:[%s8574_s5 + $0x150] sm:$0xff]  }
 0xd2e   : > { %v8371_v34 = vpop.eup %6679 }
 0xd2f   : > { %v4041_v36 = vsel %vm1653_vm1, %v8371_v34, 0.0 }
 0xd30   : > { %4042 = vadd.xlane.f32.xlu1 %v4041_v36  ;;  %v6559_v36 = vld [vmem:[%s8574_s5 + $0x110] sm:$0xff]  }
 0xd32   : > { %v8375_v40 = vpop.eup %6681 }
 0xd33   : > { %v4150_v41 = vsel %vm1653_vm1, %v8375_v40, 0.0 }
 0xd34   : > { %4151 = vadd.xlane.f32.xlu0 %v4150_v41  ;;  %v6561_v41 = vld [vmem:[%s8574_s5 + $0x148] sm:$0xff]  }
 0xd36   : > { %v8379_v43 = vpop.eup %6683 }
 0xd37   : > { %v4153_v44 = vsel %vm1653_vm1, %v8379_v43, 0.0 }
 0xd38   : > { %4154 = vadd.xlane.f32.xlu1 %v4153_v44  ;;  %v6563_v44 = vld [vmem:[%s8574_s5 + $0x108] sm:$0xff]  }
 0xda5   : > { %v3816_v56 = vpop.xlane.xlu0 %3815 }
 0xda6   : > { %6685 = vrcp.f32 %v3816_v56  ;;  %v6572_v56 = vld [vmem:[%s8574_s5 + $0x190] sm:$0xff]  }
 0xda9   : > { %v3819_v57 = vpop.xlane.xlu1 %3818 }
 0xdaa   : > { %6687 = vrcp.f32 %v3819_v57  ;;  %v6573_v57 = vld [vmem:[%s8574_s5 + $0x1c8] sm:$0xff]  }
 0xdad   : > { %v3928_v59 = vpop.xlane.xlu0 %3927 }
 0xdae   : > { %6689 = vrcp.f32 %v3928_v59  ;;  %v6574_v59 = vld [vmem:[%s8574_s5 + $0x188] sm:$0xff]  }
 0xdb1   : > { %v3931_v2 = vpop.xlane.xlu1 %3930 }
 0xdb2   : > { %6691 = vrcp.f32 %v3931_v2  ;;  %v6575_v2 = vld [vmem:[%s8574_s5 + $0x1c0] sm:$0xff]  }
 0xdb3   : > { %v6686_v61 = vpop.eup %6685 }
 0xdb4   : > { %v3822_v8 = vmul.f32 %v6686_v61, %v8354_v19  ;;  %v3754_v19 = vadd.f32 %v3753_v33, %v3003_v14 }
 0xdb5   : > { %v4040_v62 = vpop.xlane.xlu0 %4039 }
 0xdb6   : > { %6693 = vrcp.f32 %v4040_v62 }
 0xdb7   : > { %v6688_v63 = vpop.eup %6687 }
 0xdb8   : > { %v3823_v47 = vmul.f32 %v6688_v63, %v6672_v16  ;;  %v3984_v16 = vpack.c.bf16 %v3754_v19, %v3750_v46 }
 0xdb9   : > { %v4043_v11 = vpop.xlane.xlu1 %4042 }
 0xdba   : > { %6695 = vrcp.f32 %v4043_v11  ;;  %v3824_v49 = vpack.c.bf16 %v3823_v47, %v3822_v8 }
 0xdbb   : > { %v6690_v4 = vpop.eup %6689 }
 0xdbc   : > { %5971 = vmatmul.mubr.msk.bf16.vlgmr.msra.gmra.mxu1 %vm1653_vm1, %v3824_v49  ;;  %v3934_v22 = vmul.f32 %v6690_v4, %v8359_v26 }
 0xdbd   : > { %5981 = vmatpush3.bf16.msra.mxu1 %v3872_v37  ;;  %v4152_v12 = vpop.xlane.xlu0 %4151  ;;  %5982 = vmatprep.mubr.msk.bf16.mxu1 %vm7143_vm0, %v7142_v3  ;;  %v3007_v37 = vrot.slane %v8330_v13, %v7793_v55 }
 0xdbe   : > { %5992 = vmatprep.subr.bf16.mxu1 %v7142_v3  ;;  %6697 = vrcp.f32 %v4152_v12 }
 0xdbf   : > { %v6692_v15 = vpop.eup %6691  ;;  %v3756_v23 = vadd.f32 %v3755_v21, %v3007_v37  ;;  %v3752_v26 = vadd.f32 %v3751_v7, %v3007_v37 }
 0xdc0   : > { %v3935_v9 = vmul.f32 %v6692_v15, %v8363_v28 }
 0xdc1   : > { %v4155_v6 = vpop.xlane.xlu1 %4154  ;;  %v4096_v29 = vpack.c.bf16 %v3756_v23, %v3752_v26 }
 0xdc2   : > { %6699 = vrcp.f32 %v4155_v6  ;;  %v3936_v42 = vpack.c.bf16 %v3935_v9, %v3934_v22 }
 0xdc3   : > { %v6694_v35 = vpop.eup %6693 }
 0xdc4   : > { %5983 = vmatmul.mubr.msk.bf16.vlgmr.msra.gmra.mxu1 %vm1653_vm1, %v3936_v42  ;;  %v4046_v24 = vmul.f32 %v6694_v35, %v8367_v39  ;;  %v6556_v39 = vld [vmem:[%s8574_s5 + $0x1b8] sm:$0xff]  }
 0xdc5   : > { %5993 = vmatpush3.bf16.msra.mxu1 %v3984_v16  ;;  %5994 = vmatprep.mubr.msk.bf16.mxu1 %vm7143_vm0, %v7142_v3 }
 0xdc6   : > { %6004 = vmatprep.subr.bf16.mxu1 %v7142_v3 }
 0xdc7   : > { %v6696_v18 = vpop.eup %6695 }
 0xdc8   : > { %v4047_v25 = vmul.f32 %v6696_v18, %v8371_v34  ;;  %v6558_v34 = vld [vmem:[%s8574_s5 + $0x1f0] sm:$0xff]  }
 0xdca   : > { %v4048_v27 = vpack.c.bf16 %v4047_v25, %v4046_v24 }
 0xdcb   : > { %v6698_v32 = vpop.eup %6697 }
 0xdcc   : > { %5995 = vmatmul.mubr.msk.bf16.vlgmr.msra.gmra.mxu1 %vm1653_vm1, %v4048_v27  ;;  %v4158_v13 = vmul.f32 %v6698_v32, %v8375_v40  ;;  %v6560_v40 = vld [vmem:[%s8574_s5 + $0x1b0] sm:$0xff]   ;;  %v5701_v32 = vld [vmem:[#allocation8 + $0x1] ss:$0 sm:$0xff] }
 0xdcd   : > { %6005 = vmatpush3.bf16.msra.mxu1 %v4096_v29  ;;  %6006 = vmatprep.mubr.msk.bf16.mxu1 %vm7143_vm0, %v7142_v3  ;;  %v6555_v3 = vld [vmem:[%s8574_s5 + $0x118] sm:$0xff]  }
 0xdce   : > { %5870 = vmatprep.subr.bf16.mxu1 %v6554_v30  ;;  %5857 = vmatpush3.bf16.msra.mxu0 %v6555_v3 }
 0xdcf   : > { %v6700_v55 = vpop.eup %6699  ;;  %5858 = vmatprep.subr.bf16.mxu0 %v6557_v10  ;;  %v6579_v10 = vld [vmem:[#allocation13 + $0xf4] ss:$8 sps:$4 sm:$0xff]  }
 0xdd0   : > { %v4159_v38 = vmul.f32 %v6700_v55, %v8379_v43  ;;  %v6562_v43 = vld [vmem:[%s8574_s5 + $0x1e8] sm:$0xff]  }
 0xdd2   : > { %v4160_v28 = vpack.c.bf16 %v4159_v38, %v4158_v13  ;;  %5859 = vmatpush3.bf16.msra.mxu0 %v6559_v36 }
 0xdd3   : > { %5860 = vmatprep.subr.bf16.mxu0 %v6561_v41 }
 0xdd4   : > { %6007 = vmatmul.mubr.msk.bf16.vlgmr.msra.gmra.mxu1 %vm1653_vm1, %v4160_v28 }
 0xdd5   : > { %5871 = vmatpush3.bf16.msra.mxu1 %v6556_v39  ;;  %v6577_v39 = vld [vmem:[#allocation13 + $0xf0] ss:$8 sps:$4 sm:$0xff]  }
 0xdd6   : > { %5872 = vmatprep.subr.bf16.mxu1 %v6558_v34  ;;  %5861 = vmatpush3.bf16.msra.mxu0 %v6563_v44 }
 0xdd7   : > { %5862 = vmatprep.subr.bf16.mxu0 %v6565_v50  ;;  %v6580_v50 = vld [vmem:[#allocation13 + $0xe0] ss:$8 sps:$4 sm:$0xff]  }
 0xdd9   : > { %5873 = vmatpush3.bf16.msra.mxu1 %v6560_v40 }
 0xdda   : > { %5874 = vmatprep.subr.bf16.mxu1 %v6562_v43  ;;  %5863 = vmatpush3.bf16.msra.mxu0 %v6567_v52  ;;  %v6583_v52 = vld [vmem:[#allocation13 + $0xd0] ss:$8 sps:$4 sm:$0xff]  }
 0xddb   : > { %4710 = vmatprep.subr.bf16.mxu0 %v6579_v10 }
 0xddd   : > { %5875 = vmatpush3.bf16.msra.mxu1 %v6564_v48  ;;  %v6582_v48 = vld [vmem:[#allocation13 + $0xe4] ss:$8 sps:$4 sm:$0xff]  }
 0xdde   : > { %5876 = vmatprep.subr.bf16.mxu1 %v6566_v51  ;;  %v6585_v51 = vld [vmem:[#allocation13 + $0xd4] ss:$8 sps:$4 sm:$0xff]  }
 0xde1   : > { %5877 = vmatpush3.bf16.msra.mxu1 %v6568_v0  ;;  %v6586_v0 = vld [vmem:[#allocation13 + $0xc0] ss:$8 sps:$4 sm:$0xff]  }
 0xde2   : > { %5878 = vmatprep.subr.bf16.mxu1 %v6569_v53  ;;  %v6588_v53 = vld [vmem:[#allocation13 + $0xc4] ss:$8 sps:$4 sm:$0xff]  }
 0xde5   : > { %5879 = vmatpush3.bf16.msra.mxu1 %v6570_v1  ;;  %v6591_v1 = vld [vmem:[#allocation13 + $0xb4] ss:$8 sps:$4 sm:$0xff]  }
 0xde6   : > { %5880 = vmatprep.subr.bf16.mxu1 %v6571_v54  ;;  %v6589_v54 = vld [vmem:[#allocation13 + $0xb0] ss:$8 sps:$4 sm:$0xff]  }
 0xde9   : > { %5881 = vmatpush3.bf16.msra.mxu1 %v6572_v56  ;;  %v6594_v56 = vld [vmem:[#allocation13 + $0xa4] ss:$8 sps:$4 sm:$0xff]  }
 0xdea   : > { %5882 = vmatprep.subr.bf16.mxu1 %v6573_v57  ;;  %v6592_v57 = vld [vmem:[#allocation13 + $0xa0] ss:$8 sps:$4 sm:$0xff]  }
 0xded   : > { %5883 = vmatpush3.bf16.msra.mxu1 %v6574_v59  ;;  %v6597_v59 = vld [vmem:[#allocation13 + $0x94] ss:$8 sps:$4 sm:$0xff]  }
 0xdee   : > { %5884 = vmatprep.subr.bf16.mxu1 %v6575_v2  ;;  %v6595_v2 = vld [vmem:[#allocation13 + $0x90] ss:$8 sps:$4 sm:$0xff]  }
 0xdf1   : > { %5885 = vmatpush3.bf16.msra.mxu1 %v6576_v20  ;;  %v6600_v20 = vld [vmem:[#allocation13 + $0x84] ss:$8 sps:$4 sm:$0xff]  }
 0xe7c   : > { %v3862_v61 = vpop.f32.mrf.mxu1 }
 0xe7e   : > { %v5972_v62 = vpop.f32.mrf.mxu1 }
 0xe80   : > { %v3865_v63 = vpop.f32.mrf.mxu1 }
 0xe81   : > { %v3869_v33 = vpack.c.bf16 %v3865_v63, %v3862_v61  ;;  %v6598_v61 = vld [vmem:[#allocation13 + $0x80] ss:$8 sps:$4 sm:$0xff]  }
 0xe82   : > { %v5973_v7 = vpop.f32.mrf.mxu1 }
 0xe84   : > { %v3974_v8 = vpop.f32.mrf.mxu1 }
 0xe86   : > { %v5984_v47 = vpop.f32.mrf.mxu1 }
 0xe88   : > { %v3977_v11 = vpop.f32.mrf.mxu1 }
 0xe89   : > { %v3981_v49 = vpack.c.bf16 %v3977_v11, %v3974_v8 }
 0xe8a   : > { %v5985_v4 = vpop.f32.mrf.mxu1 }
 0xe8b   : > { %4495 = vmatprep.mubr.bf16.mxu0 %v3981_v49  ;;  %v5702_v4 = vld [vmem:[#allocation10 + $0x1] ss:$0 sm:$0xff] }
 0xe8c   : > { %v4086_v14 = vpop.f32.mrf.mxu1  ;;  %4496 = vmatmul.mubr.bf16.vlgmr.msra.gmra.mxu0 %v3869_v33 }
 0xe8d   : > { %4742 = vmatprep.mubr.bf16.mxu0 %v7141_v45  ;;  %4711 = vmatpush1.bf16.msra.mxu0 %v6577_v39 }
 0xe8e   : > { %v5996_v12 = vpop.f32.mrf.mxu1  ;;  %4712 = vmatprep.subr.bf16.mxu0 %v6582_v48 }
 0xe90   : > { %v4089_v15 = vpop.f32.mrf.mxu1 }
 0xe91   : > { %v4093_v42 = vpack.c.bf16 %v4089_v15, %v4086_v14  ;;  %4713 = vmatpush1.bf16.msra.mxu0 %v6580_v50 }
 0xe92   : > { %v5997_v19 = vpop.f32.mrf.mxu1  ;;  %4714 = vmatprep.subr.bf16.mxu0 %v6585_v51 }
 0xe93   : > { %v5703_v19 = vld [vmem:[#allocation11 + $0x1] ss:$0 sm:$0xff] }
 0xe94   : > { %v4198_v22 = vpop.f32.mrf.mxu1 }
 0xe95   : > { %4715 = vmatpush1.bf16.msra.mxu0 %v6583_v52 }
 0xe96   : > { %v6008_v9 = vpop.f32.mrf.mxu1  ;;  %4716 = vmatprep.subr.bf16.mxu0 %v6588_v53 }
 0xe98   : > { %v4201_v46 = vpop.f32.mrf.mxu1 }
 0xe99   : > { %v4205_v6 = vpack.c.bf16 %v4201_v46, %v4198_v22  ;;  %4717 = vmatpush1.bf16.msra.mxu0 %v6586_v0 }
 0xe9a   : > { %v6009_v16 = vpop.f32.mrf.mxu1  ;;  %4718 = vmatprep.subr.bf16.mxu0 %v6591_v1 }
 0xe9b   : > { %4536 = vmatprep.mubr.bf16.mxu1 %v4205_v6  ;;  %v6602_v16 = vld [vmem:[#allocation16 + $0xb8] sm:$0xff]  }
 0xe9c   : > { %4537 = vmatmul.mubr.bf16.vlgmr.msra.gmra.mxu1 %v4093_v42  ;;  %v6601_v42 = vld [vmem:[#allocation16 + $0xf8] sm:$0xff]  }
 0xe9d   : > { %4719 = vmatpush1.bf16.msra.mxu0 %v6589_v54  ;;  %5892 = vmatprep.subr.bf16.mxu1 %v6601_v42 }
 0xe9e   : > { %4720 = vmatprep.subr.bf16.mxu0 %v6594_v56  ;;  %5893 = vmatpush3.bf16.msra.mxu1 %v6602_v16 }
 0xea1   : > { %4721 = vmatpush1.bf16.msra.mxu0 %v6592_v57 }
 0xea2   : > { %4722 = vmatprep.subr.bf16.mxu0 %v6597_v59 }
 0xea5   : > { %4723 = vmatpush1.bf16.msra.mxu0 %v6595_v2 }
 0xea6   : > { %4724 = vmatprep.subr.bf16.mxu0 %v6600_v20 }
 0xea9   : > { %4725 = vmatpush1.bf16.msra.mxu0 %v6598_v61 }
 0xf4c   : > { %v5864_v21 = vpop.f32.mrf.mxu0 }
 0xf4e   : > { %v5865_v35 = vpop.f32.mrf.mxu0 }
 0xf4f   : > { %v5866_v24 = vadd.f32 %v5865_v35, %v5864_v21  ;;  %v6603_v21 = vld [vmem:[#allocation16 + $0xf0] sm:$0xff]  }
 0xf50   : > { %v5867_v37 = vpop.f32.mrf.mxu0  ;;  %v6604_v35 = vld [vmem:[#allocation16 + $0xb0] sm:$0xff]   ;;  %5894 = vmatprep.subr.bf16.mxu1 %v6603_v21 }
 0xf51   : > { %5895 = vmatpush3.bf16.msra.mxu1 %v6604_v35 }
 0xf52   : > { %v5868_v26 = vpop.f32.mrf.mxu0 }
 0xf53   : > { %v5869_v55 = vadd.f32 %v5868_v26, %v5867_v37  ;;  %v6605_v37 = vld [vmem:[#allocation16 + $0xe8] sm:$0xff]   ;;  %v6610_v26 = vld [vmem:[#allocation16 + $0x98] sm:$0xff]  }
 0xf54   : > { %5896 = vmatprep.subr.bf16.mxu1 %v6605_v37  ;;  %v5720_v37 = vld [vmem:[#allocation17 + $0x1] ss:$0 sm:$0xff] }
 0xf5c   : > { %v5886_v18 = vpop.f32.mrf.mxu1 }
 0xf5e   : > { %v5887_v23 = vpop.f32.mrf.mxu1 }
 0xf5f   : > { %v5888_v25 = vadd.f32 %v5887_v23, %v5886_v18  ;;  %v6606_v18 = vld [vmem:[#allocation16 + $0xa8] sm:$0xff]   ;;  %v6607_v23 = vld [vmem:[#allocation16 + $0xe0] sm:$0xff]  }
 0xf60   : > { %v5889_v45 = vpop.f32.mrf.mxu1  ;;  %5897 = vmatpush3.bf16.msra.mxu1 %v6606_v18 }
 0xf61   : > { %v4539_v27 = vadd.f32 %v5888_v25, %v5866_v24  ;;  %v6608_v24 = vld [vmem:[#allocation16 + $0xa0] sm:$0xff]   ;;  %5898 = vmatprep.subr.bf16.mxu1 %v6607_v23  ;;  %v6609_v25 = vld [vmem:[#allocation16 + $0xd8] sm:$0xff]  }
 0xf62   : > { %v5890_v29 = vpop.f32.mrf.mxu1 }
 0xf63   : > { %v4545_v13 = vadd.f32 %v4539_v27, %v7987_v60  ;;  %v5891_v38 = vadd.f32 %v5890_v29, %v5889_v45  ;;  %v6611_v45 = vld [vmem:[#allocation16 + $0xd0] sm:$0xff]   ;;  %v6613_v29 = vld [vmem:[#allocation16 + $0xc8] sm:$0xff]  }
 0xf64   : > { %5899 = vmatpush3.bf16.msra.mxu1 %v6608_v24  ;;  %v6612_v27 = vld [vmem:[#allocation16 + $0x90] sm:$0xff]  }
 0xf65   : > { %v4542_v28 = vadd.f32 %v5891_v38, %v5869_v55  ;;  %v8507_v58 = vadd.f32 %v5701_v32, %v4545_v13  ;;  %5900 = vmatprep.subr.bf16.mxu1 %v6609_v25  ;;  %v6615_v55 = vld [vmem:[#allocation16 + $0xc0] sm:$0xff]   ;;  %v4618_v38 = vld [vmem:[#allocation14 + $0x2] sm:$0x3] }
 0xf66   : > { %v6616_v13 = vld [vmem:[#allocation16 + $0x80] sm:$0xff]  }
 0xf67   : > { %v4546_v30 = vadd.f32 %v4542_v28, %v7991_v5  ;;  %4561 = vadd.xlane.f32.xlu0 %v8507_v58  ;;  %v4623_v28 = vrot.slane %v4618_v38, %v7765_v17 }
 0xf68   : > { %5901 = vmatpush3.bf16.msra.mxu1 %v6610_v26 }
 0xf69   : > { %v8511_v3 = vadd.f32 %v5701_v32, %v4546_v30  ;;  %5902 = vmatprep.subr.bf16.mxu1 %v6611_v45  ;;  %v6614_v32 = vld [vmem:[#allocation16 + $0x88] sm:$0xff]   ;;  %v4627_v30 = vrot.slane %v4618_v38, %v7773_v31 }
 0xf6b   : > { %4563 = vadd.xlane.f32.xlu1 %v8511_v3 }
 0xf6c   : > { %5903 = vmatpush3.bf16.msra.mxu1 %v6612_v27 }
 0xf6d   : > { %5904 = vmatprep.subr.bf16.mxu1 %v6613_v29 }
 0xf70   : > { %5905 = vmatpush3.bf16.msra.mxu1 %v6614_v32 }
 0xf71   : > { %5906 = vmatprep.subr.bf16.mxu1 %v6615_v55 }
 0xf74   : > { %5907 = vmatpush3.bf16.msra.mxu1 %v6616_v13 }
 0xff0   : > { %v4562_v34 = vpop.xlane.xlu0 %4561 }
 0xff1   : > { %v4565_v36 = vmul.f32 0.0078125, %v4562_v34 }
 0xff3   : > { %v4567_v60 = vsub.f32 %v8507_v58, %v4565_v36 }
 0xff4   : > { %v4564_v40 = vpop.xlane.xlu1 %4563 }
 0xff5   : > { %v4566_v41 = vmul.f32 0.0078125, %v4564_v40  ;;  %v4569_v43 = vmul.f32 %v4567_v60, %v4567_v60 }
 0xff7   : > { %v4568_v44 = vsub.f32 %v8511_v3, %v4566_v41  ;;  %4571 = vadd.xlane.f32.xlu0 %v4569_v43 }
 0xff9   : > { %v4570_v5 = vmul.f32 %v4568_v44, %v4568_v44 }
 0xffb   : > { %4573 = vadd.xlane.f32.xlu1 %v4570_v5 }
0x1080   : > { %v4572_v62 = vpop.xlane.xlu0 %4571 }
0x1081   : > { %v4575_v63 = vmul.f32 0.0078125, %v4572_v62 }
0x1083   : > { %v4577_v7 = vadd.f32 1e-06, %v4575_v63 }
0x1084   : > { %v4574_v8 = vpop.xlane.xlu1 %4573 }
0x1085   : > { %6701 = vrsqrt.f32 %v4577_v7  ;;  %v4576_v47 = vmul.f32 0.0078125, %v4574_v8 }
0x1087   : > { %v4578_v11 = vadd.f32 1e-06, %v4576_v47 }
0x1089   : > { %6703 = vrsqrt.f32 %v4578_v11 }
0x1092   : > { %v6702_v49 = vpop.eup %6701 }
0x1093   : > { %v4581_v33 = vmul.f32 %v6702_v49, %v4567_v60 }
0x1095   : > { %v4589_v15 = vmul.f32 %v5702_v4, %v4581_v33 }
0x1096   : > { %v6704_v14 = vpop.eup %6703 }
0x1097   : > { %v4582_v12 = vmul.f32 %v6704_v14, %v4568_v44  ;;  %v4597_v9 = vadd.f32 %v5703_v19, %v4589_v15 }
0x1099   : > { %v4590_v22 = vmul.f32 %v5702_v4, %v4582_v12 }
0x109b   : > { %v4598_v46 = vadd.f32 %v5703_v19, %v4590_v22 }
0x109d   : > { %v4599_v6 = vpack.c.bf16 %v4598_v46, %v4597_v9 }
0x109f   : > { %4743 = vmatmul.mubr.bf16.vlgmr.msra.gmra.mxu0 %v4599_v6 }
0x115f   : > { %v4744_v39 = vpop.f32.mrf.mxu0 }
0x1160   : > { %v4745_v10 = vadd.f32 %v4744_v39, %v4623_v28 }
0x1161   : > { %v4746_v34 = vpop.f32.mrf.mxu0 }
0x1162   : > { %v4757_v36 = vmul.f32 0.044715, %v4745_v10  ;;  %v4747_v60 = vadd.f32 %v4746_v34, %v4627_v30  ;;  %v4753_v22 = vmul.f32 0.5, %v4745_v10 }
0x1163   : > { %v4748_v40 = vpop.f32.mrf.mxu0 }
0x1164   : > { %v4761_v41 = vmul.f32 %v4757_v36, %v4745_v10  ;;  %v4758_v43 = vmul.f32 0.044715, %v4747_v60  ;;  %v4749_v44 = vadd.f32 %v4748_v40, %v4623_v28  ;;  %v4754_v12 = vmul.f32 0.5, %v4747_v60 }
0x1165   : > { %v4750_v5 = vpop.f32.mrf.mxu0 }
0x1166   : > { %v4765_v48 = vmul.f32 %v4761_v41, %v4745_v10  ;;  %v4762_v50 = vmul.f32 %v4758_v43, %v4747_v60  ;;  %v4759_v51 = vmul.f32 0.044715, %v4749_v44  ;;  %v4751_v52 = vadd.f32 %v4750_v5, %v4627_v30 }
0x1167   : > { %v4755_v4 = vmul.f32 0.5, %v4749_v44 }
0x1168   : > { %v4769_v0 = vadd.f32 %v4765_v48, %v4745_v10  ;;  %v4766_v53 = vmul.f32 %v4762_v50, %v4747_v60  ;;  %v4763_v1 = vmul.f32 %v4759_v51, %v4749_v44  ;;  %v4760_v17 = vmul.f32 0.044715, %v4751_v52  ;;  %v5738_v48 = vld [vmem:[#allocation20] ss:$0 sm:$0xff] }
0x1169   : > { %v4756_v15 = vmul.f32 0.5, %v4751_v52 }
0x116a   : > { %v4767_v54 = vmul.f32 %v4763_v1, %v4749_v44  ;;  %v4764_v31 = vmul.f32 %v4760_v17, %v4751_v52  ;;  %v4770_v56 = vadd.f32 %v4766_v53, %v4747_v60  ;;  %v4773_v57 = vmul.f32 0.7978846, %v4769_v0 }
0x116c   : > { %v4771_v59 = vadd.f32 %v4767_v54, %v4749_v44  ;;  %v4768_v2 = vmul.f32 %v4764_v31, %v4751_v52  ;;  %v4774_v20 = vmul.f32 0.7978846, %v4770_v56  ;;  %v5737_v44 = vld [vmem:[#allocation19] ss:$0 sm:$0xff] }
0x116e   : > { %v4775_v61 = vmul.f32 0.7978846, %v4771_v59  ;;  %v4772_v62 = vadd.f32 %v4768_v2, %v4751_v52  ;;  %6705 = vtanh.f32 %v4774_v20 }
0x116f   : > { %6707 = vtanh.f32 %v4773_v57 }
0x1170   : > { %6709 = vtanh.f32 %v4775_v61  ;;  %v4776_v63 = vmul.f32 0.7978846, %v4772_v62 }
0x1172   : > { %6711 = vtanh.f32 %v4776_v63 }
0x117b   : > { %v6706_v7 = vpop.eup %6705 }
0x117c   : > { %v6708_v8 = vpop.eup %6707  ;;  %v4782_v11 = vadd.f32 1.0, %v6706_v7 }
0x117d   : > { %v6710_v47 = vpop.eup %6709  ;;  %v4781_v14 = vadd.f32 1.0, %v6708_v8 }
0x117e   : > { %v4783_v49 = vadd.f32 1.0, %v6710_v47  ;;  %v4786_v46 = vmul.f32 %v4782_v11, %v4754_v12 }
0x117f   : > { %v6712_v33 = vpop.eup %6711  ;;  %v4785_v42 = vmul.f32 %v4781_v14, %v4753_v22 }
0x1180   : > { %v4784_v19 = vadd.f32 1.0, %v6712_v33  ;;  %v4787_v9 = vmul.f32 %v4783_v49, %v4755_v4 }
0x1182   : > { %v4788_v6 = vmul.f32 %v4784_v19, %v4756_v15  ;;  %v4789_v21 = vpack.c.bf16 %v4787_v9, %v4785_v42 }
0x1184   : > { %v4790_v16 = vpack.c.bf16 %v4788_v6, %v4786_v46 }
0x1186   : > { %4960 = vmatprep.mubr.bf16.mxu1 %v4790_v16 }
0x1187   : > { %4961 = vmatmul.mubr.bf16.vlgmr.msra.gmra.mxu1 %v4789_v21 }
0x1247   : > { %v5908_v35 = vpop.f32.mrf.mxu1 }
0x1249   : > { %v5909_v18 = vpop.f32.mrf.mxu1 }
0x124a   : > { %v5910_v23 = vadd.f32 %v5909_v18, %v5908_v35 }
0x124b   : > { %v5911_v24 = vpop.f32.mrf.mxu1 }
0x124c   : > { %v4963_v25 = vadd.f32 %v5910_v23, %v5720_v37 }
0x124d   : > { %v5912_v26 = vpop.f32.mrf.mxu1 }
0x124e   : > { %v5913_v45 = vadd.f32 %v5912_v26, %v5911_v24  ;;  %v4969_v27 = vadd.f32 %v4963_v25, %v8507_v58 }
0x1250   : > { %v4966_v29 = vadd.f32 %v5913_v45, %v5720_v37  ;;  %4973 = vadd.xlane.f32.xlu0 %v4969_v27 }
0x1252   : > { %v4970_v32 = vadd.f32 %v4966_v29, %v8511_v3 }
0x1254   : > { %4975 = vadd.xlane.f32.xlu1 %v4970_v32 }
0x12d9   : > { %v4974_v55 = vpop.xlane.xlu0 %4973 }
0x12da   : > { %v4977_v13 = vmul.f32 0.0078125, %v4974_v55 }
0x12dc   : > { %v4979_v38 = vsub.f32 %v4969_v27, %v4977_v13 }
0x12dd   : > { %v4976_v28 = vpop.xlane.xlu1 %4975 }
0x12de   : > { %v4978_v30 = vmul.f32 0.0078125, %v4976_v28  ;;  %v4981_v39 = vmul.f32 %v4979_v38, %v4979_v38 }
0x12e0   : > { %v4980_v10 = vsub.f32 %v4970_v32, %v4978_v30  ;;  %4983 = vadd.xlane.f32.xlu0 %v4981_v39 }
0x12e2   : > { %v4982_v34 = vmul.f32 %v4980_v10, %v4980_v10 }
0x12e4   : > { %4985 = vadd.xlane.f32.xlu1 %v4982_v34 }
0x1369   : > { %v4984_v36 = vpop.xlane.xlu0 %4983 }
0x136a   : > { %v4987_v60 = vmul.f32 0.0078125, %v4984_v36 }
0x136c   : > { %v4989_v40 = vadd.f32 1e-06, %v4987_v60 }
0x136d   : > { %v4986_v58 = vpop.xlane.xlu1 %4985 }
0x136e   : > { %6713 = vrsqrt.f32 %v4989_v40  ;;  %v4988_v41 = vmul.f32 0.0078125, %v4986_v58 }
0x1370   : > { %v4990_v3 = vadd.f32 1e-06, %v4988_v41 }
0x1372   : > { %6715 = vrsqrt.f32 %v4990_v3 }
0x137b   : > { %v6714_v43 = vpop.eup %6713 }
0x137c   : > { %v4993_v5 = vmul.f32 %v6714_v43, %v4979_v38 }
0x137e   : > { %v5001_v50 = vmul.f32 %v5737_v44, %v4993_v5 }
0x137f   : > { %v6716_v51 = vpop.eup %6715 }
0x1380   : > { %v5009_v52 = vadd.f32 %v5738_v48, %v5001_v50  ;;  %v4994_v0 = vmul.f32 %v6716_v51, %v4980_v10 }
0x1382   : > { %v5002_v53 = vmul.f32 %v5737_v44, %v4994_v0  ;;  %5011 = vst [vmem:[%s658_s16] sm:$0xff] %v5009_v52 }
0x1384   : > { %v5010_v1 = vadd.f32 %v5738_v48, %v5002_v53 }
0x1386   : > { %5012 = vst [vmem:[%s658_s16 + $0x8] sm:$0xff] %v5010_v1 }
0x1387   : > { %7042 = shalt.err (!%p7039_p3)
}
0x1388   : > { %s7043_s23 = scalar_lea.hbm %s8525_s21, 256  ;;  %s7047_s29 = scalar_lea.hbm %s8634_s2, 512 }
0x1389   : > { %p7044_p1 = scmp.ne.s32.totalorder %s8525_s21, %s7043_s23  ;;  %p7048_p4 = scmp.lt.s32.totalorder %s8525_s21, %s8634_s2 }
0x138a   : > { %p7049_p9 = scmp.lt.s32.totalorder %s7047_s29, %s7043_s23 }
0x138b   : > { %p7045_p2 = pnand %p7044_p1, %p8635_p6 }
0x138c   : > { %p7050_p8 = por %p7049_p9, %p7048_p4 }
0x138d   : > { %p7046_p7 = pneg %p7045_p2 }
0x138f   : > { %p7051_p13 = pnand %p7050_p8, %p7046_p7 }
0x1391   : > { %7054 = shalt.err (!%p7051_p13)
}
0x1392   : > { %s7145_s16 = smov 128   ;;  %s7146_s25 = smov 8  }
0x1393   : > { %6058 = dma.vmem_to_hbm [thread:$0]  (%p8635_p6), %s8527_s27, 256, %s8525_s21, %s8529_s20, %s7145_s16, %s7145_s16, %s7146_s25  }
0x1394 PF: > { %s8636_s26 = sld [smem:[#allocation33_spill]] }
0x1395   : > { %s8637_s15 = sld [smem:[#allocation31_spill]] }
0x1396   : > { %s8638_s22 = sld [smem:[#allocation36_spill]] }
0x139a   : > { %p6125_p5 = scmp.ge.s32.totalorder %s8636_s26, 2 }
0x139b   : > { %s5042_s24 = sand.u32 1, %s8637_s15  }
0x139c   : > { %p8639_p10 = scmp.ne.s32.totalorder %s8638_s22, 0  ;;  %s5043_s30 = scalar_lea.sflag [#allocation4], %s5042_s24 }
0x139e   : > { %p6098_p12 = pnand %p6125_p5, %p8639_p10 }
0x13a0   : > { %p6099_p11 = pneg %p6098_p12 }
0x13a2   : > { %7100 = dma.done.wait (%p6099_p11), %s5043_s30, 256  }
0x13a3   : > { %7102 = vsyncadd (%p6099_p11), %s5043_s30, 4294967040  ;;  %s8640_s21 = sld [smem:[#allocation34_spill]]  ;;  %s8643_s18 = smov %s7109_s19 }
0x13a4   : > { %s8641_s23 = sld [smem:[#allocation32_spill]] }
0x13a5   : > { %s8642_s20 = sld [smem:[#allocation35_spill]] }
0x13a9   : > { %p32_p0 = scmp.ge.s32.totalorder %s8640_s21, 4  }
0x13aa   : > { %s8644_s19 = smov %s8641_s23 }
0x13ab   :  { %34 = sbr.rel (!%p32_p0) target bundleno = 15 (0xf), region = 176 }
0x13b0   :  { %5048 = vsyncpa [#allocation3], 1 }
0x13b1   :  { %5050 = vsyncpa [#allocation3 + $0x1], 1 }
0x13b2   :  { %5051 = vsyncpa [#allocation6], 1 }
0x13b3   :  { %5052 = vsyncpa [#allocation9], 1 }
0x13b4   :  { %5053 = vsyncpa [#allocation12], 1 }
0x13b5   :  { %5054 = vsyncpa [#allocation15], 1 }
0x13b6   :  { %5055 = vsyncpa [#allocation18], 1 }
0x13b7   :  { %5056 = vsyncpa [#allocation21], 1 }
0x13b8   :  { %5057 = vsyncpa [#allocation4], 1 }
0x13b9   :  { %5059 = vsyncpa [#allocation4 + $0x1], 1 }

</bundles_post_ra>
